<compile_context>
chip_gen: v7x
topology: tpu7x:2x2x1
jax: 0.10.0
libtpu: 0.0.40
codegen_flags: <defaults>
</compile_context>

<pallas_src>
import jax
import jax.numpy as jnp
import numpy as np
from jax import lax
from jax.experimental import pallas as pl
from jax.experimental.pallas import tpu as pltpu

RMS_EPS = 1e-6        # RMSNorm eps (module default)
LN_EPS = 1e-5         # nn.LayerNorm default eps
PAD_ROWS = 8          # sublane-aligned zero halo on each side of the VMEM slab

# unique tap offsets of the 4 convs (PyTorch 'same' zero padding)
ALL_OFFSETS = (-3, -2, -1, 0, 1, 2, 3)
BRANCH_OFFSETS = (
    (0,),                  # conv1: k=1
    (-1, 0, 1),            # conv2: k=3
    (-3, 0, 3),            # conv3: k=3, dilation=3
    (-2, -1, 0, 1, 2),     # conv4: k=5
)
NUM_OFFS = len(ALL_OFFSETS)
NUM_BRANCH = len(BRANCH_OFFSETS)


def _encoder_kernel(
    x_ref,          # [N, E]   N = TB*L rows (batch-major), f32 residual source
    wpack_ref,      # [7E, E]  packed conv weights (columns = concat of branches)
    bpack_ref,      # [1, E]   packed conv biases (f32)
    rmsw_ref,       # [1, E]   RMSNorm weight tiled x4 (f32)
    gsum_ref,       # [E, 4]   per-branch mean-of-squares reducer (1/F block diag)
    gbcast_ref,     # [4, E]   per-branch broadcast indicator
    ln_w_ref,       # [1, E]
    ln_b_ref,       # [1, E]
    se_w1t_ref,     # [L, L4]  SENET linear1 weight, transposed
    se_b1_ref,      # [1, L4]
    se_w2t_ref,     # [L4, L]  SENET linear2 weight, transposed
    se_b2_ref,      # [1, L]
    out_ref,        # [N, E]   f32
    xpad_ref,       # VMEM scratch [N + 2*PAD_ROWS, E] f32
):
    N, E = x_ref.shape
    L = se_w1t_ref.shape[0]
    TB = N // L
    cdt = wpack_ref.dtype
    f32 = jnp.float32

    x = x_ref[...]                                            # [N, E] f32

    # ---- zero-padded slab in VMEM: every tap offset is a static shifted slice.
    # Pad rows are rewritten every step (cheap): a program_id==0-gated init
    # would leave one TensorCore's private scratch uninitialized under the
    # "parallel" megacore split on v7x.
    zpad = jnp.zeros((PAD_ROWS, E), f32)
    xpad_ref[pl.ds(0, PAD_ROWS), :] = zpad
    xpad_ref[pl.ds(PAD_ROWS + N, PAD_ROWS), :] = zpad
    xpad_ref[pl.ds(PAD_ROWS, N), :] = x

    # per-row position inside its length-L sequence (masks cross-sequence taps)
    pos = lax.broadcasted_iota(jnp.int32, (N, 1), 0) % L

    # ---- all 4 convs + branch concat: unrolled per-tap matmul accumulation ----
    # (no materialized [N, 7E] im2col slab, no cross-lane concat; operands are
    #  masked in f32 and cast to the compute dtype only at the MXU boundary)
    acc = None
    for idx, off in enumerate(ALL_OFFSETS):
        if off == 0:
            xs = x
        else:
            xs = xpad_ref[pl.ds(PAD_ROWS + off, N), :]
            valid = jnp.logical_and(pos + off >= 0, pos + off < L)
            xs = jnp.where(valid, xs, 0.0)
        part = jnp.dot(xs.astype(cdt), wpack_ref[idx * E:(idx + 1) * E, :],
                       preferred_element_type=f32)
        acc = part if acc is None else acc + part
    acc = acc + bpack_ref[...]                                # [N, E] == [N, 4F]

    # ---- per-branch RMSNorm (lane-dense selector matmuls; no reshape/concat) --
    ms = jnp.dot(acc * acc, gsum_ref[...],
                 preferred_element_type=f32)                  # [N, 4] per-branch E[x^2]
    inv = lax.rsqrt(ms + RMS_EPS)
    inv_full = jnp.dot(inv, gbcast_ref[...],
                       preferred_element_type=f32)            # [N, E]
    cat = acc * inv_full * rmsw_ref[...]

    # TODO(synk): nn.Dropout layers are identity here (eval-mode forward).

    # ---- LayerNorm over E + residual (stats via narrow MXU reductions) ----
    ln_red = jnp.full((E, 1), 1.0 / E, f32)
    mean = jnp.dot(cat, ln_red, preferred_element_type=f32)   # [N, 1]
    msq = jnp.dot(cat * cat, ln_red, preferred_element_type=f32)
    var = jnp.maximum(msq - mean * mean, 0.0)
    y = (cat - mean) * lax.rsqrt(var + LN_EPS) * ln_w_ref[...] + ln_b_ref[...]
    y = y + x                                                 # residual in f32

    # ---- SENET gate over the sequence dim (selectors generated in-kernel) ----
    s_col = jnp.dot(y, ln_red, preferred_element_type=f32)    # [N, 1] mean over E

    col_l = lax.broadcasted_iota(jnp.int32, (N, L), 1)
    fsel = (col_l == pos).astype(f32)                         # [N, L]: n%L == l
    n_col = lax.broadcasted_iota(jnp.int32, (TB, N), 1)
    lo = lax.broadcasted_iota(jnp.int32, (TB, N), 0) * L
    esel = jnp.logical_and(n_col >= lo, n_col < lo + L).astype(f32)      # [TB, N]
    n_row = lax.broadcasted_iota(jnp.int32, (N, TB), 0)
    lo_t = lax.broadcasted_iota(jnp.int32, (N, TB), 1) * L
    eselt = jnp.logical_and(n_row >= lo_t, n_row < lo_t + L).astype(f32)  # [N, TB]

    s_rows = jnp.dot(esel, s_col * fsel,
                     preferred_element_type=f32)              # [TB, L]
    h = jnp.maximum(
        jnp.dot(s_rows, se_w1t_ref[...], preferred_element_type=f32)
        + se_b1_ref[...], 0.0)                                # [TB, L4]
    g_rows = jax.nn.sigmoid(
        jnp.dot(h, se_w2t_ref[...], preferred_element_type=f32)
        + se_b2_ref[...])                                     # [TB, L]
    ones_l = jnp.full((L, 1), 1.0, f32)
    g_col = jnp.dot(jnp.dot(eselt, g_rows, preferred_element_type=f32) * fsel,
                    ones_l, preferred_element_type=f32)       # [N, 1] scatter via MXU

    out_ref[...] = (y * g_col).astype(out_ref.dtype)


def _choose_block_batch(B, L, target_rows):
    """Batch elements per grid step: biggest divisor of B keeping TB*L rows near
    target_rows, with TB*L a multiple of 8, preferring an even number of grid
    steps (v7x's two TensorCores) and >= 2 steps (pipelining)."""
    divisors = [d for d in range(1, B + 1) if B % d == 0]
    aligned = [d for d in divisors if (d * L) % 8 == 0]
    cand = aligned if aligned else [B]           # full-array block is always legal
    even = [d for d in cand if (B // d) % 2 == 0]
    multi = [d for d in cand if (B // d) >= 2]
    cand = even or multi or cand
    target = max(1, target_rows // L)
    under = [d for d in cand if d <= target]
    return max(under) if under else min(cand)


def _pack_conv(params, E, F, dtype):
    """Pack all branch weights into one [7E, 4F] matrix (zero rows where a
    branch has no tap at that offset) + packed bias [1, 4F]."""
    ws = (params["w1"], params["w2"], params["w3"], params["w4"])
    bs = (params["b1"], params["b2"], params["b3"], params["b4"])
    wpack = jnp.zeros((NUM_OFFS * E, NUM_BRANCH * F), jnp.float32)
    for g, (w, offs) in enumerate(zip(ws, BRANCH_OFFSETS)):
        for t, off in enumerate(offs):
            i = ALL_OFFSETS.index(off)
            wpack = wpack.at[i * E:(i + 1) * E, g * F:(g + 1) * F].set(
                w[t].astype(jnp.float32))
    bpack = jnp.concatenate([b.reshape(1, F).astype(jnp.float32) for b in bs],
                            axis=-1)
    return wpack.astype(dtype), bpack


def _vmem_capacity_bytes():
    try:
        return int(pltpu.get_tpu_info().vmem_capacity_bytes)
    except Exception:
        return 64 * 1024 * 1024   # conservative: v7x physical VMEM per core


def encoder_forward(x, params, *, compute_dtype=jnp.float32, target_rows=512):
    B, L, E = x.shape
    F = E // NUM_BRANCH
    L4 = params["se_w1"].shape[0]
    f32 = jnp.float32

    TB = _choose_block_batch(B, L, target_rows)
    G = B // TB
    N = TB * L

    # residual source / output stay f32; only matmul operands use compute_dtype
    x2d = x.reshape(B * L, E).astype(f32)

    wpack, bpack = _pack_conv(params, E, F, compute_dtype)
    rmsw = jnp.tile(params["rms_w"].reshape(1, F).astype(f32), (1, NUM_BRANCH))

    # group-selector constants for the fused per-branch RMSNorm
    gid = np.arange(E) // F
    gsum = jnp.asarray((gid[:, None] == np.arange(NUM_BRANCH)[None, :])
                       .astype(np.float32) / F)                         # [E, 4]
    gbcast = jnp.asarray((np.arange(NUM_BRANCH)[:, None] == gid[None, :])
                         .astype(np.float32))                           # [4, E]

    se_w1t = params["se_w1"].T.astype(f32)                              # [L, L4]
    se_b1 = params["se_b1"].reshape(1, L4).astype(f32)
    se_w2t = params["se_w2"].T.astype(f32)                              # [L4, L]
    se_b2 = params["se_b2"].reshape(1, L).astype(f32)
    ln_w = params["ln_w"].reshape(1, E).astype(f32)
    ln_b = params["ln_b"].reshape(1, E).astype(f32)

    # ---- device-aware VMEM budget (never above physical capacity - headroom) --
    csize = jnp.dtype(compute_dtype).itemsize
    const_bytes = (NUM_OFFS * E * E * csize
                   + (E * NUM_BRANCH + NUM_BRANCH * E + 6 * E) * 4
                   + (2 * L * L4 + L4 + L) * 4)
    block_bytes = 2 * 2 * N * E * 4                   # x + out, double-buffered
    scratch_bytes = (N + 2 * PAD_ROWS) * E * 4
    interm_bytes = (8 * N * E + 3 * N * L + 2 * TB * N) * 4
    vmem_est = const_bytes + block_bytes + scratch_bytes + interm_bytes
    cap = _vmem_capacity_bytes() - 8 * 1024 * 1024
    vmem_limit = int(min(max(2 * vmem_est, 32 * 1024 * 1024), cap))

    def run(single_buffer_consts):
        def const_spec(shape):
            index_map = lambda i, _n=len(shape): (0,) * _n
            if single_buffer_consts:
                # constants never change across the grid -> single buffer
                return pl.BlockSpec(shape, index_map, pipeline_mode=pl.Buffered(1))
            return pl.BlockSpec(shape, index_map)

        grid_spec = pltpu.PrefetchScalarGridSpec(
            num_scalar_prefetch=0,
            grid=(G,),
            in_specs=[
                pl.BlockSpec((N, E), lambda i: (i, 0)),     # x rows (TB batch elems)
                const_spec((NUM_OFFS * E, E)),              # packed conv weights (4F==E)
                const_spec((1, E)),                         # packed conv bias
                const_spec((1, E)),                         # RMSNorm weight (tiled)
                const_spec((E, NUM_BRANCH)),                # group reducer
                const_spec((NUM_BRANCH, E)),                # group broadcaster
                const_spec((1, E)), const_spec((1, E)),     # LayerNorm w, b
                const_spec((L, L4)), const_spec((1, L4)),   # SENET linear1 (W^T, b)
                const_spec((L4, L)), const_spec((1, L)),    # SENET linear2 (W^T, b)
            ],
            out_specs=pl.BlockSpec((N, E), lambda i: (i, 0)),
            scratch_shapes=[pltpu.VMEM((N + 2 * PAD_ROWS, E), f32)],
        )
        return pl.pallas_call(
            _encoder_kernel,
            out_shape=jax.ShapeDtypeStruct((B * L, E), f32),
            grid_spec=grid_spec,
            compiler_params=pltpu.CompilerParams(
                dimension_semantics=("parallel",),
                vmem_limit_bytes=vmem_limit),
        )(x2d, wpack, bpack, rmsw, gsum, gbcast, ln_w, ln_b,
          se_w1t, se_b1, se_w2t, se_b2)

    try:
        out2d = run(True)
    except Exception:
        # pipeline_mode=pl.Buffered(1) unsupported in this jax build: fall back
        # to default double-buffered constants (identical results, more VMEM).
        out2d = run(False)

    return out2d.reshape(B, L, E)


def encoder_reference(x, params):
    """Pure-JAX reference with identical math (plumbing validation)."""
    B, L, E = x.shape
    F = E // NUM_BRANCH
    maxpad = max(abs(o) for offs in BRANCH_OFFSETS for o in offs)
    xpad = jnp.pad(x, ((0, 0), (maxpad, maxpad), (0, 0)))

    def conv_rms(w, b, offsets):
        acc = jnp.zeros((B, L, F), jnp.float32)
        for t, off in enumerate(offsets):
            xs = xpad[:, maxpad + off:maxpad + off + L, :]
            acc = acc + jnp.einsum("ble,ef->blf", xs, w[t], precision="highest")
        acc = acc + b.reshape(1, 1, F)
        var = jnp.mean(acc * acc, -1, keepdims=True)
        return params["rms_w"].reshape(1, 1, F) * (acc * lax.rsqrt(var + RMS_EPS))

    c = [conv_rms(params[f"w{g+1}"], params[f"b{g+1}"], BRANCH_OFFSETS[g])
         for g in range(NUM_BRANCH)]
    cat = jnp.concatenate(c, axis=-1)
    mean = jnp.mean(cat, -1, keepdims=True)
    var = jnp.mean((cat - mean) ** 2, -1, keepdims=True)
    y = ((cat - mean) * lax.rsqrt(var + LN_EPS) * params["ln_w"].reshape(1, 1, E)
         + params["ln_b"].reshape(1, 1, E) + x)
    s = jnp.mean(y, -1)                                                   # [B, L]
    h = jnp.maximum(
        jnp.einsum("ol,bl->bo", params["se_w1"], s, precision="highest")
        + params["se_b1"][:, 0], 0.0)
    g = jax.nn.sigmoid(
        jnp.einsum("lo,bo->bl", params["se_w2"], h, precision="highest")
        + params["se_b2"][:, 0])
    return y * g[:, :, None]


if __name__ == "__main__":
    # Module uses ENV_EMBEDDING_SIZE=768, LENGTH=60; small test keeps the same
    # structure (E divisible by 4 for the branch concat, L divisible by the
    # SENET ratio 4) and a lane-dense E (multiple of 128), like production.
    B, L, E = 4, 8, 128
    F = E // NUM_BRANCH
    L4 = L // 4

    key = jax.random.PRNGKey(0)
    ks = jax.random.split(key, 12)

    def rnd(k, shape, scale=0.1):
        return (scale * jax.random.normal(k, shape)).astype(jnp.float32)

    # Conv weights stored pre-transposed as [k, E, F] (PyTorch weight is [F, E, k]).
    params = {
        "w1": rnd(ks[0], (1, E, F)), "b1": rnd(ks[1], (1, F)),
        "w2": rnd(ks[2], (3, E, F)), "b2": rnd(ks[3], (1, F)),
        "w3": rnd(ks[4], (3, E, F)), "b3": rnd(ks[5], (1, F)),
        "w4": rnd(ks[6], (5, E, F)), "b4": rnd(ks[7], (1, F)),
        "rms_w": jnp.ones((1, F), jnp.float32),        # RMSNorm init: ones
        "ln_w": jnp.ones((1, E), jnp.float32),         # LayerNorm init: ones
        "ln_b": jnp.zeros((1, E), jnp.float32),        # LayerNorm init: zeros
        "se_w1": rnd(ks[8], (L4, L)), "se_b1": rnd(ks[9], (L4, 1)),
        "se_w2": rnd(ks[10], (L, L4)), "se_b2": rnd(ks[11], (L, 1)),
    }
    x = jax.random.normal(jax.random.PRNGKey(1), (B, L, E), jnp.float32)

    ref = encoder_reference(x, params)

    # f32 matmul-operand path (tight parity)
    out = encoder_forward(x, params)
    jax.block_until_ready(out)
    np.testing.assert_allclose(np.asarray(out), np.asarray(ref),
                               rtol=2e-2, atol=2e-2)

    # bf16 matmul-operand path (recommended on v6e/v7x); residual/output stay f32.
    out_bf16 = encoder_forward(x, params, compute_dtype=jnp.bfloat16)
    jax.block_until_ready(out_bf16)
    np.testing.assert_allclose(np.asarray(out_bf16), np.asarray(ref),
                               rtol=1e-1, atol=1e-1)

    print("KERNEL_OK")
</pallas_src>

<mosaic_0001>
module attributes {stable_mosaic.version = 11 : i64} {
  func.func @_encoder_kernel(%arg0: i32, %arg1: memref<16x128xf32, #tpu.memory_space<vmem>>, %arg2: memref<896x128xf32, #tpu.memory_space<vmem>>, %arg3: memref<1x128xf32, #tpu.memory_space<vmem>>, %arg4: memref<1x128xf32, #tpu.memory_space<vmem>>, %arg5: memref<128x4xf32, #tpu.memory_space<vmem>>, %arg6: memref<4x128xf32, #tpu.memory_space<vmem>>, %arg7: memref<1x128xf32, #tpu.memory_space<vmem>>, %arg8: memref<1x128xf32, #tpu.memory_space<vmem>>, %arg9: memref<8x2xf32, #tpu.memory_space<vmem>>, %arg10: memref<1x2xf32, #tpu.memory_space<vmem>>, %arg11: memref<2x8xf32, #tpu.memory_space<vmem>>, %arg12: memref<1x8xf32, #tpu.memory_space<vmem>>, %arg13: memref<16x128xf32, #tpu.memory_space<vmem>>, %arg14: memref<32x128xf32, #tpu.memory_space<vmem>>) attributes {dimension_semantics = [#tpu.dimension_semantics<parallel>], iteration_bounds = array<i64: 2>, scalar_prefetch = 0 : i64, scratch_operands = 1 : i64, tpu.core_type = #tpu.core_type<tc>, window_params = [{transform_indices = @transform_0, window_bounds = array<i64: 16, 128>}, {pipeline_mode = #tpu.pipeline_mode<synchronous>, transform_indices = @transform_1, window_bounds = array<i64: 896, 128>}, {pipeline_mode = #tpu.pipeline_mode<synchronous>, transform_indices = @transform_2, window_bounds = array<i64: 1, 128>}, {pipeline_mode = #tpu.pipeline_mode<synchronous>, transform_indices = @transform_3, window_bounds = array<i64: 1, 128>}, {pipeline_mode = #tpu.pipeline_mode<synchronous>, transform_indices = @transform_4, window_bounds = array<i64: 128, 4>}, {pipeline_mode = #tpu.pipeline_mode<synchronous>, transform_indices = @transform_5, window_bounds = array<i64: 4, 128>}, {pipeline_mode = #tpu.pipeline_mode<synchronous>, transform_indices = @transform_6, window_bounds = array<i64: 1, 128>}, {pipeline_mode = #tpu.pipeline_mode<synchronous>, transform_indices = @transform_7, window_bounds = array<i64: 1, 128>}, {pipeline_mode = #tpu.pipeline_mode<synchronous>, transform_indices = @transform_8, window_bounds = array<i64: 8, 2>}, {pipeline_mode = #tpu.pipeline_mode<synchronous>, transform_indices = @transform_9, window_bounds = array<i64: 1, 2>}, {pipeline_mode = #tpu.pipeline_mode<synchronous>, transform_indices = @transform_10, window_bounds = array<i64: 2, 8>}, {pipeline_mode = #tpu.pipeline_mode<synchronous>, transform_indices = @transform_11, window_bounds = array<i64: 1, 8>}, {transform_indices = @transform_12, window_bounds = array<i64: 16, 128>}]} {
    %c0 = arith.constant 0 : index
    %c0_0 = arith.constant 0 : index
    %0 = vector.load %arg1[%c0, %c0_0] : memref<16x128xf32, #tpu.memory_space<vmem>>, vector<16x128xf32>
    %cst = arith.constant 0.000000e+00 : f32
    %1 = vector.broadcast %cst : f32 to vector<8x128xf32>
    %c0_1 = arith.constant 0 : index
    %c0_2 = arith.constant 0 : index
    %2 = vector.load %arg14[%c0_1, %c0_2] : memref<32x128xf32, #tpu.memory_space<vmem>>, vector<8x128xf32>
    tpu.vector_store %arg14[%c0_1, %c0_2], %1 {strides = array<i32>} : memref<32x128xf32, #tpu.memory_space<vmem>>, vector<8x128xf32>,
    %c24 = arith.constant 24 : index
    %c0_3 = arith.constant 0 : index
    %3 = vector.load %arg14[%c24, %c0_3] : memref<32x128xf32, #tpu.memory_space<vmem>>, vector<8x128xf32>
    tpu.vector_store %arg14[%c24, %c0_3], %1 {strides = array<i32>} : memref<32x128xf32, #tpu.memory_space<vmem>>, vector<8x128xf32>,
    %c8 = arith.constant 8 : index
    %c0_4 = arith.constant 0 : index
    %4 = vector.load %arg14[%c8, %c0_4] : memref<32x128xf32, #tpu.memory_space<vmem>>, vector<16x128xf32>
    tpu.vector_store %arg14[%c8, %c0_4], %0 {strides = array<i32>} : memref<32x128xf32, #tpu.memory_space<vmem>>, vector<16x128xf32>,
    %5 = tpu.iota {dimensions = array<i32: 0>} : vector<16x1xi32>
    %c8_i32 = arith.constant 8 : i32
    %c0_i32 = arith.constant 0 : i32
    %6 = arith.cmpi eq, %c8_i32, %c0_i32 : i32
    %c1_i32 = arith.constant 1 : i32
    %7 = arith.select %6, %c1_i32, %c8_i32 : i32
    %8 = vector.broadcast %7 : i32 to vector<16x1xi32>
    %9 = arith.remsi %5, %8 : vector<16x1xi32>
    %c0_i32_5 = arith.constant 0 : i32
    %10 = vector.broadcast %c0_i32_5 : i32 to vector<16x1xi32>
    %11 = arith.cmpi ne, %9, %10 : vector<16x1xi32>
    %c0_i32_6 = arith.constant 0 : i32
    %12 = vector.broadcast %c0_i32_6 : i32 to vector<16x1xi32>
    %13 = arith.cmpi slt, %9, %12 : vector<16x1xi32>
    %c0_i32_7 = arith.constant 0 : i32
    %14 = arith.cmpi slt, %7, %c0_i32_7 : i32
    %15 = vector.broadcast %14 : i1 to vector<16x1xi1>
    %16 = vector.broadcast %15 : vector<16x1xi1> to vector<16x1xi1>
    %17 = arith.xori %13, %16 : vector<16x1xi1>
    %18 = arith.andi %17, %11 : vector<16x1xi1>
    %19 = vector.broadcast %7 : i32 to vector<16x1xi32>
    %20 = arith.addi %9, %19 : vector<16x1xi32>
    %21 = arith.select %18, %20, %9 : vector<16x1xi1>, vector<16x1xi32>
    %c5 = arith.constant 5 : index
    %c0_8 = arith.constant 0 : index
    %22 = vector.load %arg14[%c5, %c0_8] : memref<32x128xf32, #tpu.memory_space<vmem>>, vector<16x128xf32>
    %c-3_i32 = arith.constant -3 : i32
    %23 = vector.broadcast %c-3_i32 : i32 to vector<16x1xi32>
    %24 = arith.addi %21, %23 : vector<16x1xi32>
    %c0_i32_9 = arith.constant 0 : i32
    %25 = vector.broadcast %c0_i32_9 : i32 to vector<16x1xi32>
    %26 = arith.cmpi sge, %24, %25 : vector<16x1xi32>
    %c-3_i32_10 = arith.constant -3 : i32
    %27 = vector.broadcast %c-3_i32_10 : i32 to vector<16x1xi32>
    %28 = arith.addi %21, %27 : vector<16x1xi32>
    %c8_i32_11 = arith.constant 8 : i32
    %29 = vector.broadcast %c8_i32_11 : i32 to vector<16x1xi32>
    %30 = arith.cmpi slt, %28, %29 : vector<16x1xi32>
    %31 = arith.andi %26, %30 : vector<16x1xi1>
    %cst_12 = arith.constant 0.000000e+00 : f32
    %32 = vector.shape_cast %31 : vector<16x1xi1> to vector<16x1xi1>
    %33 = vector.broadcast %32 : vector<16x1xi1> to vector<16x128xi1>
    %34 = vector.broadcast %cst_12 : f32 to vector<16x128xf32>
    %35 = arith.select %33, %22, %34 : vector<16x128xi1>, vector<16x128xf32>
    %c0_13 = arith.constant 0 : index
    %c0_14 = arith.constant 0 : index
    %36 = vector.load %arg2[%c0_13, %c0_14] : memref<896x128xf32, #tpu.memory_space<vmem>>, vector<128x128xf32>
    %cst_15 = arith.constant dense<0.000000e+00> : vector<16x128xf32>
    %37 = tpu.matmul %35, %36, %cst_15 {dimension_numbers = #tpu.dot_dimension_numbers<[1], [0], [0], [1], [0, 0, 1, 1], [], []>} : vector<16x128xf32>, vector<128x128xf32>, vector<16x128xf32> -> vector<16x128xf32>
    %c6 = arith.constant 6 : index
    %c0_16 = arith.constant 0 : index
    %38 = vector.load %arg14[%c6, %c0_16] : memref<32x128xf32, #tpu.memory_space<vmem>>, vector<16x128xf32>
    %c-2_i32 = arith.constant -2 : i32
    %39 = vector.broadcast %c-2_i32 : i32 to vector<16x1xi32>
    %40 = arith.addi %21, %39 : vector<16x1xi32>
    %c0_i32_17 = arith.constant 0 : i32
    %41 = vector.broadcast %c0_i32_17 : i32 to vector<16x1xi32>
    %42 = arith.cmpi sge, %40, %41 : vector<16x1xi32>
    %c-2_i32_18 = arith.constant -2 : i32
    %43 = vector.broadcast %c-2_i32_18 : i32 to vector<16x1xi32>
    %44 = arith.addi %21, %43 : vector<16x1xi32>
    %c8_i32_19 = arith.constant 8 : i32
    %45 = vector.broadcast %c8_i32_19 : i32 to vector<16x1xi32>
    %46 = arith.cmpi slt, %44, %45 : vector<16x1xi32>
    %47 = arith.andi %42, %46 : vector<16x1xi1>
    %cst_20 = arith.constant 0.000000e+00 : f32
    %48 = vector.shape_cast %47 : vector<16x1xi1> to vector<16x1xi1>
    %49 = vector.broadcast %48 : vector<16x1xi1> to vector<16x128xi1>
    %50 = vector.broadcast %cst_20 : f32 to vector<16x128xf32>
    %51 = arith.select %49, %38, %50 : vector<16x128xi1>, vector<16x128xf32>
    %c128 = arith.constant 128 : index
    %c0_21 = arith.constant 0 : index
    %52 = vector.load %arg2[%c128, %c0_21] : memref<896x128xf32, #tpu.memory_space<vmem>>, vector<128x128xf32>
    %cst_22 = arith.constant dense<0.000000e+00> : vector<16x128xf32>
    %53 = tpu.matmul %51, %52, %cst_22 {dimension_numbers = #tpu.dot_dimension_numbers<[1], [0], [0], [1], [0, 0, 1, 1], [], []>} : vector<16x128xf32>, vector<128x128xf32>, vector<16x128xf32> -> vector<16x128xf32>
    %54 = arith.addf %37, %53 : vector<16x128xf32>
    %c7 = arith.constant 7 : index
    %c0_23 = arith.constant 0 : index
    %55 = vector.load %arg14[%c7, %c0_23] : memref<32x128xf32, #tpu.memory_space<vmem>>, vector<16x128xf32>
    %c-1_i32 = arith.constant -1 : i32
    %56 = vector.broadcast %c-1_i32 : i32 to vector<16x1xi32>
    %57 = arith.addi %21, %56 : vector<16x1xi32>
    %c0_i32_24 = arith.constant 0 : i32
    %58 = vector.broadcast %c0_i32_24 : i32 to vector<16x1xi32>
    %59 = arith.cmpi sge, %57, %58 : vector<16x1xi32>
    %c-1_i32_25 = arith.constant -1 : i32
    %60 = vector.broadcast %c-1_i32_25 : i32 to vector<16x1xi32>
    %61 = arith.addi %21, %60 : vector<16x1xi32>
    %c8_i32_26 = arith.constant 8 : i32
    %62 = vector.broadcast %c8_i32_26 : i32 to vector<16x1xi32>
    %63 = arith.cmpi slt, %61, %62 : vector<16x1xi32>
    %64 = arith.andi %59, %63 : vector<16x1xi1>
    %cst_27 = arith.constant 0.000000e+00 : f32
    %65 = vector.shape_cast %64 : vector<16x1xi1> to vector<16x1xi1>
    %66 = vector.broadcast %65 : vector<16x1xi1> to vector<16x128xi1>
    %67 = vector.broadcast %cst_27 : f32 to vector<16x128xf32>
    %68 = arith.select %66, %55, %67 : vector<16x128xi1>, vector<16x128xf32>
    %c256 = arith.constant 256 : index
    %c0_28 = arith.constant 0 : index
    %69 = vector.load %arg2[%c256, %c0_28] : memref<896x128xf32, #tpu.memory_space<vmem>>, vector<128x128xf32>
    %cst_29 = arith.constant dense<0.000000e+00> : vector<16x128xf32>
    %70 = tpu.matmul %68, %69, %cst_29 {dimension_numbers = #tpu.dot_dimension_numbers<[1], [0], [0], [1], [0, 0, 1, 1], [], []>} : vector<16x128xf32>, vector<128x128xf32>, vector<16x128xf32> -> vector<16x128xf32>
    %71 = arith.addf %54, %70 : vector<16x128xf32>
    %c384 = arith.constant 384 : index
    %c0_30 = arith.constant 0 : index
    %72 = vector.load %arg2[%c384, %c0_30] : memref<896x128xf32, #tpu.memory_space<vmem>>, vector<128x128xf32>
    %cst_31 = arith.constant dense<0.000000e+00> : vector<16x128xf32>
    %73 = tpu.matmul %0, %72, %cst_31 {dimension_numbers = #tpu.dot_dimension_numbers<[1], [0], [0], [1], [0, 0, 1, 1], [], []>} : vector<16x128xf32>, vector<128x128xf32>, vector<16x128xf32> -> vector<16x128xf32>
    %74 = arith.addf %71, %73 : vector<16x128xf32>
    %c9 = arith.constant 9 : index
    %c0_32 = arith.constant 0 : index
    %75 = vector.load %arg14[%c9, %c0_32] : memref<32x128xf32, #tpu.memory_space<vmem>>, vector<16x128xf32>
    %c1_i32_33 = arith.constant 1 : i32
    %76 = vector.broadcast %c1_i32_33 : i32 to vector<16x1xi32>
    %77 = arith.addi %21, %76 : vector<16x1xi32>
    %c0_i32_34 = arith.constant 0 : i32
    %78 = vector.broadcast %c0_i32_34 : i32 to vector<16x1xi32>
    %79 = arith.cmpi sge, %77, %78 : vector<16x1xi32>
    %c1_i32_35 = arith.constant 1 : i32
    %80 = vector.broadcast %c1_i32_35 : i32 to vector<16x1xi32>
    %81 = arith.addi %21, %80 : vector<16x1xi32>
    %c8_i32_36 = arith.constant 8 : i32
    %82 = vector.broadcast %c8_i32_36 : i32 to vector<16x1xi32>
    %83 = arith.cmpi slt, %81, %82 : vector<16x1xi32>
    %84 = arith.andi %79, %83 : vector<16x1xi1>
    %cst_37 = arith.constant 0.000000e+00 : f32
    %85 = vector.shape_cast %84 : vector<16x1xi1> to vector<16x1xi1>
    %86 = vector.broadcast %85 : vector<16x1xi1> to vector<16x128xi1>
    %87 = vector.broadcast %cst_37 : f32 to vector<16x128xf32>
    %88 = arith.select %86, %75, %87 : vector<16x128xi1>, vector<16x128xf32>
    %c512 = arith.constant 512 : index
    %c0_38 = arith.constant 0 : index
    %89 = vector.load %arg2[%c512, %c0_38] : memref<896x128xf32, #tpu.memory_space<vmem>>, vector<128x128xf32>
    %cst_39 = arith.constant dense<0.000000e+00> : vector<16x128xf32>
    %90 = tpu.matmul %88, %89, %cst_39 {dimension_numbers = #tpu.dot_dimension_numbers<[1], [0], [0], [1], [0, 0, 1, 1], [], []>} : vector<16x128xf32>, vector<128x128xf32>, vector<16x128xf32> -> vector<16x128xf32>
    %91 = arith.addf %74, %90 : vector<16x128xf32>
    %c10 = arith.constant 10 : index
    %c0_40 = arith.constant 0 : index
    %92 = vector.load %arg14[%c10, %c0_40] : memref<32x128xf32, #tpu.memory_space<vmem>>, vector<16x128xf32>
    %c2_i32 = arith.constant 2 : i32
    %93 = vector.broadcast %c2_i32 : i32 to vector<16x1xi32>
    %94 = arith.addi %21, %93 : vector<16x1xi32>
    %c0_i32_41 = arith.constant 0 : i32
    %95 = vector.broadcast %c0_i32_41 : i32 to vector<16x1xi32>
    %96 = arith.cmpi sge, %94, %95 : vector<16x1xi32>
    %c2_i32_42 = arith.constant 2 : i32
    %97 = vector.broadcast %c2_i32_42 : i32 to vector<16x1xi32>
    %98 = arith.addi %21, %97 : vector<16x1xi32>
    %c8_i32_43 = arith.constant 8 : i32
    %99 = vector.broadcast %c8_i32_43 : i32 to vector<16x1xi32>
    %100 = arith.cmpi slt, %98, %99 : vector<16x1xi32>
    %101 = arith.andi %96, %100 : vector<16x1xi1>
    %cst_44 = arith.constant 0.000000e+00 : f32
    %102 = vector.shape_cast %101 : vector<16x1xi1> to vector<16x1xi1>
    %103 = vector.broadcast %102 : vector<16x1xi1> to vector<16x128xi1>
    %104 = vector.broadcast %cst_44 : f32 to vector<16x128xf32>
    %105 = arith.select %103, %92, %104 : vector<16x128xi1>, vector<16x128xf32>
    %c640 = arith.constant 640 : index
    %c0_45 = arith.constant 0 : index
    %106 = vector.load %arg2[%c640, %c0_45] : memref<896x128xf32, #tpu.memory_space<vmem>>, vector<128x128xf32>
    %cst_46 = arith.constant dense<0.000000e+00> : vector<16x128xf32>
    %107 = tpu.matmul %105, %106, %cst_46 {dimension_numbers = #tpu.dot_dimension_numbers<[1], [0], [0], [1], [0, 0, 1, 1], [], []>} : vector<16x128xf32>, vector<128x128xf32>, vector<16x128xf32> -> vector<16x128xf32>
    %108 = arith.addf %91, %107 : vector<16x128xf32>
    %c11 = arith.constant 11 : index
    %c0_47 = arith.constant 0 : index
    %109 = vector.load %arg14[%c11, %c0_47] : memref<32x128xf32, #tpu.memory_space<vmem>>, vector<16x128xf32>
    %c3_i32 = arith.constant 3 : i32
    %110 = vector.broadcast %c3_i32 : i32 to vector<16x1xi32>
    %111 = arith.addi %21, %110 : vector<16x1xi32>
    %c0_i32_48 = arith.constant 0 : i32
    %112 = vector.broadcast %c0_i32_48 : i32 to vector<16x1xi32>
    %113 = arith.cmpi sge, %111, %112 : vector<16x1xi32>
    %c3_i32_49 = arith.constant 3 : i32
    %114 = vector.broadcast %c3_i32_49 : i32 to vector<16x1xi32>
    %115 = arith.addi %21, %114 : vector<16x1xi32>
    %c8_i32_50 = arith.constant 8 : i32
    %116 = vector.broadcast %c8_i32_50 : i32 to vector<16x1xi32>
    %117 = arith.cmpi slt, %115, %116 : vector<16x1xi32>
    %118 = arith.andi %113, %117 : vector<16x1xi1>
    %cst_51 = arith.constant 0.000000e+00 : f32
    %119 = vector.shape_cast %118 : vector<16x1xi1> to vector<16x1xi1>
    %120 = vector.broadcast %119 : vector<16x1xi1> to vector<16x128xi1>
    %121 = vector.broadcast %cst_51 : f32 to vector<16x128xf32>
    %122 = arith.select %120, %109, %121 : vector<16x128xi1>, vector<16x128xf32>
    %c768 = arith.constant 768 : index
    %c0_52 = arith.constant 0 : index
    %123 = vector.load %arg2[%c768, %c0_52] : memref<896x128xf32, #tpu.memory_space<vmem>>, vector<128x128xf32>
    %cst_53 = arith.constant dense<0.000000e+00> : vector<16x128xf32>
    %124 = tpu.matmul %122, %123, %cst_53 {dimension_numbers = #tpu.dot_dimension_numbers<[1], [0], [0], [1], [0, 0, 1, 1], [], []>} : vector<16x128xf32>, vector<128x128xf32>, vector<16x128xf32> -> vector<16x128xf32>
    %125 = arith.addf %108, %124 : vector<16x128xf32>
    %c0_54 = arith.constant 0 : index
    %c0_55 = arith.constant 0 : index
    %126 = vector.load %arg3[%c0_54, %c0_55] : memref<1x128xf32, #tpu.memory_space<vmem>>, vector<1x128xf32>
    %127 = vector.broadcast %126 : vector<1x128xf32> to vector<16x128xf32>
    %128 = arith.addf %125, %127 : vector<16x128xf32>
    %129 = arith.mulf %128, %128 : vector<16x128xf32>
    %c0_56 = arith.constant 0 : index
    %c0_57 = arith.constant 0 : index
    %130 = vector.load %arg5[%c0_56, %c0_57] : memref<128x4xf32, #tpu.memory_space<vmem>>, vector<128x4xf32>
    %cst_58 = arith.constant dense<0.000000e+00> : vector<16x4xf32>
    %131 = tpu.matmul %129, %130, %cst_58 {dimension_numbers = #tpu.dot_dimension_numbers<[1], [0], [0], [1], [0, 0, 1, 1], [], []>} : vector<16x128xf32>, vector<128x4xf32>, vector<16x4xf32> -> vector<16x4xf32>
    %cst_59 = arith.constant 9.99999997E-7 : f32
    %132 = vector.broadcast %cst_59 : f32 to vector<16x4xf32>
    %133 = arith.addf %131, %132 : vector<16x4xf32>
    %134 = math.rsqrt %133 : vector<16x4xf32>
    %c0_60 = arith.constant 0 : index
    %c0_61 = arith.constant 0 : index
    %135 = vector.load %arg6[%c0_60, %c0_61] : memref<4x128xf32, #tpu.memory_space<vmem>>, vector<4x128xf32>
    %cst_62 = arith.constant dense<0.000000e+00> : vector<16x128xf32>
    %136 = tpu.matmul %134, %135, %cst_62 {dimension_numbers = #tpu.dot_dimension_numbers<[1], [0], [0], [1], [0, 0, 1, 1], [], []>} : vector<16x4xf32>, vector<4x128xf32>, vector<16x128xf32> -> vector<16x128xf32>
    %137 = arith.mulf %128, %136 : vector<16x128xf32>
    %c0_63 = arith.constant 0 : index
    %c0_64 = arith.constant 0 : index
    %138 = vector.load %arg4[%c0_63, %c0_64] : memref<1x128xf32, #tpu.memory_space<vmem>>, vector<1x128xf32>
    %139 = vector.broadcast %138 : vector<1x128xf32> to vector<16x128xf32>
    %140 = arith.mulf %137, %139 : vector<16x128xf32>
    %cst_65 = arith.constant 7.812500e-03 : f32
    %141 = vector.broadcast %cst_65 : f32 to vector<128x1xf32>
    %cst_66 = arith.constant dense<0.000000e+00> : vector<16x1xf32>
    %142 = tpu.matmul %140, %141, %cst_66 {dimension_numbers = #tpu.dot_dimension_numbers<[1], [0], [0], [1], [0, 0, 1, 1], [], []>} : vector<16x128xf32>, vector<128x1xf32>, vector<16x1xf32> -> vector<16x1xf32>
    %143 = arith.mulf %140, %140 : vector<16x128xf32>
    %cst_67 = arith.constant dense<0.000000e+00> : vector<16x1xf32>
    %144 = tpu.matmul %143, %141, %cst_67 {dimension_numbers = #tpu.dot_dimension_numbers<[1], [0], [0], [1], [0, 0, 1, 1], [], []>} : vector<16x128xf32>, vector<128x1xf32>, vector<16x1xf32> -> vector<16x1xf32>
    %145 = arith.mulf %142, %142 : vector<16x1xf32>
    %146 = arith.subf %144, %145 : vector<16x1xf32>
    %cst_68 = arith.constant 0.000000e+00 : f32
    %147 = vector.broadcast %cst_68 : f32 to vector<16x1xf32>
    %148 = arith.maximumf %146, %147 : vector<16x1xf32>
    %149 = vector.broadcast %142 : vector<16x1xf32> to vector<16x128xf32>
    %150 = arith.subf %140, %149 : vector<16x128xf32>
    %cst_69 = arith.constant 9.99999974E-6 : f32
    %151 = vector.broadcast %cst_69 : f32 to vector<16x1xf32>
    %152 = arith.addf %148, %151 : vector<16x1xf32>
    %153 = math.rsqrt %152 : vector<16x1xf32>
    %154 = vector.broadcast %153 : vector<16x1xf32> to vector<16x128xf32>
    %155 = arith.mulf %150, %154 : vector<16x128xf32>
    %c0_70 = arith.constant 0 : index
    %c0_71 = arith.constant 0 : index
    %156 = vector.load %arg7[%c0_70, %c0_71] : memref<1x128xf32, #tpu.memory_space<vmem>>, vector<1x128xf32>
    %157 = vector.broadcast %156 : vector<1x128xf32> to vector<16x128xf32>
    %158 = arith.mulf %155, %157 : vector<16x128xf32>
    %c0_72 = arith.constant 0 : index
    %c0_73 = arith.constant 0 : index
    %159 = vector.load %arg8[%c0_72, %c0_73] : memref<1x128xf32, #tpu.memory_space<vmem>>, vector<1x128xf32>
    %160 = vector.broadcast %159 : vector<1x128xf32> to vector<16x128xf32>
    %161 = arith.addf %158, %160 : vector<16x128xf32>
    %162 = arith.addf %161, %0 : vector<16x128xf32>
    %cst_74 = arith.constant dense<0.000000e+00> : vector<16x1xf32>
    %163 = tpu.matmul %162, %141, %cst_74 {dimension_numbers = #tpu.dot_dimension_numbers<[1], [0], [0], [1], [0, 0, 1, 1], [], []>} : vector<16x128xf32>, vector<128x1xf32>, vector<16x1xf32> -> vector<16x1xf32>
    %164 = tpu.iota {dimensions = array<i32: 1>} : vector<16x8xi32>
    %165 = vector.broadcast %21 : vector<16x1xi32> to vector<16x8xi32>
    %166 = arith.cmpi eq, %164, %165 : vector<16x8xi32>
    %167 = arith.extui %166 : vector<16x8xi1> to vector<16x8xi32>
    %168 = arith.sitofp %167 : vector<16x8xi32> to vector<16x8xf32>
    %169 = tpu.iota {dimensions = array<i32: 1>} : vector<2x16xi32>
    %170 = tpu.iota {dimensions = array<i32: 0>} : vector<2x16xi32>
    %c8_i32_75 = arith.constant 8 : i32
    %171 = vector.broadcast %c8_i32_75 : i32 to vector<2x16xi32>
    %172 = arith.muli %170, %171 : vector<2x16xi32>
    %173 = arith.cmpi sge, %169, %172 : vector<2x16xi32>
    %c8_i32_76 = arith.constant 8 : i32
    %174 = vector.broadcast %c8_i32_76 : i32 to vector<2x16xi32>
    %175 = arith.addi %172, %174 : vector<2x16xi32>
    %176 = arith.cmpi slt, %169, %175 : vector<2x16xi32>
    %177 = arith.andi %173, %176 : vector<2x16xi1>
    %178 = arith.extui %177 : vector<2x16xi1> to vector<2x16xi32>
    %179 = arith.sitofp %178 : vector<2x16xi32> to vector<2x16xf32>
    %180 = tpu.iota {dimensions = array<i32: 0>} : vector<16x2xi32>
    %181 = tpu.iota {dimensions = array<i32: 1>} : vector<16x2xi32>
    %c8_i32_77 = arith.constant 8 : i32
    %182 = vector.broadcast %c8_i32_77 : i32 to vector<16x2xi32>
    %183 = arith.muli %181, %182 : vector<16x2xi32>
    %184 = arith.cmpi sge, %180, %183 : vector<16x2xi32>
    %c8_i32_78 = arith.constant 8 : i32
    %185 = vector.broadcast %c8_i32_78 : i32 to vector<16x2xi32>
    %186 = arith.addi %183, %185 : vector<16x2xi32>
    %187 = arith.cmpi slt, %180, %186 : vector<16x2xi32>
    %188 = arith.andi %184, %187 : vector<16x2xi1>
    %189 = arith.extui %188 : vector<16x2xi1> to vector<16x2xi32>
    %190 = arith.sitofp %189 : vector<16x2xi32> to vector<16x2xf32>
    %191 = vector.broadcast %163 : vector<16x1xf32> to vector<16x8xf32>
    %192 = arith.mulf %191, %168 : vector<16x8xf32>
    %cst_79 = arith.constant dense<0.000000e+00> : vector<2x8xf32>
    %193 = tpu.matmul %179, %192, %cst_79 {dimension_numbers = #tpu.dot_dimension_numbers<[1], [0], [0], [1], [0, 0, 1, 1], [], []>} : vector<2x16xf32>, vector<16x8xf32>, vector<2x8xf32> -> vector<2x8xf32>
    %c0_80 = arith.constant 0 : index
    %c0_81 = arith.constant 0 : index
    %194 = vector.load %arg9[%c0_80, %c0_81] : memref<8x2xf32, #tpu.memory_space<vmem>>, vector<8x2xf32>
    %cst_82 = arith.constant dense<0.000000e+00> : vector<2x2xf32>
    %195 = tpu.matmul %193, %194, %cst_82 {dimension_numbers = #tpu.dot_dimension_numbers<[1], [0], [0], [1], [0, 0, 1, 1], [], []>} : vector<2x8xf32>, vector<8x2xf32>, vector<2x2xf32> -> vector<2x2xf32>
    %c0_83 = arith.constant 0 : index
    %c0_84 = arith.constant 0 : index
    %196 = vector.load %arg10[%c0_83, %c0_84] : memref<1x2xf32, #tpu.memory_space<vmem>>, vector<1x2xf32>
    %197 = vector.broadcast %196 : vector<1x2xf32> to vector<2x2xf32>
    %198 = arith.addf %195, %197 : vector<2x2xf32>
    %cst_85 = arith.constant 0.000000e+00 : f32
    %199 = vector.broadcast %cst_85 : f32 to vector<2x2xf32>
    %200 = arith.maximumf %198, %199 : vector<2x2xf32>
    %c0_86 = arith.constant 0 : index
    %c0_87 = arith.constant 0 : index
    %201 = vector.load %arg11[%c0_86, %c0_87] : memref<2x8xf32, #tpu.memory_space<vmem>>, vector<2x8xf32>
    %cst_88 = arith.constant dense<0.000000e+00> : vector<2x8xf32>
    %202 = tpu.matmul %200, %201, %cst_88 {dimension_numbers = #tpu.dot_dimension_numbers<[1], [0], [0], [1], [0, 0, 1, 1], [], []>} : vector<2x2xf32>, vector<2x8xf32>, vector<2x8xf32> -> vector<2x8xf32>
    %c0_89 = arith.constant 0 : index
    %c0_90 = arith.constant 0 : index
    %203 = vector.load %arg12[%c0_89, %c0_90] : memref<1x8xf32, #tpu.memory_space<vmem>>, vector<1x8xf32>
    %204 = vector.broadcast %203 : vector<1x8xf32> to vector<2x8xf32>
    %205 = arith.addf %202, %204 : vector<2x8xf32>
    %206 = arith.negf %205 : vector<2x8xf32>
    %207 = math.exp %206 : vector<2x8xf32>
    %cst_91 = arith.constant 1.000000e+00 : f32
    %208 = vector.broadcast %cst_91 : f32 to vector<2x8xf32>
    %209 = arith.addf %208, %207 : vector<2x8xf32>
    %210 = arith.divf %208, %209 : vector<2x8xf32>
    %cst_92 = arith.constant 1.000000e+00 : f32
    %211 = vector.broadcast %cst_92 : f32 to vector<8x1xf32>
    %cst_93 = arith.constant dense<0.000000e+00> : vector<16x8xf32>
    %212 = tpu.matmul %190, %210, %cst_93 {dimension_numbers = #tpu.dot_dimension_numbers<[1], [0], [0], [1], [0, 0, 1, 1], [], []>} : vector<16x2xf32>, vector<2x8xf32>, vector<16x8xf32> -> vector<16x8xf32>
    %213 = arith.mulf %212, %168 : vector<16x8xf32>
    %cst_94 = arith.constant dense<0.000000e+00> : vector<16x1xf32>
    %214 = tpu.matmul %213, %211, %cst_94 {dimension_numbers = #tpu.dot_dimension_numbers<[1], [0], [0], [1], [0, 0, 1, 1], [], []>} : vector<16x8xf32>, vector<8x1xf32>, vector<16x1xf32> -> vector<16x1xf32>
    %215 = vector.broadcast %214 : vector<16x1xf32> to vector<16x128xf32>
    %216 = arith.mulf %162, %215 : vector<16x128xf32>
    %c0_95 = arith.constant 0 : index
    %c0_96 = arith.constant 0 : index
    %217 = vector.load %arg13[%c0_95, %c0_96] : memref<16x128xf32, #tpu.memory_space<vmem>>, vector<16x128xf32>
    tpu.vector_store %arg13[%c0_95, %c0_96], %216 {strides = array<i32>} : memref<16x128xf32, #tpu.memory_space<vmem>>, vector<16x128xf32>,
    return
  }
  func.func @transform_0(%arg0: i32) -> (i32, i32) {
    %c0_i32 = arith.constant 0 : i32
    %c0_i32_0 = arith.constant 0 : i32
    return %arg0, %c0_i32 : i32, i32
  }
  func.func @transform_1(%arg0: i32) -> (i32, i32) {
    %c0_i32 = arith.constant 0 : i32
    %c0_i32_0 = arith.constant 0 : i32
    %c0_i32_1 = arith.constant 0 : i32
    return %c0_i32, %c0_i32_0 : i32, i32
  }
  func.func @transform_2(%arg0: i32) -> (i32, i32) {
    %c0_i32 = arith.constant 0 : i32
    %c0_i32_0 = arith.constant 0 : i32
    %c0_i32_1 = arith.constant 0 : i32
    return %c0_i32, %c0_i32_0 : i32, i32
  }
  func.func @transform_3(%arg0: i32) -> (i32, i32) {
    %c0_i32 = arith.constant 0 : i32
    %c0_i32_0 = arith.constant 0 : i32
    %c0_i32_1 = arith.constant 0 : i32
    return %c0_i32, %c0_i32_0 : i32, i32
  }
  func.func @transform_4(%arg0: i32) -> (i32, i32) {
    %c0_i32 = arith.constant 0 : i32
    %c0_i32_0 = arith.constant 0 : i32
    %c0_i32_1 = arith.constant 0 : i32
    return %c0_i32, %c0_i32_0 : i32, i32
  }
  func.func @transform_5(%arg0: i32) -> (i32, i32) {
    %c0_i32 = arith.constant 0 : i32
    %c0_i32_0 = arith.constant 0 : i32
    %c0_i32_1 = arith.constant 0 : i32
    return %c0_i32, %c0_i32_0 : i32, i32
  }
  func.func @transform_6(%arg0: i32) -> (i32, i32) {
    %c0_i32 = arith.constant 0 : i32
    %c0_i32_0 = arith.constant 0 : i32
    %c0_i32_1 = arith.constant 0 : i32
    return %c0_i32, %c0_i32_0 : i32, i32
  }
  func.func @transform_7(%arg0: i32) -> (i32, i32) {
    %c0_i32 = arith.constant 0 : i32
    %c0_i32_0 = arith.constant 0 : i32
    %c0_i32_1 = arith.constant 0 : i32
    return %c0_i32, %c0_i32_0 : i32, i32
  }
  func.func @transform_8(%arg0: i32) -> (i32, i32) {
    %c0_i32 = arith.constant 0 : i32
    %c0_i32_0 = arith.constant 0 : i32
    %c0_i32_1 = arith.constant 0 : i32
    return %c0_i32, %c0_i32_0 : i32, i32
  }
  func.func @transform_9(%arg0: i32) -> (i32, i32) {
    %c0_i32 = arith.constant 0 : i32
    %c0_i32_0 = arith.constant 0 : i32
    %c0_i32_1 = arith.constant 0 : i32
    return %c0_i32, %c0_i32_0 : i32, i32
  }
  func.func @transform_10(%arg0: i32) -> (i32, i32) {
    %c0_i32 = arith.constant 0 : i32
    %c0_i32_0 = arith.constant 0 : i32
    %c0_i32_1 = arith.constant 0 : i32
    return %c0_i32, %c0_i32_0 : i32, i32
  }
  func.func @transform_11(%arg0: i32) -> (i32, i32) {
    %c0_i32 = arith.constant 0 : i32
    %c0_i32_0 = arith.constant 0 : i32
    %c0_i32_1 = arith.constant 0 : i32
    return %c0_i32, %c0_i32_0 : i32, i32
  }
  func.func @transform_12(%arg0: i32) -> (i32, i32) {
    %c0_i32 = arith.constant 0 : i32
    %c0_i32_0 = arith.constant 0 : i32
    return %arg0, %c0_i32 : i32, i32
  }
}

module attributes {stable_mosaic.version = 11 : i64} {
  func.func @_encoder_kernel(%arg0: i32, %arg1: memref<16x128xf32, #tpu.memory_space<vmem>>, %arg2: memref<896x128xf32, #tpu.memory_space<vmem>>, %arg3: memref<1x128xf32, #tpu.memory_space<vmem>>, %arg4: memref<1x128xf32, #tpu.memory_space<vmem>>, %arg5: memref<128x4xf32, #tpu.memory_space<vmem>>, %arg6: memref<4x128xf32, #tpu.memory_space<vmem>>, %arg7: memref<1x128xf32, #tpu.memory_space<vmem>>, %arg8: memref<1x128xf32, #tpu.memory_space<vmem>>, %arg9: memref<8x2xf32, #tpu.memory_space<vmem>>, %arg10: memref<1x2xf32, #tpu.memory_space<vmem>>, %arg11: memref<2x8xf32, #tpu.memory_space<vmem>>, %arg12: memref<1x8xf32, #tpu.memory_space<vmem>>, %arg13: memref<16x128xf32, #tpu.memory_space<vmem>>, %arg14: memref<32x128xf32, #tpu.memory_space<vmem>>) attributes {dimension_semantics = [#tpu.dimension_semantics<parallel>], iteration_bounds = array<i64: 2>, scalar_prefetch = 0 : i64, scratch_operands = 1 : i64, tpu.core_type = #tpu.core_type<tc>, window_params = [{transform_indices = @transform_0, window_bounds = array<i64: 16, 128>}, {pipeline_mode = #tpu.pipeline_mode<synchronous>, transform_indices = @transform_1, window_bounds = array<i64: 896, 128>}, {pipeline_mode = #tpu.pipeline_mode<synchronous>, transform_indices = @transform_2, window_bounds = array<i64: 1, 128>}, {pipeline_mode = #tpu.pipeline_mode<synchronous>, transform_indices = @transform_3, window_bounds = array<i64: 1, 128>}, {pipeline_mode = #tpu.pipeline_mode<synchronous>, transform_indices = @transform_4, window_bounds = array<i64: 128, 4>}, {pipeline_mode = #tpu.pipeline_mode<synchronous>, transform_indices = @transform_5, window_bounds = array<i64: 4, 128>}, {pipeline_mode = #tpu.pipeline_mode<synchronous>, transform_indices = @transform_6, window_bounds = array<i64: 1, 128>}, {pipeline_mode = #tpu.pipeline_mode<synchronous>, transform_indices = @transform_7, window_bounds = array<i64: 1, 128>}, {pipeline_mode = #tpu.pipeline_mode<synchronous>, transform_indices = @transform_8, window_bounds = array<i64: 8, 2>}, {pipeline_mode = #tpu.pipeline_mode<synchronous>, transform_indices = @transform_9, window_bounds = array<i64: 1, 2>}, {pipeline_mode = #tpu.pipeline_mode<synchronous>, transform_indices = @transform_10, window_bounds = array<i64: 2, 8>}, {pipeline_mode = #tpu.pipeline_mode<synchronous>, transform_indices = @transform_11, window_bounds = array<i64: 1, 8>}, {transform_indices = @transform_12, window_bounds = array<i64: 16, 128>}]} {
    %c0 = arith.constant 0 : index
    %c0_0 = arith.constant 0 : index
    %0 = vector.load %arg1[%c0, %c0_0] : memref<16x128xf32, #tpu.memory_space<vmem>>, vector<16x128xf32>
    %cst = arith.constant 0.000000e+00 : f32
    %1 = vector.broadcast %cst : f32 to vector<8x128xf32>
    %c0_1 = arith.constant 0 : index
    %c0_2 = arith.constant 0 : index
    %2 = vector.load %arg14[%c0_1, %c0_2] : memref<32x128xf32, #tpu.memory_space<vmem>>, vector<8x128xf32>
    tpu.vector_store %arg14[%c0_1, %c0_2], %1 {strides = array<i32>} : memref<32x128xf32, #tpu.memory_space<vmem>>, vector<8x128xf32>,
    %c24 = arith.constant 24 : index
    %c0_3 = arith.constant 0 : index
    %3 = vector.load %arg14[%c24, %c0_3] : memref<32x128xf32, #tpu.memory_space<vmem>>, vector<8x128xf32>
    tpu.vector_store %arg14[%c24, %c0_3], %1 {strides = array<i32>} : memref<32x128xf32, #tpu.memory_space<vmem>>, vector<8x128xf32>,
    %c8 = arith.constant 8 : index
    %c0_4 = arith.constant 0 : index
    %4 = vector.load %arg14[%c8, %c0_4] : memref<32x128xf32, #tpu.memory_space<vmem>>, vector<16x128xf32>
    tpu.vector_store %arg14[%c8, %c0_4], %0 {strides = array<i32>} : memref<32x128xf32, #tpu.memory_space<vmem>>, vector<16x128xf32>,
    %5 = tpu.iota {dimensions = array<i32: 0>} : vector<16x1xi32>
    %c8_i32 = arith.constant 8 : i32
    %c0_i32 = arith.constant 0 : i32
    %6 = arith.cmpi eq, %c8_i32, %c0_i32 : i32
    %c1_i32 = arith.constant 1 : i32
    %7 = arith.select %6, %c1_i32, %c8_i32 : i32
    %8 = vector.broadcast %7 : i32 to vector<16x1xi32>
    %9 = arith.remsi %5, %8 : vector<16x1xi32>
    %c0_i32_5 = arith.constant 0 : i32
    %10 = vector.broadcast %c0_i32_5 : i32 to vector<16x1xi32>
    %11 = arith.cmpi ne, %9, %10 : vector<16x1xi32>
    %c0_i32_6 = arith.constant 0 : i32
    %12 = vector.broadcast %c0_i32_6 : i32 to vector<16x1xi32>
    %13 = arith.cmpi slt, %9, %12 : vector<16x1xi32>
    %c0_i32_7 = arith.constant 0 : i32
    %14 = arith.cmpi slt, %7, %c0_i32_7 : i32
    %15 = vector.broadcast %14 : i1 to vector<16x1xi1>
    %16 = vector.broadcast %15 : vector<16x1xi1> to vector<16x1xi1>
    %17 = arith.xori %13, %16 : vector<16x1xi1>
    %18 = arith.andi %17, %11 : vector<16x1xi1>
    %19 = vector.broadcast %7 : i32 to vector<16x1xi32>
    %20 = arith.addi %9, %19 : vector<16x1xi32>
    %21 = arith.select %18, %20, %9 : vector<16x1xi1>, vector<16x1xi32>
    %c5 = arith.constant 5 : index
    %c0_8 = arith.constant 0 : index
    %22 = vector.load %arg14[%c5, %c0_8] : memref<32x128xf32, #tpu.memory_space<vmem>>, vector<16x128xf32>
    %c-3_i32 = arith.constant -3 : i32
    %23 = vector.broadcast %c-3_i32 : i32 to vector<16x1xi32>
    %24 = arith.addi %21, %23 : vector<16x1xi32>
    %c0_i32_9 = arith.constant 0 : i32
    %25 = vector.broadcast %c0_i32_9 : i32 to vector<16x1xi32>
    %26 = arith.cmpi sge, %24, %25 : vector<16x1xi32>
    %c-3_i32_10 = arith.constant -3 : i32
    %27 = vector.broadcast %c-3_i32_10 : i32 to vector<16x1xi32>
    %28 = arith.addi %21, %27 : vector<16x1xi32>
    %c8_i32_11 = arith.constant 8 : i32
    %29 = vector.broadcast %c8_i32_11 : i32 to vector<16x1xi32>
    %30 = arith.cmpi slt, %28, %29 : vector<16x1xi32>
    %31 = arith.andi %26, %30 : vector<16x1xi1>
    %cst_12 = arith.constant 0.000000e+00 : f32
    %32 = vector.shape_cast %31 : vector<16x1xi1> to vector<16x1xi1>
    %33 = vector.broadcast %32 : vector<16x1xi1> to vector<16x128xi1>
    %34 = vector.broadcast %cst_12 : f32 to vector<16x128xf32>
    %35 = arith.select %33, %22, %34 : vector<16x128xi1>, vector<16x128xf32>
    %c0_13 = arith.constant 0 : index
    %c0_14 = arith.constant 0 : index
    %36 = vector.load %arg2[%c0_13, %c0_14] : memref<896x128xf32, #tpu.memory_space<vmem>>, vector<128x128xf32>
    %cst_15 = arith.constant dense<0.000000e+00> : vector<16x128xf32>
    %37 = tpu.matmul %35, %36, %cst_15 {dimension_numbers = #tpu.dot_dimension_numbers<[1], [0], [0], [1], [0, 0, 1, 1], [], []>} : vector<16x128xf32>, vector<128x128xf32>, vector<16x128xf32> -> vector<16x128xf32>
    %c6 = arith.constant 6 : index
    %c0_16 = arith.constant 0 : index
    %38 = vector.load %arg14[%c6, %c0_16] : memref<32x128xf32, #tpu.memory_space<vmem>>, vector<16x128xf32>
    %c-2_i32 = arith.constant -2 : i32
    %39 = vector.broadcast %c-2_i32 : i32 to vector<16x1xi32>
    %40 = arith.addi %21, %39 : vector<16x1xi32>
    %c0_i32_17 = arith.constant 0 : i32
    %41 = vector.broadcast %c0_i32_17 : i32 to vector<16x1xi32>
    %42 = arith.cmpi sge, %40, %41 : vector<16x1xi32>
    %c-2_i32_18 = arith.constant -2 : i32
    %43 = vector.broadcast %c-2_i32_18 : i32 to vector<16x1xi32>
    %44 = arith.addi %21, %43 : vector<16x1xi32>
    %c8_i32_19 = arith.constant 8 : i32
    %45 = vector.broadcast %c8_i32_19 : i32 to vector<16x1xi32>
    %46 = arith.cmpi slt, %44, %45 : vector<16x1xi32>
    %47 = arith.andi %42, %46 : vector<16x1xi1>
    %cst_20 = arith.constant 0.000000e+00 : f32
    %48 = vector.shape_cast %47 : vector<16x1xi1> to vector<16x1xi1>
    %49 = vector.broadcast %48 : vector<16x1xi1> to vector<16x128xi1>
    %50 = vector.broadcast %cst_20 : f32 to vector<16x128xf32>
    %51 = arith.select %49, %38, %50 : vector<16x128xi1>, vector<16x128xf32>
    %c128 = arith.constant 128 : index
    %c0_21 = arith.constant 0 : index
    %52 = vector.load %arg2[%c128, %c0_21] : memref<896x128xf32, #tpu.memory_space<vmem>>, vector<128x128xf32>
    %cst_22 = arith.constant dense<0.000000e+00> : vector<16x128xf32>
    %53 = tpu.matmul %51, %52, %cst_22 {dimension_numbers = #tpu.dot_dimension_numbers<[1], [0], [0], [1], [0, 0, 1, 1], [], []>} : vector<16x128xf32>, vector<128x128xf32>, vector<16x128xf32> -> vector<16x128xf32>
    %54 = arith.addf %37, %53 : vector<16x128xf32>
    %c7 = arith.constant 7 : index
    %c0_23 = arith.constant 0 : index
    %55 = vector.load %arg14[%c7, %c0_23] : memref<32x128xf32, #tpu.memory_space<vmem>>, vector<16x128xf32>
    %c-1_i32 = arith.constant -1 : i32
    %56 = vector.broadcast %c-1_i32 : i32 to vector<16x1xi32>
    %57 = arith.addi %21, %56 : vector<16x1xi32>
    %c0_i32_24 = arith.constant 0 : i32
    %58 = vector.broadcast %c0_i32_24 : i32 to vector<16x1xi32>
    %59 = arith.cmpi sge, %57, %58 : vector<16x1xi32>
    %c-1_i32_25 = arith.constant -1 : i32
    %60 = vector.broadcast %c-1_i32_25 : i32 to vector<16x1xi32>
    %61 = arith.addi %21, %60 : vector<16x1xi32>
    %c8_i32_26 = arith.constant 8 : i32
    %62 = vector.broadcast %c8_i32_26 : i32 to vector<16x1xi32>
    %63 = arith.cmpi slt, %61, %62 : vector<16x1xi32>
    %64 = arith.andi %59, %63 : vector<16x1xi1>
    %cst_27 = arith.constant 0.000000e+00 : f32
    %65 = vector.shape_cast %64 : vector<16x1xi1> to vector<16x1xi1>
    %66 = vector.broadcast %65 : vector<16x1xi1> to vector<16x128xi1>
    %67 = vector.broadcast %cst_27 : f32 to vector<16x128xf32>
    %68 = arith.select %66, %55, %67 : vector<16x128xi1>, vector<16x128xf32>
    %c256 = arith.constant 256 : index
    %c0_28 = arith.constant 0 : index
    %69 = vector.load %arg2[%c256, %c0_28] : memref<896x128xf32, #tpu.memory_space<vmem>>, vector<128x128xf32>
    %cst_29 = arith.constant dense<0.000000e+00> : vector<16x128xf32>
    %70 = tpu.matmul %68, %69, %cst_29 {dimension_numbers = #tpu.dot_dimension_numbers<[1], [0], [0], [1], [0, 0, 1, 1], [], []>} : vector<16x128xf32>, vector<128x128xf32>, vector<16x128xf32> -> vector<16x128xf32>
    %71 = arith.addf %54, %70 : vector<16x128xf32>
    %c384 = arith.constant 384 : index
    %c0_30 = arith.constant 0 : index
    %72 = vector.load %arg2[%c384, %c0_30] : memref<896x128xf32, #tpu.memory_space<vmem>>, vector<128x128xf32>
    %cst_31 = arith.constant dense<0.000000e+00> : vector<16x128xf32>
    %73 = tpu.matmul %0, %72, %cst_31 {dimension_numbers = #tpu.dot_dimension_numbers<[1], [0], [0], [1], [0, 0, 1, 1], [], []>} : vector<16x128xf32>, vector<128x128xf32>, vector<16x128xf32> -> vector<16x128xf32>
    %74 = arith.addf %71, %73 : vector<16x128xf32>
    %c9 = arith.constant 9 : index
    %c0_32 = arith.constant 0 : index
    %75 = vector.load %arg14[%c9, %c0_32] : memref<32x128xf32, #tpu.memory_space<vmem>>, vector<16x128xf32>
    %c1_i32_33 = arith.constant 1 : i32
    %76 = vector.broadcast %c1_i32_33 : i32 to vector<16x1xi32>
    %77 = arith.addi %21, %76 : vector<16x1xi32>
    %c0_i32_34 = arith.constant 0 : i32
    %78 = vector.broadcast %c0_i32_34 : i32 to vector<16x1xi32>
    %79 = arith.cmpi sge, %77, %78 : vector<16x1xi32>
    %c1_i32_35 = arith.constant 1 : i32
    %80 = vector.broadcast %c1_i32_35 : i32 to vector<16x1xi32>
    %81 = arith.addi %21, %80 : vector<16x1xi32>
    %c8_i32_36 = arith.constant 8 : i32
    %82 = vector.broadcast %c8_i32_36 : i32 to vector<16x1xi32>
    %83 = arith.cmpi slt, %81, %82 : vector<16x1xi32>
    %84 = arith.andi %79, %83 : vector<16x1xi1>
    %cst_37 = arith.constant 0.000000e+00 : f32
    %85 = vector.shape_cast %84 : vector<16x1xi1> to vector<16x1xi1>
    %86 = vector.broadcast %85 : vector<16x1xi1> to vector<16x128xi1>
    %87 = vector.broadcast %cst_37 : f32 to vector<16x128xf32>
    %88 = arith.select %86, %75, %87 : vector<16x128xi1>, vector<16x128xf32>
    %c512 = arith.constant 512 : index
    %c0_38 = arith.constant 0 : index
    %89 = vector.load %arg2[%c512, %c0_38] : memref<896x128xf32, #tpu.memory_space<vmem>>, vector<128x128xf32>
    %cst_39 = arith.constant dense<0.000000e+00> : vector<16x128xf32>
    %90 = tpu.matmul %88, %89, %cst_39 {dimension_numbers = #tpu.dot_dimension_numbers<[1], [0], [0], [1], [0, 0, 1, 1], [], []>} : vector<16x128xf32>, vector<128x128xf32>, vector<16x128xf32> -> vector<16x128xf32>
    %91 = arith.addf %74, %90 : vector<16x128xf32>
    %c10 = arith.constant 10 : index
    %c0_40 = arith.constant 0 : index
    %92 = vector.load %arg14[%c10, %c0_40] : memref<32x128xf32, #tpu.memory_space<vmem>>, vector<16x128xf32>
    %c2_i32 = arith.constant 2 : i32
    %93 = vector.broadcast %c2_i32 : i32 to vector<16x1xi32>
    %94 = arith.addi %21, %93 : vector<16x1xi32>
    %c0_i32_41 = arith.constant 0 : i32
    %95 = vector.broadcast %c0_i32_41 : i32 to vector<16x1xi32>
    %96 = arith.cmpi sge, %94, %95 : vector<16x1xi32>
    %c2_i32_42 = arith.constant 2 : i32
    %97 = vector.broadcast %c2_i32_42 : i32 to vector<16x1xi32>
    %98 = arith.addi %21, %97 : vector<16x1xi32>
    %c8_i32_43 = arith.constant 8 : i32
    %99 = vector.broadcast %c8_i32_43 : i32 to vector<16x1xi32>
    %100 = arith.cmpi slt, %98, %99 : vector<16x1xi32>
    %101 = arith.andi %96, %100 : vector<16x1xi1>
    %cst_44 = arith.constant 0.000000e+00 : f32
    %102 = vector.shape_cast %101 : vector<16x1xi1> to vector<16x1xi1>
    %103 = vector.broadcast %102 : vector<16x1xi1> to vector<16x128xi1>
    %104 = vector.broadcast %cst_44 : f32 to vector<16x128xf32>
    %105 = arith.select %103, %92, %104 : vector<16x128xi1>, vector<16x128xf32>
    %c640 = arith.constant 640 : index
    %c0_45 = arith.constant 0 : index
    %106 = vector.load %arg2[%c640, %c0_45] : memref<896x128xf32, #tpu.memory_space<vmem>>, vector<128x128xf32>
    %cst_46 = arith.constant dense<0.000000e+00> : vector<16x128xf32>
    %107 = tpu.matmul %105, %106, %cst_46 {dimension_numbers = #tpu.dot_dimension_numbers<[1], [0], [0], [1], [0, 0, 1, 1], [], []>} : vector<16x128xf32>, vector<128x128xf32>, vector<16x128xf32> -> vector<16x128xf32>
    %108 = arith.addf %91, %107 : vector<16x128xf32>
    %c11 = arith.constant 11 : index
    %c0_47 = arith.constant 0 : index
    %109 = vector.load %arg14[%c11, %c0_47] : memref<32x128xf32, #tpu.memory_space<vmem>>, vector<16x128xf32>
    %c3_i32 = arith.constant 3 : i32
    %110 = vector.broadcast %c3_i32 : i32 to vector<16x1xi32>
    %111 = arith.addi %21, %110 : vector<16x1xi32>
    %c0_i32_48 = arith.constant 0 : i32
    %112 = vector.broadcast %c0_i32_48 : i32 to vector<16x1xi32>
    %113 = arith.cmpi sge, %111, %112 : vector<16x1xi32>
    %c3_i32_49 = arith.constant 3 : i32
    %114 = vector.broadcast %c3_i32_49 : i32 to vector<16x1xi32>
    %115 = arith.addi %21, %114 : vector<16x1xi32>
    %c8_i32_50 = arith.constant 8 : i32
    %116 = vector.broadcast %c8_i32_50 : i32 to vector<16x1xi32>
    %117 = arith.cmpi slt, %115, %116 : vector<16x1xi32>
    %118 = arith.andi %113, %117 : vector<16x1xi1>
    %cst_51 = arith.constant 0.000000e+00 : f32
    %119 = vector.shape_cast %118 : vector<16x1xi1> to vector<16x1xi1>
    %120 = vector.broadcast %119 : vector<16x1xi1> to vector<16x128xi1>
    %121 = vector.broadcast %cst_51 : f32 to vector<16x128xf32>
    %122 = arith.select %120, %109, %121 : vector<16x128xi1>, vector<16x128xf32>
    %c768 = arith.constant 768 : index
    %c0_52 = arith.constant 0 : index
    %123 = vector.load %arg2[%c768, %c0_52] : memref<896x128xf32, #tpu.memory_space<vmem>>, vector<128x128xf32>
    %cst_53 = arith.constant dense<0.000000e+00> : vector<16x128xf32>
    %124 = tpu.matmul %122, %123, %cst_53 {dimension_numbers = #tpu.dot_dimension_numbers<[1], [0], [0], [1], [0, 0, 1, 1], [], []>} : vector<16x128xf32>, vector<128x128xf32>, vector<16x128xf32> -> vector<16x128xf32>
    %125 = arith.addf %108, %124 : vector<16x128xf32>
    %c0_54 = arith.constant 0 : index
    %c0_55 = arith.constant 0 : index
    %126 = vector.load %arg3[%c0_54, %c0_55] : memref<1x128xf32, #tpu.memory_space<vmem>>, vector<1x128xf32>
    %127 = vector.broadcast %126 : vector<1x128xf32> to vector<16x128xf32>
    %128 = arith.addf %125, %127 : vector<16x128xf32>
    %129 = arith.mulf %128, %128 : vector<16x128xf32>
    %c0_56 = arith.constant 0 : index
    %c0_57 = arith.constant 0 : index
    %130 = vector.load %arg5[%c0_56, %c0_57] : memref<128x4xf32, #tpu.memory_space<vmem>>, vector<128x4xf32>
    %cst_58 = arith.constant dense<0.000000e+00> : vector<16x4xf32>
    %131 = tpu.matmul %129, %130, %cst_58 {dimension_numbers = #tpu.dot_dimension_numbers<[1], [0], [0], [1], [0, 0, 1, 1], [], []>} : vector<16x128xf32>, vector<128x4xf32>, vector<16x4xf32> -> vector<16x4xf32>
    %cst_59 = arith.constant 9.99999997E-7 : f32
    %132 = vector.broadcast %cst_59 : f32 to vector<16x4xf32>
    %133 = arith.addf %131, %132 : vector<16x4xf32>
    %134 = math.rsqrt %133 : vector<16x4xf32>
    %c0_60 = arith.constant 0 : index
    %c0_61 = arith.constant 0 : index
    %135 = vector.load %arg6[%c0_60, %c0_61] : memref<4x128xf32, #tpu.memory_space<vmem>>, vector<4x128xf32>
    %cst_62 = arith.constant dense<0.000000e+00> : vector<16x128xf32>
    %136 = tpu.matmul %134, %135, %cst_62 {dimension_numbers = #tpu.dot_dimension_numbers<[1], [0], [0], [1], [0, 0, 1, 1], [], []>} : vector<16x4xf32>, vector<4x128xf32>, vector<16x128xf32> -> vector<16x128xf32>
    %137 = arith.mulf %128, %136 : vector<16x128xf32>
    %c0_63 = arith.constant 0 : index
    %c0_64 = arith.constant 0 : index
    %138 = vector.load %arg4[%c0_63, %c0_64] : memref<1x128xf32, #tpu.memory_space<vmem>>, vector<1x128xf32>
    %139 = vector.broadcast %138 : vector<1x128xf32> to vector<16x128xf32>
    %140 = arith.mulf %137, %139 : vector<16x128xf32>
    %cst_65 = arith.constant 7.812500e-03 : f32
    %141 = vector.broadcast %cst_65 : f32 to vector<128x1xf32>
    %cst_66 = arith.constant dense<0.000000e+00> : vector<16x1xf32>
    %142 = tpu.matmul %140, %141, %cst_66 {dimension_numbers = #tpu.dot_dimension_numbers<[1], [0], [0], [1], [0, 0, 1, 1], [], []>} : vector<16x128xf32>, vector<128x1xf32>, vector<16x1xf32> -> vector<16x1xf32>
    %143 = arith.mulf %140, %140 : vector<16x128xf32>
    %cst_67 = arith.constant dense<0.000000e+00> : vector<16x1xf32>
    %144 = tpu.matmul %143, %141, %cst_67 {dimension_numbers = #tpu.dot_dimension_numbers<[1], [0], [0], [1], [0, 0, 1, 1], [], []>} : vector<16x128xf32>, vector<128x1xf32>, vector<16x1xf32> -> vector<16x1xf32>
    %145 = arith.mulf %142, %142 : vector<16x1xf32>
    %146 = arith.subf %144, %145 : vector<16x1xf32>
    %cst_68 = arith.constant 0.000000e+00 : f32
    %147 = vector.broadcast %cst_68 : f32 to vector<16x1xf32>
    %148 = arith.maximumf %146, %147 : vector<16x1xf32>
    %149 = vector.broadcast %142 : vector<16x1xf32> to vector<16x128xf32>
    %150 = arith.subf %140, %149 : vector<16x128xf32>
    %cst_69 = arith.constant 9.99999974E-6 : f32
    %151 = vector.broadcast %cst_69 : f32 to vector<16x1xf32>
    %152 = arith.addf %148, %151 : vector<16x1xf32>
    %153 = math.rsqrt %152 : vector<16x1xf32>
    %154 = vector.broadcast %153 : vector<16x1xf32> to vector<16x128xf32>
    %155 = arith.mulf %150, %154 : vector<16x128xf32>
    %c0_70 = arith.constant 0 : index
    %c0_71 = arith.constant 0 : index
    %156 = vector.load %arg7[%c0_70, %c0_71] : memref<1x128xf32, #tpu.memory_space<vmem>>, vector<1x128xf32>
    %157 = vector.broadcast %156 : vector<1x128xf32> to vector<16x128xf32>
    %158 = arith.mulf %155, %157 : vector<16x128xf32>
    %c0_72 = arith.constant 0 : index
    %c0_73 = arith.constant 0 : index
    %159 = vector.load %arg8[%c0_72, %c0_73] : memref<1x128xf32, #tpu.memory_space<vmem>>, vector<1x128xf32>
    %160 = vector.broadcast %159 : vector<1x128xf32> to vector<16x128xf32>
    %161 = arith.addf %158, %160 : vector<16x128xf32>
    %162 = arith.addf %161, %0 : vector<16x128xf32>
    %cst_74 = arith.constant dense<0.000000e+00> : vector<16x1xf32>
    %163 = tpu.matmul %162, %141, %cst_74 {dimension_numbers = #tpu.dot_dimension_numbers<[1], [0], [0], [1], [0, 0, 1, 1], [], []>} : vector<16x128xf32>, vector<128x1xf32>, vector<16x1xf32> -> vector<16x1xf32>
    %164 = tpu.iota {dimensions = array<i32: 1>} : vector<16x8xi32>
    %165 = vector.broadcast %21 : vector<16x1xi32> to vector<16x8xi32>
    %166 = arith.cmpi eq, %164, %165 : vector<16x8xi32>
    %167 = arith.extui %166 : vector<16x8xi1> to vector<16x8xi32>
    %168 = arith.sitofp %167 : vector<16x8xi32> to vector<16x8xf32>
    %169 = tpu.iota {dimensions = array<i32: 1>} : vector<2x16xi32>
    %170 = tpu.iota {dimensions = array<i32: 0>} : vector<2x16xi32>
    %c8_i32_75 = arith.constant 8 : i32
    %171 = vector.broadcast %c8_i32_75 : i32 to vector<2x16xi32>
    %172 = arith.muli %170, %171 : vector<2x16xi32>
    %173 = arith.cmpi sge, %169, %172 : vector<2x16xi32>
    %c8_i32_76 = arith.constant 8 : i32
    %174 = vector.broadcast %c8_i32_76 : i32 to vector<2x16xi32>
    %175 = arith.addi %172, %174 : vector<2x16xi32>
    %176 = arith.cmpi slt, %169, %175 : vector<2x16xi32>
    %177 = arith.andi %173, %176 : vector<2x16xi1>
    %178 = arith.extui %177 : vector<2x16xi1> to vector<2x16xi32>
    %179 = arith.sitofp %178 : vector<2x16xi32> to vector<2x16xf32>
    %180 = tpu.iota {dimensions = array<i32: 0>} : vector<16x2xi32>
    %181 = tpu.iota {dimensions = array<i32: 1>} : vector<16x2xi32>
    %c8_i32_77 = arith.constant 8 : i32
    %182 = vector.broadcast %c8_i32_77 : i32 to vector<16x2xi32>
    %183 = arith.muli %181, %182 : vector<16x2xi32>
    %184 = arith.cmpi sge, %180, %183 : vector<16x2xi32>
    %c8_i32_78 = arith.constant 8 : i32
    %185 = vector.broadcast %c8_i32_78 : i32 to vector<16x2xi32>
    %186 = arith.addi %183, %185 : vector<16x2xi32>
    %187 = arith.cmpi slt, %180, %186 : vector<16x2xi32>
    %188 = arith.andi %184, %187 : vector<16x2xi1>
    %189 = arith.extui %188 : vector<16x2xi1> to vector<16x2xi32>
    %190 = arith.sitofp %189 : vector<16x2xi32> to vector<16x2xf32>
    %191 = vector.broadcast %163 : vector<16x1xf32> to vector<16x8xf32>
    %192 = arith.mulf %191, %168 : vector<16x8xf32>
    %cst_79 = arith.constant dense<0.000000e+00> : vector<2x8xf32>
    %193 = tpu.matmul %179, %192, %cst_79 {dimension_numbers = #tpu.dot_dimension_numbers<[1], [0], [0], [1], [0, 0, 1, 1], [], []>} : vector<2x16xf32>, vector<16x8xf32>, vector<2x8xf32> -> vector<2x8xf32>
    %c0_80 = arith.constant 0 : index
    %c0_81 = arith.constant 0 : index
    %194 = vector.load %arg9[%c0_80, %c0_81] : memref<8x2xf32, #tpu.memory_space<vmem>>, vector<8x2xf32>
    %cst_82 = arith.constant dense<0.000000e+00> : vector<2x2xf32>
    %195 = tpu.matmul %193, %194, %cst_82 {dimension_numbers = #tpu.dot_dimension_numbers<[1], [0], [0], [1], [0, 0, 1, 1], [], []>} : vector<2x8xf32>, vector<8x2xf32>, vector<2x2xf32> -> vector<2x2xf32>
    %c0_83 = arith.constant 0 : index
    %c0_84 = arith.constant 0 : index
    %196 = vector.load %arg10[%c0_83, %c0_84] : memref<1x2xf32, #tpu.memory_space<vmem>>, vector<1x2xf32>
    %197 = vector.broadcast %196 : vector<1x2xf32> to vector<2x2xf32>
    %198 = arith.addf %195, %197 : vector<2x2xf32>
    %cst_85 = arith.constant 0.000000e+00 : f32
    %199 = vector.broadcast %cst_85 : f32 to vector<2x2xf32>
    %200 = arith.maximumf %198, %199 : vector<2x2xf32>
    %c0_86 = arith.constant 0 : index
    %c0_87 = arith.constant 0 : index
    %201 = vector.load %arg11[%c0_86, %c0_87] : memref<2x8xf32, #tpu.memory_space<vmem>>, vector<2x8xf32>
    %cst_88 = arith.constant dense<0.000000e+00> : vector<2x8xf32>
    %202 = tpu.matmul %200, %201, %cst_88 {dimension_numbers = #tpu.dot_dimension_numbers<[1], [0], [0], [1], [0, 0, 1, 1], [], []>} : vector<2x2xf32>, vector<2x8xf32>, vector<2x8xf32> -> vector<2x8xf32>
    %c0_89 = arith.constant 0 : index
    %c0_90 = arith.constant 0 : index
    %203 = vector.load %arg12[%c0_89, %c0_90] : memref<1x8xf32, #tpu.memory_space<vmem>>, vector<1x8xf32>
    %204 = vector.broadcast %203 : vector<1x8xf32> to vector<2x8xf32>
    %205 = arith.addf %202, %204 : vector<2x8xf32>
    %206 = arith.negf %205 : vector<2x8xf32>
    %207 = math.exp %206 : vector<2x8xf32>
    %cst_91 = arith.constant 1.000000e+00 : f32
    %208 = vector.broadcast %cst_91 : f32 to vector<2x8xf32>
    %209 = arith.addf %208, %207 : vector<2x8xf32>
    %210 = arith.divf %208, %209 : vector<2x8xf32>
    %cst_92 = arith.constant 1.000000e+00 : f32
    %211 = vector.broadcast %cst_92 : f32 to vector<8x1xf32>
    %cst_93 = arith.constant dense<0.000000e+00> : vector<16x8xf32>
    %212 = tpu.matmul %190, %210, %cst_93 {dimension_numbers = #tpu.dot_dimension_numbers<[1], [0], [0], [1], [0, 0, 1, 1], [], []>} : vector<16x2xf32>, vector<2x8xf32>, vector<16x8xf32> -> vector<16x8xf32>
    %213 = arith.mulf %212, %168 : vector<16x8xf32>
    %cst_94 = arith.constant dense<0.000000e+00> : vector<16x1xf32>
    %214 = tpu.matmul %213, %211, %cst_94 {dimension_numbers = #tpu.dot_dimension_numbers<[1], [0], [0], [1], [0, 0, 1, 1], [], []>} : vector<16x8xf32>, vector<8x1xf32>, vector<16x1xf32> -> vector<16x1xf32>
    %215 = vector.broadcast %214 : vector<16x1xf32> to vector<16x128xf32>
    %216 = arith.mulf %162, %215 : vector<16x128xf32>
    %c0_95 = arith.constant 0 : index
    %c0_96 = arith.constant 0 : index
    %217 = vector.load %arg13[%c0_95, %c0_96] : memref<16x128xf32, #tpu.memory_space<vmem>>, vector<16x128xf32>
    tpu.vector_store %arg13[%c0_95, %c0_96], %216 {strides = array<i32>} : memref<16x128xf32, #tpu.memory_space<vmem>>, vector<16x128xf32>,
    return
  }
  func.func @transform_0(%arg0: i32) -> (i32, i32) {
    %c0_i32 = arith.constant 0 : i32
    %c0_i32_0 = arith.constant 0 : i32
    return %arg0, %c0_i32 : i32, i32
  }
  func.func @transform_1(%arg0: i32) -> (i32, i32) {
    %c0_i32 = arith.constant 0 : i32
    %c0_i32_0 = arith.constant 0 : i32
    %c0_i32_1 = arith.constant 0 : i32
    return %c0_i32, %c0_i32_0 : i32, i32
  }
  func.func @transform_2(%arg0: i32) -> (i32, i32) {
    %c0_i32 = arith.constant 0 : i32
    %c0_i32_0 = arith.constant 0 : i32
    %c0_i32_1 = arith.constant 0 : i32
    return %c0_i32, %c0_i32_0 : i32, i32
  }
  func.func @transform_3(%arg0: i32) -> (i32, i32) {
    %c0_i32 = arith.constant 0 : i32
    %c0_i32_0 = arith.constant 0 : i32
    %c0_i32_1 = arith.constant 0 : i32
    return %c0_i32, %c0_i32_0 : i32, i32
  }
  func.func @transform_4(%arg0: i32) -> (i32, i32) {
    %c0_i32 = arith.constant 0 : i32
    %c0_i32_0 = arith.constant 0 : i32
    %c0_i32_1 = arith.constant 0 : i32
    return %c0_i32, %c0_i32_0 : i32, i32
  }
  func.func @transform_5(%arg0: i32) -> (i32, i32) {
    %c0_i32 = arith.constant 0 : i32
    %c0_i32_0 = arith.constant 0 : i32
    %c0_i32_1 = arith.constant 0 : i32
    return %c0_i32, %c0_i32_0 : i32, i32
  }
  func.func @transform_6(%arg0: i32) -> (i32, i32) {
    %c0_i32 = arith.constant 0 : i32
    %c0_i32_0 = arith.constant 0 : i32
    %c0_i32_1 = arith.constant 0 : i32
    return %c0_i32, %c0_i32_0 : i32, i32
  }
  func.func @transform_7(%arg0: i32) -> (i32, i32) {
    %c0_i32 = arith.constant 0 : i32
    %c0_i32_0 = arith.constant 0 : i32
    %c0_i32_1 = arith.constant 0 : i32
    return %c0_i32, %c0_i32_0 : i32, i32
  }
  func.func @transform_8(%arg0: i32) -> (i32, i32) {
    %c0_i32 = arith.constant 0 : i32
    %c0_i32_0 = arith.constant 0 : i32
    %c0_i32_1 = arith.constant 0 : i32
    return %c0_i32, %c0_i32_0 : i32, i32
  }
  func.func @transform_9(%arg0: i32) -> (i32, i32) {
    %c0_i32 = arith.constant 0 : i32
    %c0_i32_0 = arith.constant 0 : i32
    %c0_i32_1 = arith.constant 0 : i32
    return %c0_i32, %c0_i32_0 : i32, i32
  }
  func.func @transform_10(%arg0: i32) -> (i32, i32) {
    %c0_i32 = arith.constant 0 : i32
    %c0_i32_0 = arith.constant 0 : i32
    %c0_i32_1 = arith.constant 0 : i32
    return %c0_i32, %c0_i32_0 : i32, i32
  }
  func.func @transform_11(%arg0: i32) -> (i32, i32) {
    %c0_i32 = arith.constant 0 : i32
    %c0_i32_0 = arith.constant 0 : i32
    %c0_i32_1 = arith.constant 0 : i32
    return %c0_i32, %c0_i32_0 : i32, i32
  }
  func.func @transform_12(%arg0: i32) -> (i32, i32) {
    %c0_i32 = arith.constant 0 : i32
    %c0_i32_0 = arith.constant 0 : i32
    return %arg0, %c0_i32 : i32, i32
  }
}

</mosaic_0001>

<bundles_post_ra>
// kernel: tpu_custom_call.1
= control target key start
LH: loop header
LB: loop body
LE: loop exit
PB: predicated region body
PF: predicated region fallthrough
CT: control target
= control target key end

     0   :  { %17 = vsyncpa [#allocation4], 0  ;;  %s3851_s0 = inlined_call_operand.vmem [shape: f32[32,128], index: 0, kind: input, shape index: {}]   ;;  %s3852_s1 = inlined_call_operand.hbm [shape: f32[896,128], index: 1, kind: input, shape index: {}]   ;;  %s3853_s2 = inlined_call_operand.vmem [shape: f32[1,128], index: 2, kind: input, shape index: {}]   ;;  %s3854_s3 = inlined_call_operand.vmem [shape: f32[1,128], index: 3, kind: input, shape index: {}]   ;;  %s3855_s4 = inlined_call_operand.vmem [shape: f32[128,4], index: 4, kind: input, shape index: {}]   ;;  %s3856_s5 = inlined_call_operand.vmem [shape: f32[4,128], index: 5, kind: input, shape index: {}]   ;;  %s3857_s6 = inlined_call_operand.vmem [shape: f32[1,128], index: 6, kind: input, shape index: {}]   ;;  %s3858_s7 = inlined_call_operand.vmem [shape: f32[1,128], index: 7, kind: input, shape index: {}]   ;;  %s3859_s8 = inlined_call_operand.vmem [shape: f32[8,2], index: 8, kind: input, shape index: {}]   ;;  %s3860_s9 = inlined_call_operand.vmem [shape: f32[1,2], index: 9, kind: input, shape index: {}]   ;;  %s3861_s10 = inlined_call_operand.vmem [shape: f32[2,8], index: 10, kind: input, shape index: {}]   ;;  %s3862_s11 = inlined_call_operand.vmem [shape: f32[1,8], index: 11, kind: input, shape index: {}]   ;;  %s3863_s12 = inlined_call_operand.hbm [shape: f32[32,128], index: 12, kind: output, shape index: {}]  }
   0x1   :  { %18 = vsyncpa [#allocation5], 0 }
   0x2   :  { %20 = vsyncpa [#allocation5 + $0x1], 0  ;;  %s3495_s21 = smov 0   ;;  %s3497_s22 = smov 0  }
   0x3   :  { %s3499_s23 = smov 0   ;;  %s3501_s24 = smov 0  }
   0x4 LB: > { %3868 = sst [smem:[#allocation9_spill]] %s3412_s23  ;;  %s3516_s25 = sadd.s32 4294967295, %s3416_s24   ;;  %s3416_s24 = sphi %s3501_s24, %s3885_s24   ;;  %s3412_s23 = sphi %s3499_s23, %s3882_s23   ;;  %s3408_s22 = sphi %s3497_s22, %s3884_s22   ;;  %s3404_s21 = sphi %s3495_s21, %s3883_s21  }
   0x5   : > { %s2246_s26 = sadd.s32 4294967294, %s3416_s24   ;;  %s3520_s27 = sadd.s32 1, %s3416_s24  }
   0x6   : > { %s290_s28 = sadd.s32 1, %s3412_s23  ;;  %s287_s29 = ssub.s32 %s3416_s24, %s3520_s27 }
   0x7   : > { %p300_p0 = scmp.ne.s32.totalorder %s3412_s23, %s3408_s22  ;;  %p288_p1 = scmp.eq.s32.totalorder %s287_s29, 0 }
   0x8   : > { %p301_p2 = scmp.eq.s32.totalorder %s3516_s25, 1  ;;  %p306_p3 = scmp.ne.s32.totalorder %s3408_s22, %s3404_s21 }
   0x9   : > { %p307_p4 = scmp.eq.s32.totalorder %s2246_s26, 1  ;;  %p2247_p7 = scmp.ge.s32.totalorder %s3416_s24, 1 }
   0xa   : > { %s3531_s30 = scalar_select %p288_p1, %s3412_s23, %s290_s28  }
   0xb   : > { %p3533_p5 = por %p301_p2, %p300_p0  ;;  %p3537_p6 = por %p307_p4, %p306_p3 }
   0xc   : > { %3869 = sst [smem:[#allocation10_spill]] %s3531_s30  ;;  %p314_p8 = scmp.lt.s32.totalorder %s3416_s24, 3 }
   0xd   : > { %s3870_s13 = scalar_select %p3533_p5, 1, 0 }
   0xe   : > { %s3871_s14 = scalar_select %p3537_p6, 1, 0 }
   0xf   : > { %p3865_p9 = scmp.eq.s32.totalorder %s3516_s25, 0  ;;  %p3544_p10 = pnand %p2247_p7, %p314_p8 }
  0x10   : > { %s3418_s16 = smov [#allocation3]   ;;  %s3322_s26 = scalar_lea.hbm %s3852_s1, 14336 }
  0x11   : > { %s3872_s15 = scalar_select %p3544_p10, 1, 0 }
  0x12   : > { %s326_s17 = sshll.u32 %s3418_s16, 4  ;;  %p3253_p11 = pneg %p3544_p10  ;;  %s327_s17 = int_to_ptr.vmem [resolvable:$true] %s326_s17 }
  0x13   : > { %p3323_p13 = scmp.ne.s32.totalorder %s3852_s1, %s3322_s26  ;;  %p3329_p3 = scmp.lt.u32.totalorder %s3322_s26, %s3852_s1 }
  0x14   : > { %p3552_p12 = pnand %p3865_p9, %p3253_p11 }
  0x16   : > { %p3324_p0 = pneg %p3552_p12 }
  0x18   : > { %p3325_p1 = pnand %p3324_p0, %p3323_p13 }
  0x1a   : > { %p3326_p2 = pneg %p3325_p1 }
  0x1c   : > { %p3331_p4 = pnand %p3329_p3, %p3326_p2 }
  0x1e   : > { %3334 = shalt.err (!%p3331_p4)
}
  0x1f   : > { %s3335_s23 = scalar_lea.vmem %s327_s17, 14336  ;;  %p3343_p9 = scmp.lt.s32.totalorder %s327_s17, %s327_s17 }
  0x20   : > { %p3336_p7 = scmp.ne.s32.totalorder %s327_s17, %s3335_s23  ;;  %p3344_p6 = scmp.lt.s32.totalorder %s3335_s23, %s3335_s23 }
  0x22   : > { %p3338_p8 = pnand %p3336_p7, %p3324_p0  ;;  %p3345_p5 = por %p3344_p6, %p3343_p9 }
  0x24   : > { %p3339_p11 = pneg %p3338_p8 }
  0x26   : > { %p3346_p10 = pnand %p3345_p5, %p3339_p11 }
  0x28   : > { %3349 = shalt.err (!%p3346_p10)
}
  0x29   : > { %s3419_s19 = smov 128   ;;  %s3420_s20 = smov 8  }
  0x2a   : > { %3256 = dma.hbm_to_vmem [thread:$0]  (!%p3552_p12), %s3852_s1, 14336, %s327_s17, [#allocation4], %s3419_s19, %s3419_s19, %s3420_s20  }
  0x2b   : > { %p3874_p13 = scmp.ne.s32.totalorder %s3872_s15, 0 }
  0x2c   : > { %p3875_p1 = scmp.eq.s32.totalorder (!%p3874_p13), %s3516_s25, 0 }
  0x2d   : > { %381 = sbr.rel (%p3874_p13) target bundleno = 2907 (0xb5b), region = 68 }
  0x34   : > { %3395 = dma.done.wait (%p3875_p1), [#allocation4], 14336   ;;  %p3876_p0 = pmov %p3875_p1 }
  0x35   : > { %s2253_s23 = sshll.u32 %s3516_s25, 1  ;;  %v3421_v0 = vmov 0.0   ;;  %v436_v1 = vlaneseq  ;;  %v479_v3 = vld [vmem:[#allocation3] sm:$0xff]  ;;  %v480_v4 = vld [vmem:[#allocation3 + $0x8] sm:$0xff]  ;;  %v481_v5 = vld [vmem:[#allocation3 + $0x10] sm:$0xff]  ;;  %vm1318_vm12 = vcmask 1043456  }
  0x36   : > { %3397 = vsyncadd (%p3876_p0), [#allocation4], 4294952960  ;;  %p424_p5 = scmp.lt.s32.totalorder %s2253_s23, 3  ;;  %432 = vst [vmem:[#allocation2] sm:$0xff] %v3421_v0  ;;  %v2960_v6 = vpack.c.bf16 %v480_v4, %v479_v3  ;;  %v482_v7 = vld [vmem:[#allocation3 + $0x18] sm:$0xff]  ;;  %v483_v9 = vld [vmem:[#allocation3 + $0x20] sm:$0xff] }
  0x37   : > { %433 = vst [vmem:[#allocation2 + $0x18] sm:$0xff] %v3421_v0  ;;  %v3580_v2 = vshrl.u32 %v436_v1, 7  ;;  %v2964_v8 = vpack.c.bf16 %v482_v7, %v481_v5  ;;  %v484_v10 = vld [vmem:[#allocation3 + $0x28] sm:$0xff]  ;;  %v485_v15 = vld [vmem:[#allocation3 + $0x30] sm:$0xff]  ;;  %v486_v16 = vld [vmem:[#allocation3 + $0x38] sm:$0xff]  ;;  %vm1311_vm13 = vcmask 31744  }
  0x38   : > { %s3887_s23 = smov (!%p424_p5, %s2253_s23), 3  ;;  %2961 = vmatprep.subr.bf16.mxu0 %v2960_v6  ;;  %v2968_v12 = vpack.c.bf16 %v484_v10, %v483_v9  ;;  %v2972_v18 = vpack.c.bf16 %v486_v16, %v485_v15  ;;  %v487_v19 = vld [vmem:[#allocation3 + $0x40] sm:$0xff]  ;;  %v488_v20 = vld [vmem:[#allocation3 + $0x48] sm:$0xff]  ;;  %v489_v23 = vld [vmem:[#allocation3 + $0x50] sm:$0xff]  ;;  %vm3425_vm14 = vmmov 0   ;;  %p3879_p9 = scmp.ne.s32.totalorder %s3870_s13, 0 }
  0x39   : > { %s2254_s30 = sshll.u32 %s3887_s23, 3  ;;  %v3586_v11 = vand.u32 7, %v3580_v2  ;;  %2963 = vmatpush3.bf16.msra.mxu0 %v2960_v6  ;;  %v2976_v21 = vpack.c.bf16 %v488_v20, %v487_v19  ;;  %v490_v24 = vld [vmem:[#allocation3 + $0x58] sm:$0xff]  ;;  %v491_v26 = vld [vmem:[#allocation3 + $0x60] sm:$0xff]  ;;  %v492_v27 = vld [vmem:[#allocation3 + $0x68] sm:$0xff]  ;;  %v3596_v28 = vadd.s32 8, %v3580_v2 }
  0x3a   : > { %s427_s18 = scalar_lea.vmem %s3851_s0, %s2254_s30  ;;  %2965 = vmatprep.subr.bf16.mxu0 %v2964_v8  ;;  %v2980_v25 = vpack.c.bf16 %v490_v24, %v489_v23  ;;  %v2984_v29 = vpack.c.bf16 %v492_v27, %v491_v26  ;;  %v493_v30 = vld [vmem:[#allocation3 + $0x70] sm:$0xff]  ;;  %v494_v31 = vld [vmem:[#allocation3 + $0x78] sm:$0xff]  ;;  %v693_v34 = vld [vmem:[#allocation3 + $0x100] sm:$0xff]  ;;  %s420_s23 = sand.u32 1, %s3408_s22  }
  0x3b   : > { %v3588_v13 = vld [vmem:[%s427_s18] sm:$0xff]  ;;  %v3590_v14 = vld [vmem:[%s427_s18 + $0x8] sm:$0xff]  ;;  %v465_v17 = vadd.s32 4294967293, %v3586_v11  ;;  %v3599_v32 = vand.u32 7, %v3596_v28  ;;  %v2988_v33 = vpack.c.bf16 %v494_v31, %v493_v30  ;;  %v679_v38 = vadd.s32 4294967295, %v3586_v11  ;;  %v695_v39 = vld [vmem:[#allocation3 + $0x110] sm:$0xff] }
  0x3c   : > { %434 = vst [vmem:[#allocation2 + $0x8] sm:$0xff] %v3588_v13  ;;  %435 = vst [vmem:[#allocation2 + $0x10] sm:$0xff] %v3590_v14  ;;  %v694_v35 = vld [vmem:[#allocation3 + $0x108] sm:$0xff]  ;;  %v696_v40 = vld [vmem:[#allocation3 + $0x118] sm:$0xff]  ;;  %s2252_s30 = sshll.u32 %s420_s23, 4  ;;  %s2296_s18 = sshll.u32 %s3516_s25, 8 }
  0x3d   : > { %2967 = vmatpush3.bf16.msra.mxu0 %v2964_v8  ;;  %vm467_vm0 = vcmp.ge.s32.totalorder %v465_v17, 0  ;;  %v466_v36 = vadd.s32 4294967293, %v3599_v32  ;;  %v2992_v37 = vpack.c.bf16 %v694_v35, %v693_v34  ;;  %v511_v41 = vld [vmem:[#allocation3 + $0x80] sm:$0xff]  ;;  %v512_v42 = vld [vmem:[#allocation3 + $0x88] sm:$0xff]  ;;  %v2996_v45 = vpack.c.bf16 %v696_v40, %v695_v39  ;;  %v513_v49 = vld [vmem:[#allocation3 + $0x90] sm:$0xff]  ;;  %s422_s15 = scalar_lea.vmem [#allocation6], %s2252_s30  ;;  %s3807_s19 = scalar_lea.hbm %s3863_s12, %s2296_s18 }
  0x3e   : > { %2969 = vmatprep.subr.bf16.mxu0 %v2968_v12  ;;  %v2928_v44 = vpack.c.bf16 %v512_v42, %v511_v41  ;;  %vm681_vm2 = vcmp.ge.s32.totalorder %v679_v38, 0  ;;  %v697_v47 = vld [vmem:[#allocation3 + $0x120] sm:$0xff]  ;;  %v698_v48 = vld [vmem:[#allocation3 + $0x128] sm:$0xff]  ;;  %v514_v50 = vld [vmem:[#allocation3 + $0x98] sm:$0xff]  ;;  %v497_v35 = vadd.s32 4294967294, %v3586_v11  ;;  %s2172_s17 = sshll.u32 %s422_s15, 4  ;;  %s3801_s17 = int_to_ptr.vmem [resolvable:$true] %s2172_s17 }
  0x3f   : > { %vm468_vm1 = vcmp.ge.s32.totalorder %v466_v36, 0  ;;  %v2932_v51 = vpack.c.bf16 %v514_v50, %v513_v49  ;;  %v3000_v52 = vpack.c.bf16 %v698_v48, %v697_v47  ;;  %v699_v53 = vld [vmem:[#allocation3 + $0x130] sm:$0xff]  ;;  %v700_v54 = vld [vmem:[#allocation3 + $0x138] sm:$0xff]  ;;  %v515_v55 = vld [vmem:[#allocation3 + $0xa0] sm:$0xff]  ;;  %v498_v36 = vadd.s32 4294967294, %v3599_v32  ;;  %s3810_s20 = scalar_lea.sflag [#allocation5], %s420_s23 }
  0x40   : > { %2929 = vmatprep.subr.bf16.mxu1 %v2928_v44  ;;  %v516_v56 = vld [vmem:[#allocation3 + $0xa8] sm:$0xff]  ;;  %v3004_v58 = vpack.c.bf16 %v700_v54, %v699_v53  ;;  %v701_v59 = vld [vmem:[#allocation3 + $0x140] sm:$0xff]  ;;  %v517_v61 = vld [vmem:[#allocation3 + $0xb0] sm:$0xff]  ;;  %vm499_vm4 = vcmp.ge.s32.totalorder %v497_v35, 0  ;;  %s3350_s25 = scalar_lea.vmem %s3801_s17, 256  ;;  %s3427_s28 = smov [#allocation6]  }
  0x41   : > { %2971 = vmatpush3.bf16.msra.mxu0 %v2968_v12  ;;  %2931 = vmatpush3.bf16.msra.mxu1 %v2928_v44  ;;  %v2936_v57 = vpack.c.bf16 %v516_v56, %v515_v55  ;;  %v702_v60 = vld [vmem:[#allocation3 + $0x148] sm:$0xff]  ;;  %v518_v62 = vld [vmem:[#allocation3 + $0xb8] sm:$0xff]  ;;  %v703_v3 = vld [vmem:[#allocation3 + $0x150] sm:$0xff]  ;;  %vm500_vm5 = vcmp.ge.s32.totalorder %v498_v36, 0  ;;  %p3351_p6 = scmp.ne.s32.totalorder %s3801_s17, %s3350_s25  ;;  %s3354_s29 = sshll.u32 %s3427_s28, 4  ;;  %s3355_s29 = int_to_ptr.vmem [resolvable:$false] %s3354_s29 }
  0x42   : > { %2973 = vmatprep.subr.bf16.mxu0 %v2972_v18  ;;  %2933 = vmatprep.subr.bf16.mxu1 %v2932_v51  ;;  %v2940_v63 = vpack.c.bf16 %v518_v62, %v517_v61  ;;  %v3008_v0 = vpack.c.bf16 %v702_v60, %v701_v59  ;;  %v704_v4 = vld [vmem:[#allocation3 + $0x158] sm:$0xff]  ;;  %v519_v5 = vld [vmem:[#allocation3 + $0xc0] sm:$0xff]  ;;  %v520_v6 = vld [vmem:[#allocation3 + $0xc8] sm:$0xff]  ;;  %s3356_s30 = scalar_lea.vmem %s3355_s29, 512  ;;  %p3357_p2 = scmp.lt.s32.totalorder %s3801_s17, %s3355_s29 }
  0x43   : > { %v463_v22 = vld [vmem:[#allocation2 + $0x5] sm:$0xff]  ;;  %v464_v43 = vld [vmem:[#allocation2 + $0xd] sm:$0xff]  ;;  %v2944_v7 = vpack.c.bf16 %v520_v6, %v519_v5  ;;  %v3012_v8 = vpack.c.bf16 %v704_v4, %v703_v3  ;;  %v522_v15 = vld [vmem:[#allocation3 + $0xd8] sm:$0xff]  ;;  %p3352_p10 = pnand %p3351_p6, %p3879_p9  ;;  %p3358_p3 = scmp.lt.s32.totalorder %s3356_s30, %s3350_s25 }
  0x44   : > { %2578 = vmatprep.mubr.msk.f32.mxu0 %vm467_vm0, %v463_v22  ;;  %v677_v46 = vld [vmem:[#allocation2 + $0x7] sm:$0xff]  ;;  %v521_v12 = vld [vmem:[#allocation3 + $0xd0] sm:$0xff]  ;;  %v708_v19 = vld [vmem:[#allocation3 + $0x178] sm:$0xff] }
  0x45   : > { %2975 = vmatpush3.bf16.msra.mxu0 %v2972_v18  ;;  %2935 = vmatpush3.bf16.msra.mxu1 %v2932_v51  ;;  %v705_v9 = vld [vmem:[#allocation3 + $0x160] sm:$0xff]  ;;  %v706_v10 = vld [vmem:[#allocation3 + $0x168] sm:$0xff]  ;;  %v2948_v16 = vpack.c.bf16 %v522_v15, %v521_v12  ;;  %v707_v18 = vld [vmem:[#allocation3 + $0x170] sm:$0xff]  ;;  %p3353_p12 = pneg %p3352_p10  ;;  %p3359_p4 = por %p3358_p3, %p3357_p2 }
  0x46   : > { %2977 = vmatprep.subr.bf16.mxu0 %v2976_v21  ;;  %2937 = vmatprep.subr.bf16.mxu1 %v2936_v57  ;;  %v3016_v17 = vpack.c.bf16 %v706_v10, %v705_v9  ;;  %v523_v20 = vld [vmem:[#allocation3 + $0xe0] sm:$0xff]  ;;  %v3020_v23 = vpack.c.bf16 %v708_v19, %v707_v18  ;;  %v525_v26 = vld [vmem:[#allocation3 + $0xf0] sm:$0xff]  ;;  %v526_v27 = vld [vmem:[#allocation3 + $0xf8] sm:$0xff] }
  0x47   : > { %v786_v24 = vld [vmem:[#allocation3 + $0x180] sm:$0xff]  ;;  %v2956_v30 = vpack.c.bf16 %v526_v27, %v525_v26  ;;  %v789_v34 = vld [vmem:[#allocation3 + $0x198] sm:$0xff]  ;;  %v496_v39 = vld [vmem:[#allocation2 + $0xe] sm:$0xff]  ;;  %p3360_p7 = pnand %p3359_p4, %p3353_p12 }
  0x48   : > { %v495_v38 = vld [vmem:[#allocation2 + $0x6] sm:$0xff]  ;;  %v1220_v47 = vld [vmem:[%s3855_s4 + $0x18] sm:$0xff]  ;;  %v1223_v56 = vld [vmem:[%s3855_s4 + $0x30] sm:$0xff] }
  0x49   : > { %2979 = vmatpush3.bf16.msra.mxu0 %v2976_v21  ;;  %2939 = vmatpush3.bf16.msra.mxu1 %v2936_v57  ;;  %v524_v21 = vld [vmem:[#allocation3 + $0xe8] sm:$0xff]  ;;  %v790_v41 = vld [vmem:[#allocation3 + $0x1a0] sm:$0xff]  ;;  %v793_v53 = vld [vmem:[#allocation3 + $0x1b8] sm:$0xff] }
  0x4a   : > { %2981 = vmatprep.subr.bf16.mxu0 %v2980_v25  ;;  %2941 = vmatprep.subr.bf16.mxu1 %v2940_v63  ;;  %v2952_v22 = vpack.c.bf16 %v524_v21, %v523_v20  ;;  %v791_v42 = vld [vmem:[#allocation3 + $0x1a8] sm:$0xff]  ;;  %v1221_v50 = vld [vmem:[%s3855_s4 + $0x20] sm:$0xff]  ;;  %v1224_v57 = vld [vmem:[%s3855_s4 + $0x38] sm:$0xff]  ;;  %v881_v21 = vadd.s32 1, %v3586_v11 }
  0x4b   : > { %2543 = vmatprep.mubr.msk.f32.mxu1 %vm499_vm4, %v495_v38  ;;  %v1218_v44 = vld [vmem:[%s3855_s4 + $0x8] sm:$0xff]  ;;  %v3032_v48 = vpack.c.bf16 %v791_v42, %v790_v41  ;;  %v3164_v60 = vpack.c.bf16 %v1224_v57, %v1223_v56  ;;  %v1225_v62 = vld [vmem:[%s3855_s4 + $0x40] sm:$0xff]  ;;  %v797_v3 = vld [vmem:[#allocation3 + $0x1d8] sm:$0xff]  ;;  %vm1728_vm4 = vcmask 130048  }
  0x4c   : > { %v1222_v51 = vld [vmem:[%s3855_s4 + $0x28] sm:$0xff]  ;;  %v1227_v6 = vld [vmem:[%s3855_s4 + $0x50] sm:$0xff]  ;;  %v895_v18 = vld [vmem:[#allocation3 + $0x200] sm:$0xff]  ;;  %vm885_vm6 = vcmp.lt.s32.totalorder %v881_v21, 8 }
  0x4d   : > { %2983 = vmatpush3.bf16.msra.mxu0 %v2980_v25  ;;  %2943 = vmatpush3.bf16.msra.mxu1 %v2940_v63  ;;  %v787_v25 = vld [vmem:[#allocation3 + $0x188] sm:$0xff]  ;;  %v3160_v54 = vpack.c.bf16 %v1222_v51, %v1221_v50  ;;  %v800_v15 = vld [vmem:[#allocation3 + $0x1f0] sm:$0xff]  ;;  %v899_v26 = vld [vmem:[#allocation3 + $0x220] sm:$0xff]  ;;  %v990_v50 = vadd.s32 2, %v3586_v11 }
  0x4e   : > { %2985 = vmatprep.subr.bf16.mxu0 %v2984_v29  ;;  %2945 = vmatprep.subr.bf16.mxu1 %v2944_v7  ;;  %v3024_v31 = vpack.c.bf16 %v787_v25, %v786_v24  ;;  %v795_v59 = vld [vmem:[#allocation3 + $0x1c8] sm:$0xff]  ;;  %v906_v38 = vld [vmem:[#allocation3 + $0x258] sm:$0xff]  ;;  %v1006_v51 = vld [vmem:[#allocation3 + $0x290] sm:$0xff] }
  0x4f   : > { %v1226_v63 = vld [vmem:[%s3855_s4 + $0x48] sm:$0xff]  ;;  %vm994_vm8 = vcmp.lt.s32.totalorder %v990_v50, 8  ;;  %v1008_v56 = vld [vmem:[#allocation3 + $0x2a0] sm:$0xff]  ;;  %v1116_v21 = vld [vmem:[#allocation3 + $0x318] sm:$0xff] }
  0x50   : > { %v3168_v4 = vpack.c.bf16 %v1226_v63, %v1225_v62  ;;  %v799_v9 = vld [vmem:[#allocation3 + $0x1e8] sm:$0xff]  ;;  %v1012_v62 = vld [vmem:[#allocation3 + $0x2c0] sm:$0xff] }
  0x51   : > { %2987 = vmatpush3.bf16.msra.mxu0 %v2984_v29  ;;  %2947 = vmatpush3.bf16.msra.mxu1 %v2944_v7  ;;  %v680_v29 = vadd.s32 4294967295, %v3599_v32  ;;  %v1228_v7 = vld [vmem:[%s3855_s4 + $0x58] sm:$0xff]  ;;  %v896_v19 = vld [vmem:[#allocation3 + $0x208] sm:$0xff] }
  0x52   : > { %2989 = vmatprep.subr.bf16.mxu0 %v2988_v33  ;;  %2949 = vmatprep.subr.bf16.mxu1 %v2948_v16  ;;  %v3172_v10 = vpack.c.bf16 %v1228_v7, %v1227_v6  ;;  %v3056_v20 = vpack.c.bf16 %v896_v19, %v895_v18  ;;  %v879_v25 = vld [vmem:[#allocation2 + $0x9] sm:$0xff]  ;;  %v1016_v6 = vld [vmem:[#allocation3 + $0x2e0] sm:$0xff]  ;;  %v1099_v19 = vadd.s32 3, %v3586_v11 }
  0x53   : > { %vm682_vm3 = vcmp.ge.s32.totalorder %v680_v29, 0  ;;  %v900_v27 = vld [vmem:[#allocation3 + $0x228] sm:$0xff] }
  0x54   : > { %v3064_v29 = vpack.c.bf16 %v900_v27, %v899_v26  ;;  %v904_v35 = vld [vmem:[#allocation3 + $0x248] sm:$0xff]  ;;  %vm1103_vm10 = vcmp.lt.s32.totalorder %v1099_v19, 8 }
  0x55   : > { %2991 = vmatpush3.bf16.msra.mxu0 %v2988_v33  ;;  %2951 = vmatpush3.bf16.msra.mxu1 %v2948_v16  ;;  %v788_v33 = vld [vmem:[#allocation3 + $0x190] sm:$0xff]  ;;  %v801_v16 = vld [vmem:[#allocation3 + $0x1f8] sm:$0xff]  ;;  %v908_v41 = vld [vmem:[#allocation3 + $0x268] sm:$0xff] }
  0x56   : > { %2993 = vmatprep.subr.bf16.mxu0 %v2992_v37  ;;  %2953 = vmatprep.subr.bf16.mxu1 %v2952_v22  ;;  %v3028_v40 = vpack.c.bf16 %v789_v34, %v788_v33  ;;  %v903_v34 = vld [vmem:[#allocation3 + $0x240] sm:$0xff]  ;;  %v1009_v57 = vld [vmem:[#allocation3 + $0x2a8] sm:$0xff] }
  0x57   : > { %v3072_v36 = vpack.c.bf16 %v904_v35, %v903_v34  ;;  %v1013_v63 = vld [vmem:[#allocation3 + $0x2c8] sm:$0xff] }
  0x58   : > { %2579 = vmatmul.mubr.msk.f32.vlgmr.msra.gmra.mrb[0].mxu0 %vm468_vm1, %v464_v43  ;;  %v1217_v43 = vld [vmem:[%s3855_s4] sm:$0xff]  ;;  %v1017_v7 = vld [vmem:[#allocation3 + $0x2e8] sm:$0xff] }
  0x59   : > { %2995 = vmatpush3.bf16.msra.mxu0 %v2992_v37  ;;  %2613 = vmatprep.mubr.msk.f32.mxu0 %vm681_vm2, %v677_v46  ;;  %v678_v37 = vld [vmem:[#allocation2 + $0xf] sm:$0xff]  ;;  %v3152_v46 = vpack.c.bf16 %v1218_v44, %v1217_v43  ;;  %v910_v44 = vld [vmem:[#allocation3 + $0x278] sm:$0xff] }
  0x5a   : > { %2997 = vmatprep.subr.bf16.mxu0 %v2996_v45  ;;  %2955 = vmatpush3.bf16.msra.mxu1 %v2952_v22  ;;  %v897_v22 = vld [vmem:[#allocation3 + $0x210] sm:$0xff]  ;;  %v1118_v26 = vld [vmem:[#allocation3 + $0x328] sm:$0xff] }
  0x5b   : > { %2957 = vmatprep.subr.bf16.mxu1 %v2956_v30  ;;  %v909_v43 = vld [vmem:[#allocation3 + $0x270] sm:$0xff]  ;;  %v1122_v34 = vld [vmem:[#allocation3 + $0x348] sm:$0xff] }
  0x5d   : > { %2999 = vmatpush3.bf16.msra.mxu0 %v2996_v45  ;;  %v1219_v45 = vld [vmem:[%s3855_s4 + $0x10] sm:$0xff] }
  0x5e   : > { %3001 = vmatprep.subr.bf16.mxu0 %v3000_v52  ;;  %2959 = vmatpush3.bf16.msra.mxu1 %v2956_v30  ;;  %v3156_v49 = vpack.c.bf16 %v1220_v47, %v1219_v45  ;;  %v901_v30 = vld [vmem:[#allocation3 + $0x230] sm:$0xff]  ;;  %v3084_v45 = vpack.c.bf16 %v910_v44, %v909_v43  ;;  %v1005_v47 = vld [vmem:[#allocation3 + $0x288] sm:$0xff]  ;;  %v1128_v43 = vld [vmem:[#allocation3 + $0x378] sm:$0xff] }
  0x5f   : > { %3153 = vmatprep.subr.bf16.mxu1 %v3152_v46 }
  0x61   : > { %3003 = vmatpush3.bf16.msra.mxu0 %v3000_v52  ;;  %2544 = vmatmul.mubr.msk.f32.vlgmr.msra.gmra.mrb[0].mxu1 %vm500_vm5, %v496_v39  ;;  %v792_v52 = vld [vmem:[#allocation3 + $0x1b0] sm:$0xff]  ;;  %vm1810_vm5 = vcmask 64512  }
  0x62   : > { %3005 = vmatprep.subr.bf16.mxu0 %v3004_v58  ;;  %3155 = vmatpush3.bf16.msra.mxu1 %v3152_v46  ;;  %v3036_v55 = vpack.c.bf16 %v793_v53, %v792_v52  ;;  %v1004_v46 = vld [vmem:[#allocation3 + $0x280] sm:$0xff]  ;;  %v1007_v52 = vld [vmem:[#allocation3 + $0x298] sm:$0xff] }
  0x63   : > { %3157 = vmatprep.subr.bf16.mxu1 %v3156_v49  ;;  %v880_v53 = vld [vmem:[#allocation2 + $0x11] sm:$0xff] }
  0x65   : > { %3007 = vmatpush3.bf16.msra.mxu0 %v3004_v58  ;;  %v794_v58 = vld [vmem:[#allocation3 + $0x1c0] sm:$0xff] }
  0x66   : > { %3009 = vmatprep.subr.bf16.mxu0 %v3008_v0  ;;  %3159 = vmatpush3.bf16.msra.mxu1 %v3156_v49  ;;  %v3040_v61 = vpack.c.bf16 %v795_v59, %v794_v58  ;;  %v3088_v49 = vpack.c.bf16 %v1005_v47, %v1004_v46  ;;  %v3096_v58 = vpack.c.bf16 %v1009_v57, %v1008_v56  ;;  %v1010_v59 = vld [vmem:[#allocation3 + $0x2b0] sm:$0xff]  ;;  %v1229_v47 = vld [vmem:[%s3855_s4 + $0x60] sm:$0xff] }
  0x67   : > { %3161 = vmatprep.subr.bf16.mxu1 %v3160_v54  ;;  %v1098_v46 = vld [vmem:[#allocation2 + $0x13] sm:$0xff]  ;;  %v2267_v56 = vld [vmem:[%s3853_s2] ss:$0 sm:$0xff] }
  0x69   : > { %3011 = vmatpush3.bf16.msra.mxu0 %v3008_v0  ;;  %v796_v0 = vld [vmem:[#allocation3 + $0x1d0] sm:$0xff] }
  0x6a   : > { %3013 = vmatprep.subr.bf16.mxu0 %v3012_v8  ;;  %3163 = vmatpush3.bf16.msra.mxu1 %v3160_v54  ;;  %v3044_v5 = vpack.c.bf16 %v797_v3, %v796_v0  ;;  %v3092_v54 = vpack.c.bf16 %v1007_v52, %v1006_v51  ;;  %v3104_v0 = vpack.c.bf16 %v1013_v63, %v1012_v62  ;;  %v1014_v3 = vld [vmem:[#allocation3 + $0x2d0] sm:$0xff] }
  0x6b   : > { %3165 = vmatprep.subr.bf16.mxu1 %v3164_v60  ;;  %v1231_v52 = vld [vmem:[%s3855_s4 + $0x70] sm:$0xff] }
  0x6d   : > { %3015 = vmatpush3.bf16.msra.mxu0 %v3012_v8  ;;  %v798_v8 = vld [vmem:[#allocation3 + $0x1e0] sm:$0xff] }
  0x6e   : > { %3017 = vmatprep.subr.bf16.mxu0 %v3016_v17  ;;  %3167 = vmatpush3.bf16.msra.mxu1 %v3164_v60  ;;  %v3048_v12 = vpack.c.bf16 %v799_v9, %v798_v8  ;;  %v1011_v60 = vld [vmem:[#allocation3 + $0x2b8] sm:$0xff]  ;;  %v3112_v8 = vpack.c.bf16 %v1017_v7, %v1016_v6  ;;  %v1018_v9 = vld [vmem:[#allocation3 + $0x2f0] sm:$0xff] }
  0x6f   : > { %3169 = vmatprep.subr.bf16.mxu1 %v3168_v4 }
  0x71   : > { %3019 = vmatpush3.bf16.msra.mxu0 %v3016_v17  ;;  %v3052_v17 = vpack.c.bf16 %v801_v16, %v800_v15  ;;  %v1113_v15 = vld [vmem:[#allocation3 + $0x300] sm:$0xff]  ;;  %v1114_v16 = vld [vmem:[#allocation3 + $0x308] sm:$0xff] }
  0x72   : > { %3021 = vmatprep.subr.bf16.mxu0 %v3020_v23  ;;  %3171 = vmatpush3.bf16.msra.mxu1 %v3168_v4  ;;  %v1015_v4 = vld [vmem:[#allocation3 + $0x2d8] sm:$0xff]  ;;  %v3120_v18 = vpack.c.bf16 %v1114_v16, %v1113_v15  ;;  %v2271_v15 = vld [vmem:[%s3854_s3] ss:$0 sm:$0xff] }
  0x73   : > { %3173 = vmatprep.subr.bf16.mxu1 %v3172_v10 }
  0x75   : > { %3023 = vmatpush3.bf16.msra.mxu0 %v3020_v23  ;;  %v898_v23 = vld [vmem:[#allocation3 + $0x218] sm:$0xff] }
  0x76   : > { %3025 = vmatprep.subr.bf16.mxu0 %v3024_v31  ;;  %3175 = vmatpush3.bf16.msra.mxu1 %v3172_v10  ;;  %v3060_v24 = vpack.c.bf16 %v898_v23, %v897_v22  ;;  %v1019_v10 = vld [vmem:[#allocation3 + $0x2f8] sm:$0xff] }
  0x77   : > { %v989_v22 = vld [vmem:[#allocation2 + $0x12] sm:$0xff] }
  0x78   : > { %2614 = vmatmul.mubr.msk.f32.vlgmr.msra.gmra.mrb[0].mxu0 %vm682_vm3, %v678_v37  ;;  %v905_v37 = vld [vmem:[#allocation3 + $0x250] sm:$0xff] }
  0x79   : > { %3027 = vmatpush3.bf16.msra.mxu0 %v3024_v31  ;;  %2648 = vmatprep.mubr.f32.mxu0 %v3588_v13  ;;  %v902_v31 = vld [vmem:[#allocation3 + $0x238] sm:$0xff]  ;;  %v3076_v39 = vpack.c.bf16 %v906_v38, %v905_v37 }
  0x7a   : > { %3029 = vmatprep.subr.bf16.mxu0 %v3028_v40  ;;  %v3068_v33 = vpack.c.bf16 %v902_v31, %v901_v30  ;;  %v1120_v30 = vld [vmem:[#allocation3 + $0x338] sm:$0xff] }
  0x7b   : > { %v1124_v37 = vld [vmem:[#allocation3 + $0x358] sm:$0xff] }
  0x7d   : > { %3031 = vmatpush3.bf16.msra.mxu0 %v3028_v40  ;;  %v907_v40 = vld [vmem:[#allocation3 + $0x260] sm:$0xff] }
  0x7e   : > { %3033 = vmatprep.subr.bf16.mxu0 %v3032_v48  ;;  %v3080_v42 = vpack.c.bf16 %v908_v41, %v907_v40  ;;  %v1126_v40 = vld [vmem:[#allocation3 + $0x368] sm:$0xff] }
  0x81   : > { %3035 = vmatpush3.bf16.msra.mxu0 %v3032_v48  ;;  %v882_v48 = vadd.s32 1, %v3599_v32 }
  0x82   : > { %3037 = vmatprep.subr.bf16.mxu0 %v3036_v55 }
  0x83   : > { %vm886_vm7 = vcmp.lt.s32.totalorder %v882_v48, 8  ;;  %v1230_v48 = vld [vmem:[%s3855_s4 + $0x68] sm:$0xff] }
  0x84   : > { %v3176_v50 = vpack.c.bf16 %v1230_v48, %v1229_v47 }
  0x85   : > { %3039 = vmatpush3.bf16.msra.mxu0 %v3036_v55  ;;  %v988_v55 = vld [vmem:[#allocation2 + $0xa] sm:$0xff] }
  0x86   : > { %3041 = vmatprep.subr.bf16.mxu0 %v3040_v61  ;;  %3177 = vmatprep.subr.bf16.mxu1 %v3176_v50 }
  0x87   : > { %3179 = vmatpush3.bf16.msra.mxu1 %v3176_v50 }
  0x89   : > { %3043 = vmatpush3.bf16.msra.mxu0 %v3040_v61  ;;  %v3100_v61 = vpack.c.bf16 %v1011_v60, %v1010_v59 }
  0x8a   : > { %3045 = vmatprep.subr.bf16.mxu0 %v3044_v5 }
  0x8d   : > { %3047 = vmatpush3.bf16.msra.mxu0 %v3044_v5  ;;  %v3108_v5 = vpack.c.bf16 %v1015_v4, %v1014_v3  ;;  %v3422_v3 = vmov 0.0078125|0.0078125  }
  0x8e   : > { %3049 = vmatprep.subr.bf16.mxu0 %v3048_v12 }
  0x91   : > { %3051 = vmatpush3.bf16.msra.mxu0 %v3048_v12  ;;  %v3116_v12 = vpack.c.bf16 %v1019_v10, %v1018_v9 }
  0x92   : > { %3053 = vmatprep.subr.bf16.mxu0 %v3052_v17 }
  0x95   : > { %3055 = vmatpush3.bf16.msra.mxu0 %v3052_v17  ;;  %v991_v17 = vadd.s32 2, %v3599_v32 }
  0x96   : > { %3057 = vmatprep.subr.bf16.mxu0 %v3056_v20 }
  0x97   : > { %vm995_vm9 = vcmp.lt.s32.totalorder %v991_v17, 8 }
  0x98   : > { %2649 = vmatmul.mubr.f32.vlgmr.msra.gmra.mrb[0].mxu0 %v3590_v14 }
  0x99   : > { %3059 = vmatpush3.bf16.msra.mxu0 %v3056_v20  ;;  %2683 = vmatprep.mubr.msk.f32.mxu0 %vm885_vm6, %v879_v25  ;;  %v1115_v20 = vld [vmem:[#allocation3 + $0x310] sm:$0xff]  ;;  %v1117_v25 = vld [vmem:[#allocation3 + $0x320] sm:$0xff]  ;;  %vm1897_vm6 = vcmask 1041408  }
  0x9a   : > { %3061 = vmatprep.subr.bf16.mxu0 %v3060_v24  ;;  %v3124_v23 = vpack.c.bf16 %v1116_v21, %v1115_v20  ;;  %v3128_v27 = vpack.c.bf16 %v1118_v26, %v1117_v25 }
  0x9d   : > { %3063 = vmatpush3.bf16.msra.mxu0 %v3060_v24  ;;  %v1097_v24 = vld [vmem:[#allocation2 + $0xb] sm:$0xff] }
  0x9e   : > { %3065 = vmatprep.subr.bf16.mxu0 %v3064_v29 }
  0xa1   : > { %3067 = vmatpush3.bf16.msra.mxu0 %v3064_v29  ;;  %v1119_v29 = vld [vmem:[#allocation3 + $0x330] sm:$0xff] }
  0xa2   : > { %3069 = vmatprep.subr.bf16.mxu0 %v3068_v33  ;;  %v3132_v31 = vpack.c.bf16 %v1120_v30, %v1119_v29 }
  0xa5   : > { %3071 = vmatpush3.bf16.msra.mxu0 %v3068_v33  ;;  %v1121_v33 = vld [vmem:[#allocation3 + $0x340] sm:$0xff] }
  0xa6   : > { %3073 = vmatprep.subr.bf16.mxu0 %v3072_v36  ;;  %v3136_v35 = vpack.c.bf16 %v1122_v34, %v1121_v33 }
  0xa9   : > { %3075 = vmatpush3.bf16.msra.mxu0 %v3072_v36  ;;  %v1123_v36 = vld [vmem:[#allocation3 + $0x350] sm:$0xff] }
  0xaa   : > { %3077 = vmatprep.subr.bf16.mxu0 %v3076_v39  ;;  %v3140_v38 = vpack.c.bf16 %v1124_v37, %v1123_v36 }
  0xad   : > { %3079 = vmatpush3.bf16.msra.mxu0 %v3076_v39  ;;  %v1125_v39 = vld [vmem:[#allocation3 + $0x360] sm:$0xff] }
  0xae   : > { %3081 = vmatprep.subr.bf16.mxu0 %v3080_v42  ;;  %v3144_v41 = vpack.c.bf16 %v1126_v40, %v1125_v39 }
  0xb1   : > { %3083 = vmatpush3.bf16.msra.mxu0 %v3080_v42  ;;  %v1127_v42 = vld [vmem:[#allocation3 + $0x370] sm:$0xff] }
  0xb2   : > { %3085 = vmatprep.subr.bf16.mxu0 %v3084_v45  ;;  %v3148_v44 = vpack.c.bf16 %v1128_v43, %v1127_v42  ;;  %v2272_v42 = vld [vmem:[%s3857_s6] ss:$0 sm:$0xff] }
  0xb5   : > { %3087 = vmatpush3.bf16.msra.mxu0 %v3084_v45  ;;  %v1100_v45 = vadd.s32 3, %v3599_v32 }
  0xb6   : > { %3089 = vmatprep.subr.bf16.mxu0 %v3088_v49 }
  0xb7   : > { %vm1104_vm11 = vcmp.lt.s32.totalorder %v1100_v45, 8  ;;  %v2273_v45 = vld [vmem:[%s3858_s7] ss:$0 sm:$0xff] }
  0xb8   : > { %2684 = vmatmul.mubr.msk.f32.vlgmr.msra.gmra.mrb[0].mxu0 %vm886_vm7, %v880_v53  ;;  %v1232_v53 = vld [vmem:[%s3855_s4 + $0x78] sm:$0xff]  ;;  %vm1893_vm7 = vcmask 15360  }
  0xb9   : > { %3091 = vmatpush3.bf16.msra.mxu0 %v3088_v49  ;;  %2718 = vmatprep.mubr.msk.f32.mxu0 %vm994_vm8, %v988_v55 }
  0xba   : > { %3093 = vmatprep.subr.bf16.mxu0 %v3092_v54 }
  0xbd   : > { %3095 = vmatpush3.bf16.msra.mxu0 %v3092_v54  ;;  %v3180_v54 = vpack.c.bf16 %v1232_v53, %v1231_v52 }
  0xbe   : > { %3097 = vmatprep.subr.bf16.mxu0 %v3096_v58 }
  0xbf   : > { %3181 = vmatprep.subr.bf16.mxu1 %v3180_v54 }
  0xc0   : > { %3183 = vmatpush3.bf16.msra.mxu1 %v3180_v54 }
  0xc1   : > { %3099 = vmatpush3.bf16.msra.mxu0 %v3096_v58 }
  0xc2   : > { %3101 = vmatprep.subr.bf16.mxu0 %v3100_v61 }
  0xc5   : > { %3103 = vmatpush3.bf16.msra.mxu0 %v3100_v61 }
  0xc6   : > { %3105 = vmatprep.subr.bf16.mxu0 %v3104_v0 }
  0xc9   : > { %3107 = vmatpush3.bf16.msra.mxu0 %v3104_v0  ;;  %v1310_v0 = vld [vmem:[%s3856_s5] sm:$0xf] }
  0xca   : > { %3109 = vmatprep.subr.bf16.mxu0 %v3108_v5  ;;  %2791 = vmatprep.subr.msk.mxu1 %vm1318_vm12, %v1310_v0 }
  0xcd   : > { %3111 = vmatpush3.bf16.msra.mxu0 %v3108_v5 }
  0xce   : > { %3113 = vmatprep.subr.bf16.mxu0 %v3112_v8 }
  0xd1   : > { %3115 = vmatpush3.bf16.msra.mxu0 %v3112_v8 }
  0xd2   : > { %3117 = vmatprep.subr.bf16.mxu0 %v3116_v12 }
  0xd5   : > { %3119 = vmatpush3.bf16.msra.mxu0 %v3116_v12 }
  0xd6   : > { %3121 = vmatprep.subr.bf16.mxu0 %v3120_v18 }
  0xd8   : > { %2719 = vmatmul.mubr.msk.f32.vlgmr.msra.gmra.mrb[0].mxu0 %vm995_vm9, %v989_v22  ;;  %v3423_v22 = vmov 0  }
  0xd9   : > { %3123 = vmatpush3.bf16.msra.mxu0 %v3120_v18  ;;  %2753 = vmatprep.mubr.msk.f32.mxu0 %vm1103_vm10, %v1097_v24 }
  0xda   : > { %3125 = vmatprep.subr.bf16.mxu0 %v3124_v23  ;;  %3307 = vset.pattern.permute.xlu0 %v3423_v22 }
  0xdb   : > { %3308 = vset.pattern.permute.xlu1 %v3423_v22 }
  0xdd   : > { %3127 = vmatpush3.bf16.msra.mxu0 %v3124_v23 }
  0xde   : > { %3129 = vmatprep.subr.bf16.mxu0 %v3128_v27 }
  0xe1   : > { %3131 = vmatpush3.bf16.msra.mxu0 %v3128_v27 }
  0xe2   : > { %3133 = vmatprep.subr.bf16.mxu0 %v3132_v31 }
  0xe5   : > { %3135 = vmatpush3.bf16.msra.mxu0 %v3132_v31 }
  0xe6   : > { %3137 = vmatprep.subr.bf16.mxu0 %v3136_v35 }
  0xe9   : > { %3139 = vmatpush3.bf16.msra.mxu0 %v3136_v35 }
  0xea   : > { %3141 = vmatprep.subr.bf16.mxu0 %v3140_v38 }
  0xed   : > { %3143 = vmatpush3.bf16.msra.mxu0 %v3140_v38 }
  0xee   : > { %3145 = vmatprep.subr.bf16.mxu0 %v3144_v41 }
  0xf1   : > { %3147 = vmatpush3.bf16.msra.mxu0 %v3144_v41 }
  0xf2   : > { %3149 = vmatprep.subr.bf16.mxu0 %v3148_v44 }
  0xf5   : > { %3151 = vmatpush3.bf16.msra.mxu0 %v3148_v44 }
  0xf8   : > { %2754 = vmatmul.mubr.msk.f32.vlgmr.msra.gmra.mrb[0].mxu0 %vm1104_vm11, %v1098_v46 }
 0x134   : > { %v2545_v49 = vpop.f32.mrb[0].mxu1 }
 0x135   : > { %v593_v51 = vpop.f32.mrb[1].mxu1 }
 0x1cb   : > { %v2755_v55 = vpop.f32.mrb[0].mxu0 }
 0x1cc   : > { %v3235_v57 = vadd.f32 %v2755_v55, %v2545_v49  ;;  %v1195_v58 = vpop.f32.mrb[1].mxu0 }
 0x1cd   : > { %v3236_v59 = vadd.f32 %v1195_v58, %v593_v51  ;;  %v3745_v58 = vld [vmem:[#allocation2] sm:$0xff] }
 0x1ce   : > { %v1214_v60 = vadd.f32 %v3235_v57, %v2267_v56  ;;  %v3424_v57 = vmov 0.0|0.0  }
 0x1cf   : > { %v1213_v61 = vadd.f32 %v3236_v59, %v2267_v56  ;;  %v1697_v59 = vmul.u32 8, %v3580_v2 }
 0x1d0   : > { %v1216_v63 = vmul.f32 %v1214_v60, %v1214_v60 }
 0x1d1   : > { %v1215_v62 = vmul.f32 %v1213_v61, %v1213_v61 }
 0x1d3   : > { %2788 = vmatprep.mubr.f32.mxu1 %v1215_v62 }
 0x1d4   : > { %2789 = vmatmul.mubr.f32.vlgmr.msra.gmra.mrb[2].mxu1 %v1216_v63 }
 0x1d5   : > { %2792 = vmatpush3.msk.msra.mxu1 %vm1318_vm12, %v1310_v0 }
 0x1d6   : > { %3184 = vmatprep.subr.bf16.mxu1 %v3422_v3 }
 0x2a7   : > { %v2790_v4 = vpop.f32.mrb[2].mxu1 }
 0x2a8   : > { %v1305_v5 = vadd.f32 1e-06, %v2790_v4  ;;  %v1299_v6 = vpop.f32.mrb[3].mxu1 }
 0x2a9   : > { %v1300_v7 = vadd.f32 1e-06, %v1299_v6  ;;  %v1885_v6 = vld [vmem:[%s3861_s10] sm:$0x3] }
 0x2ab   : > { %3309 = vrsqrt.f32 %v1300_v7  ;;  %v2280_v7 = vld [vmem:[%s3860_s9] ss:$0 sm:$0xff] }
 0x2ac   : > { %3311 = vrsqrt.f32 %v1305_v5 }
 0x2b5   : > { %v3310_v8 = vpop.eup %3309 }
 0x2b6   : > { %v3312_v9 = vpop.eup %3311  ;;  %2793 = vmatprep.mubr.msk.f32.mxu1 %vm1311_vm13, %v3310_v8 }
 0x2b7   : > { %2794 = vmatmul.mubr.msk.f32.vlgmr.msra.gmra.mrb[4].mxu1 %vm1311_vm13, %v3312_v9 }
 0x2b8   : > { %3185 = vmatpush3.bf16.msra.mxu1 %v3422_v3 }
 0x2b9   : > { %3186 = vmatprep.subr.bf16.mxu1 %v3422_v3 }
 0x2bc   : > { %3187 = vmatpush3.bf16.msra.mxu1 %v3422_v3 }
 0x2bd   : > { %3188 = vmatprep.subr.bf16.mxu1 %v3422_v3 }
 0x2c0   : > { %3189 = vmatpush3.bf16.msra.mxu1 %v3422_v3 }
 0x2c1   : > { %3190 = vmatprep.subr.bf16.mxu1 %v3422_v3 }
 0x2c4   : > { %3191 = vmatpush3.bf16.msra.mxu1 %v3422_v3 }
 0x2c5   : > { %3192 = vmatprep.subr.bf16.mxu1 %v3422_v3 }
 0x2c8   : > { %3193 = vmatpush3.bf16.msra.mxu1 %v3422_v3 }
 0x2c9   : > { %3194 = vmatprep.subr.bf16.mxu1 %v3422_v3 }
 0x2cc   : > { %3195 = vmatpush3.bf16.msra.mxu1 %v3422_v3 }
 0x2cd   : > { %3196 = vmatprep.subr.bf16.mxu1 %v3422_v3 }
 0x2d0   : > { %3197 = vmatpush3.bf16.msra.mxu1 %v3422_v3 }
 0x2d1   : > { %3198 = vmatprep.subr.bf16.mxu1 %v3422_v3 }
 0x2d4   : > { %3199 = vmatpush3.bf16.msra.mxu1 %v3422_v3 }
 0x2d5   : > { %3200 = vmatprep.subr.bf16.mxu1 %v3422_v3 }
 0x38a   : > { %v2795_v10 = vpop.f32.mrb[4].mxu1 }
 0x38b   : > { %v1398_v12 = vmul.f32 %v2795_v10, %v1214_v60  ;;  %v1388_v16 = vpop.f32.mrb[5].mxu1 }
 0x38c   : > { %v1397_v17 = vmul.f32 %v1388_v16, %v1213_v61 }
 0x38d   : > { %v3690_v19 = vmul.f32 %v2271_v15, %v1398_v12 }
 0x38e   : > { %v3688_v18 = vmul.f32 %v2271_v15, %v1397_v17 }
 0x38f   : > { %v1484_v21 = vmul.f32 %v3690_v19, %v3690_v19 }
 0x390   : > { %2828 = vmatprep.mubr.f32.mxu1 %v3688_v18  ;;  %v1483_v20 = vmul.f32 %v3688_v18, %v3688_v18 }
 0x391   : > { %2829 = vmatmul.mubr.f32.vlgmr.msra.gmra.mrb[6].mxu1 %v3690_v19 }
 0x392   : > { %3201 = vmatpush3.bf16.msra.mxu1 %v3422_v3  ;;  %2863 = vmatprep.mubr.f32.mxu1 %v1483_v20 }
 0x393   : > { %3202 = vmatprep.subr.bf16.mxu1 %v3422_v3 }
 0x396   : > { %3203 = vmatpush3.bf16.msra.mxu1 %v3422_v3 }
 0x397   : > { %3204 = vmatprep.subr.bf16.mxu1 %v3422_v3 }
 0x39a   : > { %3205 = vmatpush3.bf16.msra.mxu1 %v3422_v3 }
 0x39b   : > { %3206 = vmatprep.subr.bf16.mxu1 %v3422_v3 }
 0x39e   : > { %3207 = vmatpush3.bf16.msra.mxu1 %v3422_v3 }
 0x39f   : > { %3208 = vmatprep.subr.bf16.mxu1 %v3422_v3 }
 0x3a2   : > { %3209 = vmatpush3.bf16.msra.mxu1 %v3422_v3 }
 0x3a3   : > { %3210 = vmatprep.subr.bf16.mxu1 %v3422_v3 }
 0x3a6   : > { %3211 = vmatpush3.bf16.msra.mxu1 %v3422_v3 }
 0x3a7   : > { %3212 = vmatprep.subr.bf16.mxu1 %v3422_v3 }
 0x3aa   : > { %3213 = vmatpush3.bf16.msra.mxu1 %v3422_v3 }
 0x3ab   : > { %3214 = vmatprep.subr.bf16.mxu1 %v3422_v3 }
 0x3ae   : > { %3215 = vmatpush3.bf16.msra.mxu1 %v3422_v3 }
 0x3af   : > { %3216 = vmatprep.subr.bf16.mxu1 %v3422_v3 }
 0x3b1   : > { %2864 = vmatmul.mubr.f32.vlgmr.msra.gmra.mrb[8].mxu1 %v1484_v21 }
 0x3b2   : > { %3217 = vmatpush3.bf16.msra.mxu1 %v3422_v3 }
 0x3b3   : > { %3218 = vmatprep.subr.bf16.mxu1 %v3422_v3 }
 0x3b6   : > { %3219 = vmatpush3.bf16.msra.mxu1 %v3422_v3 }
 0x3b7   : > { %3220 = vmatprep.subr.bf16.mxu1 %v3422_v3 }
 0x3ba   : > { %3221 = vmatpush3.bf16.msra.mxu1 %v3422_v3 }
 0x3bb   : > { %3222 = vmatprep.subr.bf16.mxu1 %v3422_v3 }
 0x3be   : > { %3223 = vmatpush3.bf16.msra.mxu1 %v3422_v3 }
 0x3bf   : > { %3224 = vmatprep.subr.bf16.mxu1 %v3422_v3 }
 0x3c2   : > { %3225 = vmatpush3.bf16.msra.mxu1 %v3422_v3 }
 0x3c3   : > { %3226 = vmatprep.subr.bf16.mxu1 %v3422_v3 }
 0x3c6   : > { %3227 = vmatpush3.bf16.msra.mxu1 %v3422_v3 }
 0x3c7   : > { %3228 = vmatprep.subr.bf16.mxu1 %v3422_v3 }
 0x3ca   : > { %3229 = vmatpush3.bf16.msra.mxu1 %v3422_v3 }
 0x3cb   : > { %3230 = vmatprep.subr.bf16.mxu1 %v3422_v3 }
 0x3ce   : > { %3231 = vmatpush3.bf16.msra.mxu1 %v3422_v3 }
 0x3cf   : > { %3232 = vmatprep.subr.bf16.mxu1 %v3424_v57 }
 0x464   : > { %v2830_v23 = vpop.f32.mrb[6].mxu1 }
 0x465   : > { %v1474_v24 = vpop.f32.mrb[7].mxu1  ;;  %v1561_v25 = vmul.f32 %v2830_v23, %v2830_v23 }
 0x466   : > { %1568 = vperm.xlu0 %3307, %v1474_v24   ;;  %v1560_v26 = vmul.f32 %v1474_v24, %v1474_v24 }
 0x46a   : > { %1573 = vperm.xlu0 %3307, %v2830_v23  }
 0x484   : > { %v2865_v27 = vpop.f32.mrb[8].mxu1 }
 0x485   : > { %v1563_v29 = vsub.f32 %v2865_v27, %v1561_v25  ;;  %v1551_v30 = vpop.f32.mrb[9].mxu1 }
 0x486   : > { %v1562_v31 = vsub.f32 %v1551_v30, %v1560_v26  ;;  %v3426_v26 = vmov 1.0  }
 0x487   : > { %v1565_v33 = vmax.f32 %v1563_v29, 0.0 }
 0x488   : > { %v1564_v34 = vmax.f32 %v1562_v31, 0.0 }
 0x489   : > { %v1579_v36 = vadd.f32 1e-05, %v1565_v33 }
 0x48a   : > { %v1578_v35 = vadd.f32 1e-05, %v1564_v34 }
 0x48c   : > { %3313 = vrsqrt.f32 %v1578_v35 }
 0x48d   : > { %3315 = vrsqrt.f32 %v1579_v36 }
 0x496   : > { %v3314_v37 = vpop.eup %3313 }
 0x497   : > { %1584 = vperm.xlu1 %3308, %v3314_v37   ;;  %v3316_v38 = vpop.eup %3315 }
 0x49b   : > { %1589 = vperm.xlu1 %3308, %v3316_v38  }
 0x4e5   : > { %v1569_v39 = vpop.permute.xlu0 %1568 }
 0x4e6   : > { %v1576_v40 = vsub.f32 %v3688_v18, %v1569_v39 }
 0x4e9   : > { %v1574_v41 = vpop.permute.xlu0 %1573 }
 0x4ea   : > { %v1577_v46 = vsub.f32 %v3690_v19, %v1574_v41  ;;  %v2282_v19 = vld [vmem:[%s3862_s11] ss:$0 sm:$0xff] }
 0x516   : > { %v1585_v43 = vpop.permute.xlu1 %1584 }
 0x517   : > { %v1592_v44 = vmul.f32 %v1585_v43, %v1576_v40 }
 0x519   : > { %v1601_v47 = vmul.f32 %v2272_v42, %v1592_v44 }
 0x51a   : > { %v1590_v48 = vpop.permute.xlu1 %1589 }
 0x51b   : > { %v1610_v49 = vadd.f32 %v2273_v45, %v1601_v47  ;;  %v1593_v50 = vmul.f32 %v1590_v48, %v1577_v46 }
 0x51d   : > { %v1602_v51 = vmul.f32 %v2272_v42, %v1593_v50  ;;  %v3738_v52 = vadd.f32 %v1610_v49, %v3588_v13  ;;  %v1690_v13 = vand.u32 127, %v436_v1 }
 0x51f   : > { %v1611_v53 = vadd.f32 %v2273_v45, %v1602_v51  ;;  %2898 = vmatprep.mubr.f32.mxu1 %v3738_v52  ;;  %vm1692_vm15 = vcmp.eq.s32.totalorder %v1690_v13, %v3599_v32  ;;  %vm1691_vm0 = vcmp.eq.s32.totalorder %v1690_v13, %v3586_v11  ;;  %vm1698_vm1 = vcmp.ge.s32.totalorder %v1690_v13, %v1697_v59  ;;  %v1802_v11 = vld [vmem:[%s3859_s8] sm:$0xff] }
 0x520   : > { %v3754_v60 = vsel %vm1692_vm15, 1.0, %v3745_v58  ;;  %v2274_v61 = vsel %vm1691_vm0, 1.0, %v3745_v58  ;;  %v1704_v15 = vmul.u32 8, %v1690_v13 }
 0x521   : > { %v3742_v54 = vadd.f32 %v1611_v53, %v3590_v14  ;;  %v1699_v14 = vadd.s32 8, %v1697_v59 }
 0x522   : > { %v1707_v16 = vadd.s32 8, %v1704_v15  ;;  %vm1705_vm8 = vcmp.ge.s32.totalorder %v3580_v2, %v1704_v15  ;;  %vm1706_vm11 = vcmp.ge.s32.totalorder %v3596_v28, %v1704_v15 }
 0x523   : > { %2899 = vmatmul.mubr.f32.vlgmr.msra.gmra.mrb[10].mxu1 %v3742_v54  ;;  %vm1700_vm2 = vcmp.lt.s32.totalorder %v1690_v13, %v1699_v14 }
 0x524   : > { %2905 = vmatprep.mubr.msk.f32.mxu1 %vm3425_vm14, %v3745_v58  ;;  %vm1701_vm3 = vmand %vm1698_vm1, %vm1700_vm2  ;;  %vm1708_vm9 = vcmp.lt.s32.totalorder %v3580_v2, %v1707_v16  ;;  %vm1709_vm12 = vcmp.lt.s32.totalorder %v3596_v28, %v1707_v16 }
 0x525   : > { %v2276_v32 = vsel %vm1701_vm3, 1.0, %v3745_v58  ;;  %vm1710_vm10 = vmand %vm1705_vm8, %vm1708_vm9 }
 0x526   : > { %v2277_v17 = vsel %vm1710_vm10, 1.0, %v3745_v58  ;;  %vm3782_vm13 = vmand %vm1706_vm11, %vm1709_vm12 }
 0x527   : > { %v2278_v25 = vsel %vm3782_vm13, 1.0, %v3745_v58 }
 0x5f6   : > { %v2900_v55 = vpop.f32.mrb[10].mxu1 }
 0x5f7   : > { %1723 = vperm.xlu1 %3308, %v2900_v55   ;;  %v1680_v56 = vpop.f32.mrb[11].mxu1 }
 0x5f8   : > { %1718 = vperm.xlu0 %3307, %v1680_v56  }
 0x676   : > { %v1724_v62 = vpop.permute.xlu1 %1723 }
 0x677   : > { %v1727_v63 = vmul.f32 %v3754_v60, %v1724_v62  ;;  %v1719_v0 = vpop.permute.xlu0 %1718 }
 0x678   : > { %v1726_v3 = vmul.f32 %v2274_v61, %v1719_v0 }
 0x67a   : > { %v3233_v1 = vpack.c.bf16 %v1727_v63, %v1726_v3 }
 0x67c   : > { %3234 = vmatpush3.bf16.msra.mxu1 %v3233_v1 }
 0x67d   : > { %2908 = vmatprep.subr.mxu1 %v3745_v58 }
 0x67f   : > { %2906 = vmatmul.mubr.msk.f32.vlgmr.msra.gmra.mrb[12].mxu1 %vm1728_vm4, %v2276_v32 }
 0x680   : > { %2910 = vmatprep.mubr.msk.f32.mxu1 %vm3425_vm14, %v3745_v58  ;;  %2909 = vmatpush3.msra.mxu1 %v1802_v11 }
 0x681   : > { %2913 = vmatprep.subr.mxu1 %v3745_v58 }
 0x752   : > { %v1798_v4 = vpop.f32.mrb[12].mxu1 }
 0x753   : > { %v2907_v5 = vpop.f32.mrb[13].mxu1  ;;  %2911 = vmatmul.mubr.msk.f32.vlgmr.msra.gmra.mrb[14].mxu1 %vm1810_vm5, %v1798_v4 }
 0x754   : > { %2915 = vmatprep.mubr.msk.f32.mxu1 %vm3425_vm14, %v3745_v58  ;;  %2914 = vmatpush3.msk.msra.mxu1 %vm1897_vm6, %v1885_v6 }
 0x826   : > { %v1880_v8 = vpop.f32.mrb[14].mxu1 }
 0x827   : > { %v1881_v9 = vadd.f32 %v2280_v7, %v1880_v8  ;;  %v2912_v10 = vpop.f32.mrb[15].mxu1 }
 0x829   : > { %v1884_v12 = vmax.f32 %v1881_v9, 0.0 }
 0x82b   : > { %2916 = vmatmul.mubr.msk.f32.vlgmr.msra.gmra.mrb[16].mxu1 %vm1893_vm7, %v1884_v12 }
 0x82c   : > { %2920 = vmatprep.mubr.msk.f32.mxu1 %vm1893_vm7, %v2277_v17 }
 0x8fe   : > { %v1967_v20 = vpop.f32.mrb[16].mxu1 }
 0x8ff   : > { %v1968_v21 = vadd.f32 %v2282_v19, %v1967_v20  ;;  %v2917_v2 = vpop.f32.mrb[17].mxu1 }
 0x901   : > { %v2285_v22 = vmul.f32 -1.442695, %v1968_v21 }
 0x903   : > { %3317 = vpow2.f32 %v2285_v22 }
 0x90d   : > { %v3318_v23 = vpop.eup %3317 }
 0x90e   : > { %v1974_v24 = vadd.f32 1.0, %v3318_v23 }
 0x910   : > { %3319 = vrcp.f32 %v1974_v24 }
 0x91a   : > { %v3320_v28 = vpop.eup %3319 }
 0x91b   : > { %2918 = vmatprep.subr.msk.mxu1 %vm1897_vm6, %v3320_v28 }
 0x91c   : > { %2919 = vmatpush3.msk.msra.mxu1 %vm1897_vm6, %v3320_v28 }
 0x91d   : > { %2921 = vmatmul.mubr.msk.f32.vlgmr.msra.gmra.mrb[18].mxu1 %vm1893_vm7, %v2278_v25  ;;  %2923 = vmatprep.subr.mxu1 %v3426_v26 }
 0x91e   : > { %2924 = vmatpush3.msra.mxu1 %v3426_v26 }
 0x9f0   : > { %v2922_v27 = vpop.f32.mrb[18].mxu1 }
 0x9f1   : > { %v2052_v29 = vpop.f32.mrb[19].mxu1  ;;  %v2062_v31 = vmul.f32 %v2922_v27, %v3754_v60 }
 0x9f2   : > { %v2061_v30 = vmul.f32 %v2274_v61, %v2052_v29 }
 0x9f4   : > { %2925 = vmatprep.mubr.msk.f32.mxu1 %vm1810_vm5, %v2061_v30 }
 0x9f5   : > { %2926 = vmatmul.mubr.msk.f32.vlgmr.msra.gmra.mrb[20].mxu1 %vm1810_vm5, %v2062_v31 }
 0xac8   : > { %v2927_v33 = vpop.f32.mrb[20].mxu1 }
 0xac9   : > { %2151 = vperm.xlu1 %3308, %v2927_v33   ;;  %v2135_v34 = vpop.f32.mrb[21].mxu1 }
 0xaca   : > { %2146 = vperm.xlu0 %3307, %v2135_v34  }
 0xb48   : > { %v2152_v35 = vpop.permute.xlu1 %2151 }
 0xb49   : > { %v2155_v36 = vmul.f32 %v2152_v35, %v3742_v54  ;;  %v2147_v37 = vpop.permute.xlu0 %2146 }
 0xb4a   : > { %v2154_v38 = vmul.f32 %v2147_v37, %v3738_v52 }
 0xb4b   : > { %2157 = vst [vmem:[%s422_s15 + $0x8] sm:$0xff] %v2155_v36 }
 0xb4c   : > { %2156 = vst [vmem:[%s422_s15] sm:$0xff] %v2154_v38 }
 0xb4d   : > { %3363 = shalt.err (!%p3360_p7)
}
 0xb4e   : > { %s3364_s23 = scalar_lea.hbm %s3807_s19, 256  ;;  %s3368_s26 = scalar_lea.hbm %s3863_s12, 512 }
 0xb4f   : > { %p3365_p8 = scmp.ne.s32.totalorder %s3807_s19, %s3364_s23  ;;  %p3369_p1 = scmp.lt.u32.totalorder %s3807_s19, %s3863_s12 }
 0xb50   : > { %p3370_p0 = scmp.lt.u32.totalorder %s3368_s26, %s3364_s23  ;;  %p3372_p6 = scmp.lt.u32.totalorder %s3364_s23, %s3807_s19 }
 0xb51   : > { %p3366_p11 = pnand %p3365_p8, %p3879_p9 }
 0xb52   : > { %p3371_p5 = por %p3370_p0, %p3369_p1 }
 0xb53   : > { %p3367_p13 = pneg %p3366_p11 }
 0xb54   : > { %p3373_p10 = por %p3372_p6, %p3371_p5 }
 0xb56   : > { %p3374_p12 = pnand %p3373_p10, %p3367_p13 }
 0xb58   : > { %3377 = shalt.err (!%p3374_p12)
}
 0xb59   : > { %s3428_s25 = smov 128   ;;  %s3429_s29 = smov 8  }
 0xb5a   : > { %3251 = dma.vmem_to_hbm [thread:$0]  (%p3879_p9), %s3801_s17, 256, %s3807_s19, %s3810_s20, %s3428_s25, %s3428_s25, %s3429_s29  }
 0xb5b PF: > { %p3263_p2 = scmp.ge.s32.totalorder %s3416_s24, 2  ;;  %s2187_s30 = sand.u32 1, %s3404_s21  }
 0xb5c   : > { %p3880_p3 = scmp.ne.s32.totalorder %s3871_s14, 0  ;;  %s2188_s23 = scalar_lea.sflag [#allocation5], %s2187_s30 }
 0xb5e   : > { %p3258_p4 = pnand %p3263_p2, %p3880_p3 }
 0xb60   : > { %3399 = dma.done.wait (!%p3258_p4), %s2188_s23, 256  }
 0xb61   : > { %3401 = vsyncadd (!%p3258_p4), %s2188_s23, 4294967040  ;;  %s3881_s15 = sld [smem:[#allocation9_spill]]  ;;  %s3882_s23 = sld [smem:[#allocation10_spill]] }
 0xb62   : > { %p23_p7 = scmp.ge.s32.totalorder %s3520_s27, 4   ;;  %s3883_s21 = smov %s3408_s22 }
 0xb63   : > { %s3885_s24 = smov %s3520_s27 }
 0xb64   :  { %25 = sbr.rel (!%p23_p7) target bundleno = 4 (0x4), region = 108 }
 0xb67   : > { %s3884_s22 = smov %s3881_s15 }
 0xb6b   :  { %2193 = vsyncpa [#allocation4], 1 }
 0xb6c   :  { %2195 = vsyncpa [#allocation4 + $0x1], 1 }
 0xb6d   :  { %2196 = vsyncpa [#allocation5], 1 }
 0xb6e   :  { %2198 = vsyncpa [#allocation5 + $0x1], 1 }

// kernel: tpu_custom_call.1
= control target key start
LH: loop header
LB: loop body
LE: loop exit
PB: predicated region body
PF: predicated region fallthrough
CT: control target
= control target key end

     0   :  { %17 = vsyncpa [#allocation4], 0  ;;  %s3851_s0 = inlined_call_operand.vmem [shape: f32[32,128], index: 0, kind: input, shape index: {}]   ;;  %s3852_s1 = inlined_call_operand.hbm [shape: f32[896,128], index: 1, kind: input, shape index: {}]   ;;  %s3853_s2 = inlined_call_operand.vmem [shape: f32[1,128], index: 2, kind: input, shape index: {}]   ;;  %s3854_s3 = inlined_call_operand.vmem [shape: f32[1,128], index: 3, kind: input, shape index: {}]   ;;  %s3855_s4 = inlined_call_operand.vmem [shape: f32[128,4], index: 4, kind: input, shape index: {}]   ;;  %s3856_s5 = inlined_call_operand.vmem [shape: f32[4,128], index: 5, kind: input, shape index: {}]   ;;  %s3857_s6 = inlined_call_operand.vmem [shape: f32[1,128], index: 6, kind: input, shape index: {}]   ;;  %s3858_s7 = inlined_call_operand.vmem [shape: f32[1,128], index: 7, kind: input, shape index: {}]   ;;  %s3859_s8 = inlined_call_operand.vmem [shape: f32[8,2], index: 8, kind: input, shape index: {}]   ;;  %s3860_s9 = inlined_call_operand.vmem [shape: f32[1,2], index: 9, kind: input, shape index: {}]   ;;  %s3861_s10 = inlined_call_operand.vmem [shape: f32[2,8], index: 10, kind: input, shape index: {}]   ;;  %s3862_s11 = inlined_call_operand.vmem [shape: f32[1,8], index: 11, kind: input, shape index: {}]   ;;  %s3863_s12 = inlined_call_operand.hbm [shape: f32[32,128], index: 12, kind: output, shape index: {}]  }
   0x1   :  { %18 = vsyncpa [#allocation5], 0 }
   0x2   :  { %20 = vsyncpa [#allocation5 + $0x1], 0  ;;  %s3495_s21 = smov 0   ;;  %s3497_s22 = smov 0  }
   0x3   :  { %s3499_s23 = smov 0   ;;  %s3501_s24 = smov 0  }
   0x4 LB: > { %3868 = sst [smem:[#allocation9_spill]] %s3412_s23  ;;  %s3516_s25 = sadd.s32 4294967295, %s3416_s24   ;;  %s3416_s24 = sphi %s3501_s24, %s3885_s24   ;;  %s3412_s23 = sphi %s3499_s23, %s3882_s23   ;;  %s3408_s22 = sphi %s3497_s22, %s3884_s22   ;;  %s3404_s21 = sphi %s3495_s21, %s3883_s21  }
   0x5   : > { %s2246_s26 = sadd.s32 4294967294, %s3416_s24   ;;  %s3520_s27 = sadd.s32 1, %s3416_s24  }
   0x6   : > { %s290_s28 = sadd.s32 1, %s3412_s23  ;;  %s287_s29 = ssub.s32 %s3416_s24, %s3520_s27 }
   0x7   : > { %p300_p0 = scmp.ne.s32.totalorder %s3412_s23, %s3408_s22  ;;  %p288_p1 = scmp.eq.s32.totalorder %s287_s29, 0 }
   0x8   : > { %p301_p2 = scmp.eq.s32.totalorder %s3516_s25, 1  ;;  %p306_p3 = scmp.ne.s32.totalorder %s3408_s22, %s3404_s21 }
   0x9   : > { %p307_p4 = scmp.eq.s32.totalorder %s2246_s26, 1  ;;  %p2247_p7 = scmp.ge.s32.totalorder %s3416_s24, 1 }
   0xa   : > { %s3531_s30 = scalar_select %p288_p1, %s3412_s23, %s290_s28  }
   0xb   : > { %p3533_p5 = por %p301_p2, %p300_p0  ;;  %p3537_p6 = por %p307_p4, %p306_p3 }
   0xc   : > { %3869 = sst [smem:[#allocation10_spill]] %s3531_s30  ;;  %p314_p8 = scmp.lt.s32.totalorder %s3416_s24, 3 }
   0xd   : > { %s3870_s13 = scalar_select %p3533_p5, 1, 0 }
   0xe   : > { %s3871_s14 = scalar_select %p3537_p6, 1, 0 }
   0xf   : > { %p3865_p9 = scmp.eq.s32.totalorder %s3516_s25, 0  ;;  %p3544_p10 = pnand %p2247_p7, %p314_p8 }
  0x10   : > { %s3418_s16 = smov [#allocation3]   ;;  %s3322_s26 = scalar_lea.hbm %s3852_s1, 14336 }
  0x11   : > { %s3872_s15 = scalar_select %p3544_p10, 1, 0 }
  0x12   : > { %s326_s17 = sshll.u32 %s3418_s16, 4  ;;  %p3253_p11 = pneg %p3544_p10  ;;  %s327_s17 = int_to_ptr.vmem [resolvable:$true] %s326_s17 }
  0x13   : > { %p3323_p13 = scmp.ne.s32.totalorder %s3852_s1, %s3322_s26  ;;  %p3329_p3 = scmp.lt.u32.totalorder %s3322_s26, %s3852_s1 }
  0x14   : > { %p3552_p12 = pnand %p3865_p9, %p3253_p11 }
  0x16   : > { %p3324_p0 = pneg %p3552_p12 }
  0x18   : > { %p3325_p1 = pnand %p3324_p0, %p3323_p13 }
  0x1a   : > { %p3326_p2 = pneg %p3325_p1 }
  0x1c   : > { %p3331_p4 = pnand %p3329_p3, %p3326_p2 }
  0x1e   : > { %3334 = shalt.err (!%p3331_p4)
}
  0x1f   : > { %s3335_s23 = scalar_lea.vmem %s327_s17, 14336  ;;  %p3343_p9 = scmp.lt.s32.totalorder %s327_s17, %s327_s17 }
  0x20   : > { %p3336_p7 = scmp.ne.s32.totalorder %s327_s17, %s3335_s23  ;;  %p3344_p6 = scmp.lt.s32.totalorder %s3335_s23, %s3335_s23 }
  0x22   : > { %p3338_p8 = pnand %p3336_p7, %p3324_p0  ;;  %p3345_p5 = por %p3344_p6, %p3343_p9 }
  0x24   : > { %p3339_p11 = pneg %p3338_p8 }
  0x26   : > { %p3346_p10 = pnand %p3345_p5, %p3339_p11 }
  0x28   : > { %3349 = shalt.err (!%p3346_p10)
}
  0x29   : > { %s3419_s19 = smov 128   ;;  %s3420_s20 = smov 8  }
  0x2a   : > { %3256 = dma.hbm_to_vmem [thread:$0]  (!%p3552_p12), %s3852_s1, 14336, %s327_s17, [#allocation4], %s3419_s19, %s3419_s19, %s3420_s20  }
  0x2b   : > { %p3874_p13 = scmp.ne.s32.totalorder %s3872_s15, 0 }
  0x2c   : > { %p3875_p1 = scmp.eq.s32.totalorder (!%p3874_p13), %s3516_s25, 0 }
  0x2d   : > { %381 = sbr.rel (%p3874_p13) target bundleno = 2907 (0xb5b), region = 68 }
  0x34   : > { %3395 = dma.done.wait (%p3875_p1), [#allocation4], 14336   ;;  %p3876_p0 = pmov %p3875_p1 }
  0x35   : > { %s2253_s23 = sshll.u32 %s3516_s25, 1  ;;  %v3421_v0 = vmov 0.0   ;;  %v436_v1 = vlaneseq  ;;  %v479_v3 = vld [vmem:[#allocation3] sm:$0xff]  ;;  %v480_v4 = vld [vmem:[#allocation3 + $0x8] sm:$0xff]  ;;  %v481_v5 = vld [vmem:[#allocation3 + $0x10] sm:$0xff]  ;;  %vm1318_vm12 = vcmask 1043456  }
  0x36   : > { %3397 = vsyncadd (%p3876_p0), [#allocation4], 4294952960  ;;  %p424_p5 = scmp.lt.s32.totalorder %s2253_s23, 3  ;;  %432 = vst [vmem:[#allocation2] sm:$0xff] %v3421_v0  ;;  %v2960_v6 = vpack.c.bf16 %v480_v4, %v479_v3  ;;  %v482_v7 = vld [vmem:[#allocation3 + $0x18] sm:$0xff]  ;;  %v483_v9 = vld [vmem:[#allocation3 + $0x20] sm:$0xff] }
  0x37   : > { %433 = vst [vmem:[#allocation2 + $0x18] sm:$0xff] %v3421_v0  ;;  %v3580_v2 = vshrl.u32 %v436_v1, 7  ;;  %v2964_v8 = vpack.c.bf16 %v482_v7, %v481_v5  ;;  %v484_v10 = vld [vmem:[#allocation3 + $0x28] sm:$0xff]  ;;  %v485_v15 = vld [vmem:[#allocation3 + $0x30] sm:$0xff]  ;;  %v486_v16 = vld [vmem:[#allocation3 + $0x38] sm:$0xff]  ;;  %vm1311_vm13 = vcmask 31744  }
  0x38   : > { %s3887_s23 = smov (!%p424_p5, %s2253_s23), 3  ;;  %2961 = vmatprep.subr.bf16.mxu0 %v2960_v6  ;;  %v2968_v12 = vpack.c.bf16 %v484_v10, %v483_v9  ;;  %v2972_v18 = vpack.c.bf16 %v486_v16, %v485_v15  ;;  %v487_v19 = vld [vmem:[#allocation3 + $0x40] sm:$0xff]  ;;  %v488_v20 = vld [vmem:[#allocation3 + $0x48] sm:$0xff]  ;;  %v489_v23 = vld [vmem:[#allocation3 + $0x50] sm:$0xff]  ;;  %vm3425_vm14 = vmmov 0   ;;  %p3879_p9 = scmp.ne.s32.totalorder %s3870_s13, 0 }
  0x39   : > { %s2254_s30 = sshll.u32 %s3887_s23, 3  ;;  %v3586_v11 = vand.u32 7, %v3580_v2  ;;  %2963 = vmatpush3.bf16.msra.mxu0 %v2960_v6  ;;  %v2976_v21 = vpack.c.bf16 %v488_v20, %v487_v19  ;;  %v490_v24 = vld [vmem:[#allocation3 + $0x58] sm:$0xff]  ;;  %v491_v26 = vld [vmem:[#allocation3 + $0x60] sm:$0xff]  ;;  %v492_v27 = vld [vmem:[#allocation3 + $0x68] sm:$0xff]  ;;  %v3596_v28 = vadd.s32 8, %v3580_v2 }
  0x3a   : > { %s427_s18 = scalar_lea.vmem %s3851_s0, %s2254_s30  ;;  %2965 = vmatprep.subr.bf16.mxu0 %v2964_v8  ;;  %v2980_v25 = vpack.c.bf16 %v490_v24, %v489_v23  ;;  %v2984_v29 = vpack.c.bf16 %v492_v27, %v491_v26  ;;  %v493_v30 = vld [vmem:[#allocation3 + $0x70] sm:$0xff]  ;;  %v494_v31 = vld [vmem:[#allocation3 + $0x78] sm:$0xff]  ;;  %v693_v34 = vld [vmem:[#allocation3 + $0x100] sm:$0xff]  ;;  %s420_s23 = sand.u32 1, %s3408_s22  }
  0x3b   : > { %v3588_v13 = vld [vmem:[%s427_s18] sm:$0xff]  ;;  %v3590_v14 = vld [vmem:[%s427_s18 + $0x8] sm:$0xff]  ;;  %v465_v17 = vadd.s32 4294967293, %v3586_v11  ;;  %v3599_v32 = vand.u32 7, %v3596_v28  ;;  %v2988_v33 = vpack.c.bf16 %v494_v31, %v493_v30  ;;  %v679_v38 = vadd.s32 4294967295, %v3586_v11  ;;  %v695_v39 = vld [vmem:[#allocation3 + $0x110] sm:$0xff] }
  0x3c   : > { %434 = vst [vmem:[#allocation2 + $0x8] sm:$0xff] %v3588_v13  ;;  %435 = vst [vmem:[#allocation2 + $0x10] sm:$0xff] %v3590_v14  ;;  %v694_v35 = vld [vmem:[#allocation3 + $0x108] sm:$0xff]  ;;  %v696_v40 = vld [vmem:[#allocation3 + $0x118] sm:$0xff]  ;;  %s2252_s30 = sshll.u32 %s420_s23, 4  ;;  %s2296_s18 = sshll.u32 %s3516_s25, 8 }
  0x3d   : > { %2967 = vmatpush3.bf16.msra.mxu0 %v2964_v8  ;;  %vm467_vm0 = vcmp.ge.s32.totalorder %v465_v17, 0  ;;  %v466_v36 = vadd.s32 4294967293, %v3599_v32  ;;  %v2992_v37 = vpack.c.bf16 %v694_v35, %v693_v34  ;;  %v511_v41 = vld [vmem:[#allocation3 + $0x80] sm:$0xff]  ;;  %v512_v42 = vld [vmem:[#allocation3 + $0x88] sm:$0xff]  ;;  %v2996_v45 = vpack.c.bf16 %v696_v40, %v695_v39  ;;  %v513_v49 = vld [vmem:[#allocation3 + $0x90] sm:$0xff]  ;;  %s422_s15 = scalar_lea.vmem [#allocation6], %s2252_s30  ;;  %s3807_s19 = scalar_lea.hbm %s3863_s12, %s2296_s18 }
  0x3e   : > { %2969 = vmatprep.subr.bf16.mxu0 %v2968_v12  ;;  %v2928_v44 = vpack.c.bf16 %v512_v42, %v511_v41  ;;  %vm681_vm2 = vcmp.ge.s32.totalorder %v679_v38, 0  ;;  %v697_v47 = vld [vmem:[#allocation3 + $0x120] sm:$0xff]  ;;  %v698_v48 = vld [vmem:[#allocation3 + $0x128] sm:$0xff]  ;;  %v514_v50 = vld [vmem:[#allocation3 + $0x98] sm:$0xff]  ;;  %v497_v35 = vadd.s32 4294967294, %v3586_v11  ;;  %s2172_s17 = sshll.u32 %s422_s15, 4  ;;  %s3801_s17 = int_to_ptr.vmem [resolvable:$true] %s2172_s17 }
  0x3f   : > { %vm468_vm1 = vcmp.ge.s32.totalorder %v466_v36, 0  ;;  %v2932_v51 = vpack.c.bf16 %v514_v50, %v513_v49  ;;  %v3000_v52 = vpack.c.bf16 %v698_v48, %v697_v47  ;;  %v699_v53 = vld [vmem:[#allocation3 + $0x130] sm:$0xff]  ;;  %v700_v54 = vld [vmem:[#allocation3 + $0x138] sm:$0xff]  ;;  %v515_v55 = vld [vmem:[#allocation3 + $0xa0] sm:$0xff]  ;;  %v498_v36 = vadd.s32 4294967294, %v3599_v32  ;;  %s3810_s20 = scalar_lea.sflag [#allocation5], %s420_s23 }
  0x40   : > { %2929 = vmatprep.subr.bf16.mxu1 %v2928_v44  ;;  %v516_v56 = vld [vmem:[#allocation3 + $0xa8] sm:$0xff]  ;;  %v3004_v58 = vpack.c.bf16 %v700_v54, %v699_v53  ;;  %v701_v59 = vld [vmem:[#allocation3 + $0x140] sm:$0xff]  ;;  %v517_v61 = vld [vmem:[#allocation3 + $0xb0] sm:$0xff]  ;;  %vm499_vm4 = vcmp.ge.s32.totalorder %v497_v35, 0  ;;  %s3350_s25 = scalar_lea.vmem %s3801_s17, 256  ;;  %s3427_s28 = smov [#allocation6]  }
  0x41   : > { %2971 = vmatpush3.bf16.msra.mxu0 %v2968_v12  ;;  %2931 = vmatpush3.bf16.msra.mxu1 %v2928_v44  ;;  %v2936_v57 = vpack.c.bf16 %v516_v56, %v515_v55  ;;  %v702_v60 = vld [vmem:[#allocation3 + $0x148] sm:$0xff]  ;;  %v518_v62 = vld [vmem:[#allocation3 + $0xb8] sm:$0xff]  ;;  %v703_v3 = vld [vmem:[#allocation3 + $0x150] sm:$0xff]  ;;  %vm500_vm5 = vcmp.ge.s32.totalorder %v498_v36, 0  ;;  %p3351_p6 = scmp.ne.s32.totalorder %s3801_s17, %s3350_s25  ;;  %s3354_s29 = sshll.u32 %s3427_s28, 4  ;;  %s3355_s29 = int_to_ptr.vmem [resolvable:$false] %s3354_s29 }
  0x42   : > { %2973 = vmatprep.subr.bf16.mxu0 %v2972_v18  ;;  %2933 = vmatprep.subr.bf16.mxu1 %v2932_v51  ;;  %v2940_v63 = vpack.c.bf16 %v518_v62, %v517_v61  ;;  %v3008_v0 = vpack.c.bf16 %v702_v60, %v701_v59  ;;  %v704_v4 = vld [vmem:[#allocation3 + $0x158] sm:$0xff]  ;;  %v519_v5 = vld [vmem:[#allocation3 + $0xc0] sm:$0xff]  ;;  %v520_v6 = vld [vmem:[#allocation3 + $0xc8] sm:$0xff]  ;;  %s3356_s30 = scalar_lea.vmem %s3355_s29, 512  ;;  %p3357_p2 = scmp.lt.s32.totalorder %s3801_s17, %s3355_s29 }
  0x43   : > { %v463_v22 = vld [vmem:[#allocation2 + $0x5] sm:$0xff]  ;;  %v464_v43 = vld [vmem:[#allocation2 + $0xd] sm:$0xff]  ;;  %v2944_v7 = vpack.c.bf16 %v520_v6, %v519_v5  ;;  %v3012_v8 = vpack.c.bf16 %v704_v4, %v703_v3  ;;  %v522_v15 = vld [vmem:[#allocation3 + $0xd8] sm:$0xff]  ;;  %p3352_p10 = pnand %p3351_p6, %p3879_p9  ;;  %p3358_p3 = scmp.lt.s32.totalorder %s3356_s30, %s3350_s25 }
  0x44   : > { %2578 = vmatprep.mubr.msk.f32.mxu0 %vm467_vm0, %v463_v22  ;;  %v677_v46 = vld [vmem:[#allocation2 + $0x7] sm:$0xff]  ;;  %v521_v12 = vld [vmem:[#allocation3 + $0xd0] sm:$0xff]  ;;  %v708_v19 = vld [vmem:[#allocation3 + $0x178] sm:$0xff] }
  0x45   : > { %2975 = vmatpush3.bf16.msra.mxu0 %v2972_v18  ;;  %2935 = vmatpush3.bf16.msra.mxu1 %v2932_v51  ;;  %v705_v9 = vld [vmem:[#allocation3 + $0x160] sm:$0xff]  ;;  %v706_v10 = vld [vmem:[#allocation3 + $0x168] sm:$0xff]  ;;  %v2948_v16 = vpack.c.bf16 %v522_v15, %v521_v12  ;;  %v707_v18 = vld [vmem:[#allocation3 + $0x170] sm:$0xff]  ;;  %p3353_p12 = pneg %p3352_p10  ;;  %p3359_p4 = por %p3358_p3, %p3357_p2 }
  0x46   : > { %2977 = vmatprep.subr.bf16.mxu0 %v2976_v21  ;;  %2937 = vmatprep.subr.bf16.mxu1 %v2936_v57  ;;  %v3016_v17 = vpack.c.bf16 %v706_v10, %v705_v9  ;;  %v523_v20 = vld [vmem:[#allocation3 + $0xe0] sm:$0xff]  ;;  %v3020_v23 = vpack.c.bf16 %v708_v19, %v707_v18  ;;  %v525_v26 = vld [vmem:[#allocation3 + $0xf0] sm:$0xff]  ;;  %v526_v27 = vld [vmem:[#allocation3 + $0xf8] sm:$0xff] }
  0x47   : > { %v786_v24 = vld [vmem:[#allocation3 + $0x180] sm:$0xff]  ;;  %v2956_v30 = vpack.c.bf16 %v526_v27, %v525_v26  ;;  %v789_v34 = vld [vmem:[#allocation3 + $0x198] sm:$0xff]  ;;  %v496_v39 = vld [vmem:[#allocation2 + $0xe] sm:$0xff]  ;;  %p3360_p7 = pnand %p3359_p4, %p3353_p12 }
  0x48   : > { %v495_v38 = vld [vmem:[#allocation2 + $0x6] sm:$0xff]  ;;  %v1220_v47 = vld [vmem:[%s3855_s4 + $0x18] sm:$0xff]  ;;  %v1223_v56 = vld [vmem:[%s3855_s4 + $0x30] sm:$0xff] }
  0x49   : > { %2979 = vmatpush3.bf16.msra.mxu0 %v2976_v21  ;;  %2939 = vmatpush3.bf16.msra.mxu1 %v2936_v57  ;;  %v524_v21 = vld [vmem:[#allocation3 + $0xe8] sm:$0xff]  ;;  %v790_v41 = vld [vmem:[#allocation3 + $0x1a0] sm:$0xff]  ;;  %v793_v53 = vld [vmem:[#allocation3 + $0x1b8] sm:$0xff] }
  0x4a   : > { %2981 = vmatprep.subr.bf16.mxu0 %v2980_v25  ;;  %2941 = vmatprep.subr.bf16.mxu1 %v2940_v63  ;;  %v2952_v22 = vpack.c.bf16 %v524_v21, %v523_v20  ;;  %v791_v42 = vld [vmem:[#allocation3 + $0x1a8] sm:$0xff]  ;;  %v1221_v50 = vld [vmem:[%s3855_s4 + $0x20] sm:$0xff]  ;;  %v1224_v57 = vld [vmem:[%s3855_s4 + $0x38] sm:$0xff]  ;;  %v881_v21 = vadd.s32 1, %v3586_v11 }
  0x4b   : > { %2543 = vmatprep.mubr.msk.f32.mxu1 %vm499_vm4, %v495_v38  ;;  %v1218_v44 = vld [vmem:[%s3855_s4 + $0x8] sm:$0xff]  ;;  %v3032_v48 = vpack.c.bf16 %v791_v42, %v790_v41  ;;  %v3164_v60 = vpack.c.bf16 %v1224_v57, %v1223_v56  ;;  %v1225_v62 = vld [vmem:[%s3855_s4 + $0x40] sm:$0xff]  ;;  %v797_v3 = vld [vmem:[#allocation3 + $0x1d8] sm:$0xff]  ;;  %vm1728_vm4 = vcmask 130048  }
  0x4c   : > { %v1222_v51 = vld [vmem:[%s3855_s4 + $0x28] sm:$0xff]  ;;  %v1227_v6 = vld [vmem:[%s3855_s4 + $0x50] sm:$0xff]  ;;  %v895_v18 = vld [vmem:[#allocation3 + $0x200] sm:$0xff]  ;;  %vm885_vm6 = vcmp.lt.s32.totalorder %v881_v21, 8 }
  0x4d   : > { %2983 = vmatpush3.bf16.msra.mxu0 %v2980_v25  ;;  %2943 = vmatpush3.bf16.msra.mxu1 %v2940_v63  ;;  %v787_v25 = vld [vmem:[#allocation3 + $0x188] sm:$0xff]  ;;  %v3160_v54 = vpack.c.bf16 %v1222_v51, %v1221_v50  ;;  %v800_v15 = vld [vmem:[#allocation3 + $0x1f0] sm:$0xff]  ;;  %v899_v26 = vld [vmem:[#allocation3 + $0x220] sm:$0xff]  ;;  %v990_v50 = vadd.s32 2, %v3586_v11 }
  0x4e   : > { %2985 = vmatprep.subr.bf16.mxu0 %v2984_v29  ;;  %2945 = vmatprep.subr.bf16.mxu1 %v2944_v7  ;;  %v3024_v31 = vpack.c.bf16 %v787_v25, %v786_v24  ;;  %v795_v59 = vld [vmem:[#allocation3 + $0x1c8] sm:$0xff]  ;;  %v906_v38 = vld [vmem:[#allocation3 + $0x258] sm:$0xff]  ;;  %v1006_v51 = vld [vmem:[#allocation3 + $0x290] sm:$0xff] }
  0x4f   : > { %v1226_v63 = vld [vmem:[%s3855_s4 + $0x48] sm:$0xff]  ;;  %vm994_vm8 = vcmp.lt.s32.totalorder %v990_v50, 8  ;;  %v1008_v56 = vld [vmem:[#allocation3 + $0x2a0] sm:$0xff]  ;;  %v1116_v21 = vld [vmem:[#allocation3 + $0x318] sm:$0xff] }
  0x50   : > { %v3168_v4 = vpack.c.bf16 %v1226_v63, %v1225_v62  ;;  %v799_v9 = vld [vmem:[#allocation3 + $0x1e8] sm:$0xff]  ;;  %v1012_v62 = vld [vmem:[#allocation3 + $0x2c0] sm:$0xff] }
  0x51   : > { %2987 = vmatpush3.bf16.msra.mxu0 %v2984_v29  ;;  %2947 = vmatpush3.bf16.msra.mxu1 %v2944_v7  ;;  %v680_v29 = vadd.s32 4294967295, %v3599_v32  ;;  %v1228_v7 = vld [vmem:[%s3855_s4 + $0x58] sm:$0xff]  ;;  %v896_v19 = vld [vmem:[#allocation3 + $0x208] sm:$0xff] }
  0x52   : > { %2989 = vmatprep.subr.bf16.mxu0 %v2988_v33  ;;  %2949 = vmatprep.subr.bf16.mxu1 %v2948_v16  ;;  %v3172_v10 = vpack.c.bf16 %v1228_v7, %v1227_v6  ;;  %v3056_v20 = vpack.c.bf16 %v896_v19, %v895_v18  ;;  %v879_v25 = vld [vmem:[#allocation2 + $0x9] sm:$0xff]  ;;  %v1016_v6 = vld [vmem:[#allocation3 + $0x2e0] sm:$0xff]  ;;  %v1099_v19 = vadd.s32 3, %v3586_v11 }
  0x53   : > { %vm682_vm3 = vcmp.ge.s32.totalorder %v680_v29, 0  ;;  %v900_v27 = vld [vmem:[#allocation3 + $0x228] sm:$0xff] }
  0x54   : > { %v3064_v29 = vpack.c.bf16 %v900_v27, %v899_v26  ;;  %v904_v35 = vld [vmem:[#allocation3 + $0x248] sm:$0xff]  ;;  %vm1103_vm10 = vcmp.lt.s32.totalorder %v1099_v19, 8 }
  0x55   : > { %2991 = vmatpush3.bf16.msra.mxu0 %v2988_v33  ;;  %2951 = vmatpush3.bf16.msra.mxu1 %v2948_v16  ;;  %v788_v33 = vld [vmem:[#allocation3 + $0x190] sm:$0xff]  ;;  %v801_v16 = vld [vmem:[#allocation3 + $0x1f8] sm:$0xff]  ;;  %v908_v41 = vld [vmem:[#allocation3 + $0x268] sm:$0xff] }
  0x56   : > { %2993 = vmatprep.subr.bf16.mxu0 %v2992_v37  ;;  %2953 = vmatprep.subr.bf16.mxu1 %v2952_v22  ;;  %v3028_v40 = vpack.c.bf16 %v789_v34, %v788_v33  ;;  %v903_v34 = vld [vmem:[#allocation3 + $0x240] sm:$0xff]  ;;  %v1009_v57 = vld [vmem:[#allocation3 + $0x2a8] sm:$0xff] }
  0x57   : > { %v3072_v36 = vpack.c.bf16 %v904_v35, %v903_v34  ;;  %v1013_v63 = vld [vmem:[#allocation3 + $0x2c8] sm:$0xff] }
  0x58   : > { %2579 = vmatmul.mubr.msk.f32.vlgmr.msra.gmra.mrb[0].mxu0 %vm468_vm1, %v464_v43  ;;  %v1217_v43 = vld [vmem:[%s3855_s4] sm:$0xff]  ;;  %v1017_v7 = vld [vmem:[#allocation3 + $0x2e8] sm:$0xff] }
  0x59   : > { %2995 = vmatpush3.bf16.msra.mxu0 %v2992_v37  ;;  %2613 = vmatprep.mubr.msk.f32.mxu0 %vm681_vm2, %v677_v46  ;;  %v678_v37 = vld [vmem:[#allocation2 + $0xf] sm:$0xff]  ;;  %v3152_v46 = vpack.c.bf16 %v1218_v44, %v1217_v43  ;;  %v910_v44 = vld [vmem:[#allocation3 + $0x278] sm:$0xff] }
  0x5a   : > { %2997 = vmatprep.subr.bf16.mxu0 %v2996_v45  ;;  %2955 = vmatpush3.bf16.msra.mxu1 %v2952_v22  ;;  %v897_v22 = vld [vmem:[#allocation3 + $0x210] sm:$0xff]  ;;  %v1118_v26 = vld [vmem:[#allocation3 + $0x328] sm:$0xff] }
  0x5b   : > { %2957 = vmatprep.subr.bf16.mxu1 %v2956_v30  ;;  %v909_v43 = vld [vmem:[#allocation3 + $0x270] sm:$0xff]  ;;  %v1122_v34 = vld [vmem:[#allocation3 + $0x348] sm:$0xff] }
  0x5d   : > { %2999 = vmatpush3.bf16.msra.mxu0 %v2996_v45  ;;  %v1219_v45 = vld [vmem:[%s3855_s4 + $0x10] sm:$0xff] }
  0x5e   : > { %3001 = vmatprep.subr.bf16.mxu0 %v3000_v52  ;;  %2959 = vmatpush3.bf16.msra.mxu1 %v2956_v30  ;;  %v3156_v49 = vpack.c.bf16 %v1220_v47, %v1219_v45  ;;  %v901_v30 = vld [vmem:[#allocation3 + $0x230] sm:$0xff]  ;;  %v3084_v45 = vpack.c.bf16 %v910_v44, %v909_v43  ;;  %v1005_v47 = vld [vmem:[#allocation3 + $0x288] sm:$0xff]  ;;  %v1128_v43 = vld [vmem:[#allocation3 + $0x378] sm:$0xff] }
  0x5f   : > { %3153 = vmatprep.subr.bf16.mxu1 %v3152_v46 }
  0x61   : > { %3003 = vmatpush3.bf16.msra.mxu0 %v3000_v52  ;;  %2544 = vmatmul.mubr.msk.f32.vlgmr.msra.gmra.mrb[0].mxu1 %vm500_vm5, %v496_v39  ;;  %v792_v52 = vld [vmem:[#allocation3 + $0x1b0] sm:$0xff]  ;;  %vm1810_vm5 = vcmask 64512  }
  0x62   : > { %3005 = vmatprep.subr.bf16.mxu0 %v3004_v58  ;;  %3155 = vmatpush3.bf16.msra.mxu1 %v3152_v46  ;;  %v3036_v55 = vpack.c.bf16 %v793_v53, %v792_v52  ;;  %v1004_v46 = vld [vmem:[#allocation3 + $0x280] sm:$0xff]  ;;  %v1007_v52 = vld [vmem:[#allocation3 + $0x298] sm:$0xff] }
  0x63   : > { %3157 = vmatprep.subr.bf16.mxu1 %v3156_v49  ;;  %v880_v53 = vld [vmem:[#allocation2 + $0x11] sm:$0xff] }
  0x65   : > { %3007 = vmatpush3.bf16.msra.mxu0 %v3004_v58  ;;  %v794_v58 = vld [vmem:[#allocation3 + $0x1c0] sm:$0xff] }
  0x66   : > { %3009 = vmatprep.subr.bf16.mxu0 %v3008_v0  ;;  %3159 = vmatpush3.bf16.msra.mxu1 %v3156_v49  ;;  %v3040_v61 = vpack.c.bf16 %v795_v59, %v794_v58  ;;  %v3088_v49 = vpack.c.bf16 %v1005_v47, %v1004_v46  ;;  %v3096_v58 = vpack.c.bf16 %v1009_v57, %v1008_v56  ;;  %v1010_v59 = vld [vmem:[#allocation3 + $0x2b0] sm:$0xff]  ;;  %v1229_v47 = vld [vmem:[%s3855_s4 + $0x60] sm:$0xff] }
  0x67   : > { %3161 = vmatprep.subr.bf16.mxu1 %v3160_v54  ;;  %v1098_v46 = vld [vmem:[#allocation2 + $0x13] sm:$0xff]  ;;  %v2267_v56 = vld [vmem:[%s3853_s2] ss:$0 sm:$0xff] }
  0x69   : > { %3011 = vmatpush3.bf16.msra.mxu0 %v3008_v0  ;;  %v796_v0 = vld [vmem:[#allocation3 + $0x1d0] sm:$0xff] }
  0x6a   : > { %3013 = vmatprep.subr.bf16.mxu0 %v3012_v8  ;;  %3163 = vmatpush3.bf16.msra.mxu1 %v3160_v54  ;;  %v3044_v5 = vpack.c.bf16 %v797_v3, %v796_v0  ;;  %v3092_v54 = vpack.c.bf16 %v1007_v52, %v1006_v51  ;;  %v3104_v0 = vpack.c.bf16 %v1013_v63, %v1012_v62  ;;  %v1014_v3 = vld [vmem:[#allocation3 + $0x2d0] sm:$0xff] }
  0x6b   : > { %3165 = vmatprep.subr.bf16.mxu1 %v3164_v60  ;;  %v1231_v52 = vld [vmem:[%s3855_s4 + $0x70] sm:$0xff] }
  0x6d   : > { %3015 = vmatpush3.bf16.msra.mxu0 %v3012_v8  ;;  %v798_v8 = vld [vmem:[#allocation3 + $0x1e0] sm:$0xff] }
  0x6e   : > { %3017 = vmatprep.subr.bf16.mxu0 %v3016_v17  ;;  %3167 = vmatpush3.bf16.msra.mxu1 %v3164_v60  ;;  %v3048_v12 = vpack.c.bf16 %v799_v9, %v798_v8  ;;  %v1011_v60 = vld [vmem:[#allocation3 + $0x2b8] sm:$0xff]  ;;  %v3112_v8 = vpack.c.bf16 %v1017_v7, %v1016_v6  ;;  %v1018_v9 = vld [vmem:[#allocation3 + $0x2f0] sm:$0xff] }
  0x6f   : > { %3169 = vmatprep.subr.bf16.mxu1 %v3168_v4 }
  0x71   : > { %3019 = vmatpush3.bf16.msra.mxu0 %v3016_v17  ;;  %v3052_v17 = vpack.c.bf16 %v801_v16, %v800_v15  ;;  %v1113_v15 = vld [vmem:[#allocation3 + $0x300] sm:$0xff]  ;;  %v1114_v16 = vld [vmem:[#allocation3 + $0x308] sm:$0xff] }
  0x72   : > { %3021 = vmatprep.subr.bf16.mxu0 %v3020_v23  ;;  %3171 = vmatpush3.bf16.msra.mxu1 %v3168_v4  ;;  %v1015_v4 = vld [vmem:[#allocation3 + $0x2d8] sm:$0xff]  ;;  %v3120_v18 = vpack.c.bf16 %v1114_v16, %v1113_v15  ;;  %v2271_v15 = vld [vmem:[%s3854_s3] ss:$0 sm:$0xff] }
  0x73   : > { %3173 = vmatprep.subr.bf16.mxu1 %v3172_v10 }
  0x75   : > { %3023 = vmatpush3.bf16.msra.mxu0 %v3020_v23  ;;  %v898_v23 = vld [vmem:[#allocation3 + $0x218] sm:$0xff] }
  0x76   : > { %3025 = vmatprep.subr.bf16.mxu0 %v3024_v31  ;;  %3175 = vmatpush3.bf16.msra.mxu1 %v3172_v10  ;;  %v3060_v24 = vpack.c.bf16 %v898_v23, %v897_v22  ;;  %v1019_v10 = vld [vmem:[#allocation3 + $0x2f8] sm:$0xff] }
  0x77   : > { %v989_v22 = vld [vmem:[#allocation2 + $0x12] sm:$0xff] }
  0x78   : > { %2614 = vmatmul.mubr.msk.f32.vlgmr.msra.gmra.mrb[0].mxu0 %vm682_vm3, %v678_v37  ;;  %v905_v37 = vld [vmem:[#allocation3 + $0x250] sm:$0xff] }
  0x79   : > { %3027 = vmatpush3.bf16.msra.mxu0 %v3024_v31  ;;  %2648 = vmatprep.mubr.f32.mxu0 %v3588_v13  ;;  %v902_v31 = vld [vmem:[#allocation3 + $0x238] sm:$0xff]  ;;  %v3076_v39 = vpack.c.bf16 %v906_v38, %v905_v37 }
  0x7a   : > { %3029 = vmatprep.subr.bf16.mxu0 %v3028_v40  ;;  %v3068_v33 = vpack.c.bf16 %v902_v31, %v901_v30  ;;  %v1120_v30 = vld [vmem:[#allocation3 + $0x338] sm:$0xff] }
  0x7b   : > { %v1124_v37 = vld [vmem:[#allocation3 + $0x358] sm:$0xff] }
  0x7d   : > { %3031 = vmatpush3.bf16.msra.mxu0 %v3028_v40  ;;  %v907_v40 = vld [vmem:[#allocation3 + $0x260] sm:$0xff] }
  0x7e   : > { %3033 = vmatprep.subr.bf16.mxu0 %v3032_v48  ;;  %v3080_v42 = vpack.c.bf16 %v908_v41, %v907_v40  ;;  %v1126_v40 = vld [vmem:[#allocation3 + $0x368] sm:$0xff] }
  0x81   : > { %3035 = vmatpush3.bf16.msra.mxu0 %v3032_v48  ;;  %v882_v48 = vadd.s32 1, %v3599_v32 }
  0x82   : > { %3037 = vmatprep.subr.bf16.mxu0 %v3036_v55 }
  0x83   : > { %vm886_vm7 = vcmp.lt.s32.totalorder %v882_v48, 8  ;;  %v1230_v48 = vld [vmem:[%s3855_s4 + $0x68] sm:$0xff] }
  0x84   : > { %v3176_v50 = vpack.c.bf16 %v1230_v48, %v1229_v47 }
  0x85   : > { %3039 = vmatpush3.bf16.msra.mxu0 %v3036_v55  ;;  %v988_v55 = vld [vmem:[#allocation2 + $0xa] sm:$0xff] }
  0x86   : > { %3041 = vmatprep.subr.bf16.mxu0 %v3040_v61  ;;  %3177 = vmatprep.subr.bf16.mxu1 %v3176_v50 }
  0x87   : > { %3179 = vmatpush3.bf16.msra.mxu1 %v3176_v50 }
  0x89   : > { %3043 = vmatpush3.bf16.msra.mxu0 %v3040_v61  ;;  %v3100_v61 = vpack.c.bf16 %v1011_v60, %v1010_v59 }
  0x8a   : > { %3045 = vmatprep.subr.bf16.mxu0 %v3044_v5 }
  0x8d   : > { %3047 = vmatpush3.bf16.msra.mxu0 %v3044_v5  ;;  %v3108_v5 = vpack.c.bf16 %v1015_v4, %v1014_v3  ;;  %v3422_v3 = vmov 0.0078125|0.0078125  }
  0x8e   : > { %3049 = vmatprep.subr.bf16.mxu0 %v3048_v12 }
  0x91   : > { %3051 = vmatpush3.bf16.msra.mxu0 %v3048_v12  ;;  %v3116_v12 = vpack.c.bf16 %v1019_v10, %v1018_v9 }
  0x92   : > { %3053 = vmatprep.subr.bf16.mxu0 %v3052_v17 }
  0x95   : > { %3055 = vmatpush3.bf16.msra.mxu0 %v3052_v17  ;;  %v991_v17 = vadd.s32 2, %v3599_v32 }
  0x96   : > { %3057 = vmatprep.subr.bf16.mxu0 %v3056_v20 }
  0x97   : > { %vm995_vm9 = vcmp.lt.s32.totalorder %v991_v17, 8 }
  0x98   : > { %2649 = vmatmul.mubr.f32.vlgmr.msra.gmra.mrb[0].mxu0 %v3590_v14 }
  0x99   : > { %3059 = vmatpush3.bf16.msra.mxu0 %v3056_v20  ;;  %2683 = vmatprep.mubr.msk.f32.mxu0 %vm885_vm6, %v879_v25  ;;  %v1115_v20 = vld [vmem:[#allocation3 + $0x310] sm:$0xff]  ;;  %v1117_v25 = vld [vmem:[#allocation3 + $0x320] sm:$0xff]  ;;  %vm1897_vm6 = vcmask 1041408  }
  0x9a   : > { %3061 = vmatprep.subr.bf16.mxu0 %v3060_v24  ;;  %v3124_v23 = vpack.c.bf16 %v1116_v21, %v1115_v20  ;;  %v3128_v27 = vpack.c.bf16 %v1118_v26, %v1117_v25 }
  0x9d   : > { %3063 = vmatpush3.bf16.msra.mxu0 %v3060_v24  ;;  %v1097_v24 = vld [vmem:[#allocation2 + $0xb] sm:$0xff] }
  0x9e   : > { %3065 = vmatprep.subr.bf16.mxu0 %v3064_v29 }
  0xa1   : > { %3067 = vmatpush3.bf16.msra.mxu0 %v3064_v29  ;;  %v1119_v29 = vld [vmem:[#allocation3 + $0x330] sm:$0xff] }
  0xa2   : > { %3069 = vmatprep.subr.bf16.mxu0 %v3068_v33  ;;  %v3132_v31 = vpack.c.bf16 %v1120_v30, %v1119_v29 }
  0xa5   : > { %3071 = vmatpush3.bf16.msra.mxu0 %v3068_v33  ;;  %v1121_v33 = vld [vmem:[#allocation3 + $0x340] sm:$0xff] }
  0xa6   : > { %3073 = vmatprep.subr.bf16.mxu0 %v3072_v36  ;;  %v3136_v35 = vpack.c.bf16 %v1122_v34, %v1121_v33 }
  0xa9   : > { %3075 = vmatpush3.bf16.msra.mxu0 %v3072_v36  ;;  %v1123_v36 = vld [vmem:[#allocation3 + $0x350] sm:$0xff] }
  0xaa   : > { %3077 = vmatprep.subr.bf16.mxu0 %v3076_v39  ;;  %v3140_v38 = vpack.c.bf16 %v1124_v37, %v1123_v36 }
  0xad   : > { %3079 = vmatpush3.bf16.msra.mxu0 %v3076_v39  ;;  %v1125_v39 = vld [vmem:[#allocation3 + $0x360] sm:$0xff] }
  0xae   : > { %3081 = vmatprep.subr.bf16.mxu0 %v3080_v42  ;;  %v3144_v41 = vpack.c.bf16 %v1126_v40, %v1125_v39 }
  0xb1   : > { %3083 = vmatpush3.bf16.msra.mxu0 %v3080_v42  ;;  %v1127_v42 = vld [vmem:[#allocation3 + $0x370] sm:$0xff] }
  0xb2   : > { %3085 = vmatprep.subr.bf16.mxu0 %v3084_v45  ;;  %v3148_v44 = vpack.c.bf16 %v1128_v43, %v1127_v42  ;;  %v2272_v42 = vld [vmem:[%s3857_s6] ss:$0 sm:$0xff] }
  0xb5   : > { %3087 = vmatpush3.bf16.msra.mxu0 %v3084_v45  ;;  %v1100_v45 = vadd.s32 3, %v3599_v32 }
  0xb6   : > { %3089 = vmatprep.subr.bf16.mxu0 %v3088_v49 }
  0xb7   : > { %vm1104_vm11 = vcmp.lt.s32.totalorder %v1100_v45, 8  ;;  %v2273_v45 = vld [vmem:[%s3858_s7] ss:$0 sm:$0xff] }
  0xb8   : > { %2684 = vmatmul.mubr.msk.f32.vlgmr.msra.gmra.mrb[0].mxu0 %vm886_vm7, %v880_v53  ;;  %v1232_v53 = vld [vmem:[%s3855_s4 + $0x78] sm:$0xff]  ;;  %vm1893_vm7 = vcmask 15360  }
  0xb9   : > { %3091 = vmatpush3.bf16.msra.mxu0 %v3088_v49  ;;  %2718 = vmatprep.mubr.msk.f32.mxu0 %vm994_vm8, %v988_v55 }
  0xba   : > { %3093 = vmatprep.subr.bf16.mxu0 %v3092_v54 }
  0xbd   : > { %3095 = vmatpush3.bf16.msra.mxu0 %v3092_v54  ;;  %v3180_v54 = vpack.c.bf16 %v1232_v53, %v1231_v52 }
  0xbe   : > { %3097 = vmatprep.subr.bf16.mxu0 %v3096_v58 }
  0xbf   : > { %3181 = vmatprep.subr.bf16.mxu1 %v3180_v54 }
  0xc0   : > { %3183 = vmatpush3.bf16.msra.mxu1 %v3180_v54 }
  0xc1   : > { %3099 = vmatpush3.bf16.msra.mxu0 %v3096_v58 }
  0xc2   : > { %3101 = vmatprep.subr.bf16.mxu0 %v3100_v61 }
  0xc5   : > { %3103 = vmatpush3.bf16.msra.mxu0 %v3100_v61 }
  0xc6   : > { %3105 = vmatprep.subr.bf16.mxu0 %v3104_v0 }
  0xc9   : > { %3107 = vmatpush3.bf16.msra.mxu0 %v3104_v0  ;;  %v1310_v0 = vld [vmem:[%s3856_s5] sm:$0xf] }
  0xca   : > { %3109 = vmatprep.subr.bf16.mxu0 %v3108_v5  ;;  %2791 = vmatprep.subr.msk.mxu1 %vm1318_vm12, %v1310_v0 }
  0xcd   : > { %3111 = vmatpush3.bf16.msra.mxu0 %v3108_v5 }
  0xce   : > { %3113 = vmatprep.subr.bf16.mxu0 %v3112_v8 }
  0xd1   : > { %3115 = vmatpush3.bf16.msra.mxu0 %v3112_v8 }
  0xd2   : > { %3117 = vmatprep.subr.bf16.mxu0 %v3116_v12 }
  0xd5   : > { %3119 = vmatpush3.bf16.msra.mxu0 %v3116_v12 }
  0xd6   : > { %3121 = vmatprep.subr.bf16.mxu0 %v3120_v18 }
  0xd8   : > { %2719 = vmatmul.mubr.msk.f32.vlgmr.msra.gmra.mrb[0].mxu0 %vm995_vm9, %v989_v22  ;;  %v3423_v22 = vmov 0  }
  0xd9   : > { %3123 = vmatpush3.bf16.msra.mxu0 %v3120_v18  ;;  %2753 = vmatprep.mubr.msk.f32.mxu0 %vm1103_vm10, %v1097_v24 }
  0xda   : > { %3125 = vmatprep.subr.bf16.mxu0 %v3124_v23  ;;  %3307 = vset.pattern.permute.xlu0 %v3423_v22 }
  0xdb   : > { %3308 = vset.pattern.permute.xlu1 %v3423_v22 }
  0xdd   : > { %3127 = vmatpush3.bf16.msra.mxu0 %v3124_v23 }
  0xde   : > { %3129 = vmatprep.subr.bf16.mxu0 %v3128_v27 }
  0xe1   : > { %3131 = vmatpush3.bf16.msra.mxu0 %v3128_v27 }
  0xe2   : > { %3133 = vmatprep.subr.bf16.mxu0 %v3132_v31 }
  0xe5   : > { %3135 = vmatpush3.bf16.msra.mxu0 %v3132_v31 }
  0xe6   : > { %3137 = vmatprep.subr.bf16.mxu0 %v3136_v35 }
  0xe9   : > { %3139 = vmatpush3.bf16.msra.mxu0 %v3136_v35 }
  0xea   : > { %3141 = vmatprep.subr.bf16.mxu0 %v3140_v38 }
  0xed   : > { %3143 = vmatpush3.bf16.msra.mxu0 %v3140_v38 }
  0xee   : > { %3145 = vmatprep.subr.bf16.mxu0 %v3144_v41 }
  0xf1   : > { %3147 = vmatpush3.bf16.msra.mxu0 %v3144_v41 }
  0xf2   : > { %3149 = vmatprep.subr.bf16.mxu0 %v3148_v44 }
  0xf5   : > { %3151 = vmatpush3.bf16.msra.mxu0 %v3148_v44 }
  0xf8   : > { %2754 = vmatmul.mubr.msk.f32.vlgmr.msra.gmra.mrb[0].mxu0 %vm1104_vm11, %v1098_v46 }
 0x134   : > { %v2545_v49 = vpop.f32.mrb[0].mxu1 }
 0x135   : > { %v593_v51 = vpop.f32.mrb[1].mxu1 }
 0x1cb   : > { %v2755_v55 = vpop.f32.mrb[0].mxu0 }
 0x1cc   : > { %v3235_v57 = vadd.f32 %v2755_v55, %v2545_v49  ;;  %v1195_v58 = vpop.f32.mrb[1].mxu0 }
 0x1cd   : > { %v3236_v59 = vadd.f32 %v1195_v58, %v593_v51  ;;  %v3745_v58 = vld [vmem:[#allocation2] sm:$0xff] }
 0x1ce   : > { %v1214_v60 = vadd.f32 %v3235_v57, %v2267_v56  ;;  %v3424_v57 = vmov 0.0|0.0  }
 0x1cf   : > { %v1213_v61 = vadd.f32 %v3236_v59, %v2267_v56  ;;  %v1697_v59 = vmul.u32 8, %v3580_v2 }
 0x1d0   : > { %v1216_v63 = vmul.f32 %v1214_v60, %v1214_v60 }
 0x1d1   : > { %v1215_v62 = vmul.f32 %v1213_v61, %v1213_v61 }
 0x1d3   : > { %2788 = vmatprep.mubr.f32.mxu1 %v1215_v62 }
 0x1d4   : > { %2789 = vmatmul.mubr.f32.vlgmr.msra.gmra.mrb[2].mxu1 %v1216_v63 }
 0x1d5   : > { %2792 = vmatpush3.msk.msra.mxu1 %vm1318_vm12, %v1310_v0 }
 0x1d6   : > { %3184 = vmatprep.subr.bf16.mxu1 %v3422_v3 }
 0x2a7   : > { %v2790_v4 = vpop.f32.mrb[2].mxu1 }
 0x2a8   : > { %v1305_v5 = vadd.f32 1e-06, %v2790_v4  ;;  %v1299_v6 = vpop.f32.mrb[3].mxu1 }
 0x2a9   : > { %v1300_v7 = vadd.f32 1e-06, %v1299_v6  ;;  %v1885_v6 = vld [vmem:[%s3861_s10] sm:$0x3] }
 0x2ab   : > { %3309 = vrsqrt.f32 %v1300_v7  ;;  %v2280_v7 = vld [vmem:[%s3860_s9] ss:$0 sm:$0xff] }
 0x2ac   : > { %3311 = vrsqrt.f32 %v1305_v5 }
 0x2b5   : > { %v3310_v8 = vpop.eup %3309 }
 0x2b6   : > { %v3312_v9 = vpop.eup %3311  ;;  %2793 = vmatprep.mubr.msk.f32.mxu1 %vm1311_vm13, %v3310_v8 }
 0x2b7   : > { %2794 = vmatmul.mubr.msk.f32.vlgmr.msra.gmra.mrb[4].mxu1 %vm1311_vm13, %v3312_v9 }
 0x2b8   : > { %3185 = vmatpush3.bf16.msra.mxu1 %v3422_v3 }
 0x2b9   : > { %3186 = vmatprep.subr.bf16.mxu1 %v3422_v3 }
 0x2bc   : > { %3187 = vmatpush3.bf16.msra.mxu1 %v3422_v3 }
 0x2bd   : > { %3188 = vmatprep.subr.bf16.mxu1 %v3422_v3 }
 0x2c0   : > { %3189 = vmatpush3.bf16.msra.mxu1 %v3422_v3 }
 0x2c1   : > { %3190 = vmatprep.subr.bf16.mxu1 %v3422_v3 }
 0x2c4   : > { %3191 = vmatpush3.bf16.msra.mxu1 %v3422_v3 }
 0x2c5   : > { %3192 = vmatprep.subr.bf16.mxu1 %v3422_v3 }
 0x2c8   : > { %3193 = vmatpush3.bf16.msra.mxu1 %v3422_v3 }
 0x2c9   : > { %3194 = vmatprep.subr.bf16.mxu1 %v3422_v3 }
 0x2cc   : > { %3195 = vmatpush3.bf16.msra.mxu1 %v3422_v3 }
 0x2cd   : > { %3196 = vmatprep.subr.bf16.mxu1 %v3422_v3 }
 0x2d0   : > { %3197 = vmatpush3.bf16.msra.mxu1 %v3422_v3 }
 0x2d1   : > { %3198 = vmatprep.subr.bf16.mxu1 %v3422_v3 }
 0x2d4   : > { %3199 = vmatpush3.bf16.msra.mxu1 %v3422_v3 }
 0x2d5   : > { %3200 = vmatprep.subr.bf16.mxu1 %v3422_v3 }
 0x38a   : > { %v2795_v10 = vpop.f32.mrb[4].mxu1 }
 0x38b   : > { %v1398_v12 = vmul.f32 %v2795_v10, %v1214_v60  ;;  %v1388_v16 = vpop.f32.mrb[5].mxu1 }
 0x38c   : > { %v1397_v17 = vmul.f32 %v1388_v16, %v1213_v61 }
 0x38d   : > { %v3690_v19 = vmul.f32 %v2271_v15, %v1398_v12 }
 0x38e   : > { %v3688_v18 = vmul.f32 %v2271_v15, %v1397_v17 }
 0x38f   : > { %v1484_v21 = vmul.f32 %v3690_v19, %v3690_v19 }
 0x390   : > { %2828 = vmatprep.mubr.f32.mxu1 %v3688_v18  ;;  %v1483_v20 = vmul.f32 %v3688_v18, %v3688_v18 }
 0x391   : > { %2829 = vmatmul.mubr.f32.vlgmr.msra.gmra.mrb[6].mxu1 %v3690_v19 }
 0x392   : > { %3201 = vmatpush3.bf16.msra.mxu1 %v3422_v3  ;;  %2863 = vmatprep.mubr.f32.mxu1 %v1483_v20 }
 0x393   : > { %3202 = vmatprep.subr.bf16.mxu1 %v3422_v3 }
 0x396   : > { %3203 = vmatpush3.bf16.msra.mxu1 %v3422_v3 }
 0x397   : > { %3204 = vmatprep.subr.bf16.mxu1 %v3422_v3 }
 0x39a   : > { %3205 = vmatpush3.bf16.msra.mxu1 %v3422_v3 }
 0x39b   : > { %3206 = vmatprep.subr.bf16.mxu1 %v3422_v3 }
 0x39e   : > { %3207 = vmatpush3.bf16.msra.mxu1 %v3422_v3 }
 0x39f   : > { %3208 = vmatprep.subr.bf16.mxu1 %v3422_v3 }
 0x3a2   : > { %3209 = vmatpush3.bf16.msra.mxu1 %v3422_v3 }
 0x3a3   : > { %3210 = vmatprep.subr.bf16.mxu1 %v3422_v3 }
 0x3a6   : > { %3211 = vmatpush3.bf16.msra.mxu1 %v3422_v3 }
 0x3a7   : > { %3212 = vmatprep.subr.bf16.mxu1 %v3422_v3 }
 0x3aa   : > { %3213 = vmatpush3.bf16.msra.mxu1 %v3422_v3 }
 0x3ab   : > { %3214 = vmatprep.subr.bf16.mxu1 %v3422_v3 }
 0x3ae   : > { %3215 = vmatpush3.bf16.msra.mxu1 %v3422_v3 }
 0x3af   : > { %3216 = vmatprep.subr.bf16.mxu1 %v3422_v3 }
 0x3b1   : > { %2864 = vmatmul.mubr.f32.vlgmr.msra.gmra.mrb[8].mxu1 %v1484_v21 }
 0x3b2   : > { %3217 = vmatpush3.bf16.msra.mxu1 %v3422_v3 }
 0x3b3   : > { %3218 = vmatprep.subr.bf16.mxu1 %v3422_v3 }
 0x3b6   : > { %3219 = vmatpush3.bf16.msra.mxu1 %v3422_v3 }
 0x3b7   : > { %3220 = vmatprep.subr.bf16.mxu1 %v3422_v3 }
 0x3ba   : > { %3221 = vmatpush3.bf16.msra.mxu1 %v3422_v3 }
 0x3bb   : > { %3222 = vmatprep.subr.bf16.mxu1 %v3422_v3 }
 0x3be   : > { %3223 = vmatpush3.bf16.msra.mxu1 %v3422_v3 }
 0x3bf   : > { %3224 = vmatprep.subr.bf16.mxu1 %v3422_v3 }
 0x3c2   : > { %3225 = vmatpush3.bf16.msra.mxu1 %v3422_v3 }
 0x3c3   : > { %3226 = vmatprep.subr.bf16.mxu1 %v3422_v3 }
 0x3c6   : > { %3227 = vmatpush3.bf16.msra.mxu1 %v3422_v3 }
 0x3c7   : > { %3228 = vmatprep.subr.bf16.mxu1 %v3422_v3 }
 0x3ca   : > { %3229 = vmatpush3.bf16.msra.mxu1 %v3422_v3 }
 0x3cb   : > { %3230 = vmatprep.subr.bf16.mxu1 %v3422_v3 }
 0x3ce   : > { %3231 = vmatpush3.bf16.msra.mxu1 %v3422_v3 }
 0x3cf   : > { %3232 = vmatprep.subr.bf16.mxu1 %v3424_v57 }
 0x464   : > { %v2830_v23 = vpop.f32.mrb[6].mxu1 }
 0x465   : > { %v1474_v24 = vpop.f32.mrb[7].mxu1  ;;  %v1561_v25 = vmul.f32 %v2830_v23, %v2830_v23 }
 0x466   : > { %1568 = vperm.xlu0 %3307, %v1474_v24   ;;  %v1560_v26 = vmul.f32 %v1474_v24, %v1474_v24 }
 0x46a   : > { %1573 = vperm.xlu0 %3307, %v2830_v23  }
 0x484   : > { %v2865_v27 = vpop.f32.mrb[8].mxu1 }
 0x485   : > { %v1563_v29 = vsub.f32 %v2865_v27, %v1561_v25  ;;  %v1551_v30 = vpop.f32.mrb[9].mxu1 }
 0x486   : > { %v1562_v31 = vsub.f32 %v1551_v30, %v1560_v26  ;;  %v3426_v26 = vmov 1.0  }
 0x487   : > { %v1565_v33 = vmax.f32 %v1563_v29, 0.0 }
 0x488   : > { %v1564_v34 = vmax.f32 %v1562_v31, 0.0 }
 0x489   : > { %v1579_v36 = vadd.f32 1e-05, %v1565_v33 }
 0x48a   : > { %v1578_v35 = vadd.f32 1e-05, %v1564_v34 }
 0x48c   : > { %3313 = vrsqrt.f32 %v1578_v35 }
 0x48d   : > { %3315 = vrsqrt.f32 %v1579_v36 }
 0x496   : > { %v3314_v37 = vpop.eup %3313 }
 0x497   : > { %1584 = vperm.xlu1 %3308, %v3314_v37   ;;  %v3316_v38 = vpop.eup %3315 }
 0x49b   : > { %1589 = vperm.xlu1 %3308, %v3316_v38  }
 0x4e5   : > { %v1569_v39 = vpop.permute.xlu0 %1568 }
 0x4e6   : > { %v1576_v40 = vsub.f32 %v3688_v18, %v1569_v39 }
 0x4e9   : > { %v1574_v41 = vpop.permute.xlu0 %1573 }
 0x4ea   : > { %v1577_v46 = vsub.f32 %v3690_v19, %v1574_v41  ;;  %v2282_v19 = vld [vmem:[%s3862_s11] ss:$0 sm:$0xff] }
 0x516   : > { %v1585_v43 = vpop.permute.xlu1 %1584 }
 0x517   : > { %v1592_v44 = vmul.f32 %v1585_v43, %v1576_v40 }
 0x519   : > { %v1601_v47 = vmul.f32 %v2272_v42, %v1592_v44 }
 0x51a   : > { %v1590_v48 = vpop.permute.xlu1 %1589 }
 0x51b   : > { %v1610_v49 = vadd.f32 %v2273_v45, %v1601_v47  ;;  %v1593_v50 = vmul.f32 %v1590_v48, %v1577_v46 }
 0x51d   : > { %v1602_v51 = vmul.f32 %v2272_v42, %v1593_v50  ;;  %v3738_v52 = vadd.f32 %v1610_v49, %v3588_v13  ;;  %v1690_v13 = vand.u32 127, %v436_v1 }
 0x51f   : > { %v1611_v53 = vadd.f32 %v2273_v45, %v1602_v51  ;;  %2898 = vmatprep.mubr.f32.mxu1 %v3738_v52  ;;  %vm1692_vm15 = vcmp.eq.s32.totalorder %v1690_v13, %v3599_v32  ;;  %vm1691_vm0 = vcmp.eq.s32.totalorder %v1690_v13, %v3586_v11  ;;  %vm1698_vm1 = vcmp.ge.s32.totalorder %v1690_v13, %v1697_v59  ;;  %v1802_v11 = vld [vmem:[%s3859_s8] sm:$0xff] }
 0x520   : > { %v3754_v60 = vsel %vm1692_vm15, 1.0, %v3745_v58  ;;  %v2274_v61 = vsel %vm1691_vm0, 1.0, %v3745_v58  ;;  %v1704_v15 = vmul.u32 8, %v1690_v13 }
 0x521   : > { %v3742_v54 = vadd.f32 %v1611_v53, %v3590_v14  ;;  %v1699_v14 = vadd.s32 8, %v1697_v59 }
 0x522   : > { %v1707_v16 = vadd.s32 8, %v1704_v15  ;;  %vm1705_vm8 = vcmp.ge.s32.totalorder %v3580_v2, %v1704_v15  ;;  %vm1706_vm11 = vcmp.ge.s32.totalorder %v3596_v28, %v1704_v15 }
 0x523   : > { %2899 = vmatmul.mubr.f32.vlgmr.msra.gmra.mrb[10].mxu1 %v3742_v54  ;;  %vm1700_vm2 = vcmp.lt.s32.totalorder %v1690_v13, %v1699_v14 }
 0x524   : > { %2905 = vmatprep.mubr.msk.f32.mxu1 %vm3425_vm14, %v3745_v58  ;;  %vm1701_vm3 = vmand %vm1698_vm1, %vm1700_vm2  ;;  %vm1708_vm9 = vcmp.lt.s32.totalorder %v3580_v2, %v1707_v16  ;;  %vm1709_vm12 = vcmp.lt.s32.totalorder %v3596_v28, %v1707_v16 }
 0x525   : > { %v2276_v32 = vsel %vm1701_vm3, 1.0, %v3745_v58  ;;  %vm1710_vm10 = vmand %vm1705_vm8, %vm1708_vm9 }
 0x526   : > { %v2277_v17 = vsel %vm1710_vm10, 1.0, %v3745_v58  ;;  %vm3782_vm13 = vmand %vm1706_vm11, %vm1709_vm12 }
 0x527   : > { %v2278_v25 = vsel %vm3782_vm13, 1.0, %v3745_v58 }
 0x5f6   : > { %v2900_v55 = vpop.f32.mrb[10].mxu1 }
 0x5f7   : > { %1723 = vperm.xlu1 %3308, %v2900_v55   ;;  %v1680_v56 = vpop.f32.mrb[11].mxu1 }
 0x5f8   : > { %1718 = vperm.xlu0 %3307, %v1680_v56  }
 0x676   : > { %v1724_v62 = vpop.permute.xlu1 %1723 }
 0x677   : > { %v1727_v63 = vmul.f32 %v3754_v60, %v1724_v62  ;;  %v1719_v0 = vpop.permute.xlu0 %1718 }
 0x678   : > { %v1726_v3 = vmul.f32 %v2274_v61, %v1719_v0 }
 0x67a   : > { %v3233_v1 = vpack.c.bf16 %v1727_v63, %v1726_v3 }
 0x67c   : > { %3234 = vmatpush3.bf16.msra.mxu1 %v3233_v1 }
 0x67d   : > { %2908 = vmatprep.subr.mxu1 %v3745_v58 }
 0x67f   : > { %2906 = vmatmul.mubr.msk.f32.vlgmr.msra.gmra.mrb[12].mxu1 %vm1728_vm4, %v2276_v32 }
 0x680   : > { %2910 = vmatprep.mubr.msk.f32.mxu1 %vm3425_vm14, %v3745_v58  ;;  %2909 = vmatpush3.msra.mxu1 %v1802_v11 }
 0x681   : > { %2913 = vmatprep.subr.mxu1 %v3745_v58 }
 0x752   : > { %v1798_v4 = vpop.f32.mrb[12].mxu1 }
 0x753   : > { %v2907_v5 = vpop.f32.mrb[13].mxu1  ;;  %2911 = vmatmul.mubr.msk.f32.vlgmr.msra.gmra.mrb[14].mxu1 %vm1810_vm5, %v1798_v4 }
 0x754   : > { %2915 = vmatprep.mubr.msk.f32.mxu1 %vm3425_vm14, %v3745_v58  ;;  %2914 = vmatpush3.msk.msra.mxu1 %vm1897_vm6, %v1885_v6 }
 0x826   : > { %v1880_v8 = vpop.f32.mrb[14].mxu1 }
 0x827   : > { %v1881_v9 = vadd.f32 %v2280_v7, %v1880_v8  ;;  %v2912_v10 = vpop.f32.mrb[15].mxu1 }
 0x829   : > { %v1884_v12 = vmax.f32 %v1881_v9, 0.0 }
 0x82b   : > { %2916 = vmatmul.mubr.msk.f32.vlgmr.msra.gmra.mrb[16].mxu1 %vm1893_vm7, %v1884_v12 }
 0x82c   : > { %2920 = vmatprep.mubr.msk.f32.mxu1 %vm1893_vm7, %v2277_v17 }
 0x8fe   : > { %v1967_v20 = vpop.f32.mrb[16].mxu1 }
 0x8ff   : > { %v1968_v21 = vadd.f32 %v2282_v19, %v1967_v20  ;;  %v2917_v2 = vpop.f32.mrb[17].mxu1 }
 0x901   : > { %v2285_v22 = vmul.f32 -1.442695, %v1968_v21 }
 0x903   : > { %3317 = vpow2.f32 %v2285_v22 }
 0x90d   : > { %v3318_v23 = vpop.eup %3317 }
 0x90e   : > { %v1974_v24 = vadd.f32 1.0, %v3318_v23 }
 0x910   : > { %3319 = vrcp.f32 %v1974_v24 }
 0x91a   : > { %v3320_v28 = vpop.eup %3319 }
 0x91b   : > { %2918 = vmatprep.subr.msk.mxu1 %vm1897_vm6, %v3320_v28 }
 0x91c   : > { %2919 = vmatpush3.msk.msra.mxu1 %vm1897_vm6, %v3320_v28 }
 0x91d   : > { %2921 = vmatmul.mubr.msk.f32.vlgmr.msra.gmra.mrb[18].mxu1 %vm1893_vm7, %v2278_v25  ;;  %2923 = vmatprep.subr.mxu1 %v3426_v26 }
 0x91e   : > { %2924 = vmatpush3.msra.mxu1 %v3426_v26 }
 0x9f0   : > { %v2922_v27 = vpop.f32.mrb[18].mxu1 }
 0x9f1   : > { %v2052_v29 = vpop.f32.mrb[19].mxu1  ;;  %v2062_v31 = vmul.f32 %v2922_v27, %v3754_v60 }
 0x9f2   : > { %v2061_v30 = vmul.f32 %v2274_v61, %v2052_v29 }
 0x9f4   : > { %2925 = vmatprep.mubr.msk.f32.mxu1 %vm1810_vm5, %v2061_v30 }
 0x9f5   : > { %2926 = vmatmul.mubr.msk.f32.vlgmr.msra.gmra.mrb[20].mxu1 %vm1810_vm5, %v2062_v31 }
 0xac8   : > { %v2927_v33 = vpop.f32.mrb[20].mxu1 }
 0xac9   : > { %2151 = vperm.xlu1 %3308, %v2927_v33   ;;  %v2135_v34 = vpop.f32.mrb[21].mxu1 }
 0xaca   : > { %2146 = vperm.xlu0 %3307, %v2135_v34  }
 0xb48   : > { %v2152_v35 = vpop.permute.xlu1 %2151 }
 0xb49   : > { %v2155_v36 = vmul.f32 %v2152_v35, %v3742_v54  ;;  %v2147_v37 = vpop.permute.xlu0 %2146 }
 0xb4a   : > { %v2154_v38 = vmul.f32 %v2147_v37, %v3738_v52 }
 0xb4b   : > { %2157 = vst [vmem:[%s422_s15 + $0x8] sm:$0xff] %v2155_v36 }
 0xb4c   : > { %2156 = vst [vmem:[%s422_s15] sm:$0xff] %v2154_v38 }
 0xb4d   : > { %3363 = shalt.err (!%p3360_p7)
}
 0xb4e   : > { %s3364_s23 = scalar_lea.hbm %s3807_s19, 256  ;;  %s3368_s26 = scalar_lea.hbm %s3863_s12, 512 }
 0xb4f   : > { %p3365_p8 = scmp.ne.s32.totalorder %s3807_s19, %s3364_s23  ;;  %p3369_p1 = scmp.lt.u32.totalorder %s3807_s19, %s3863_s12 }
 0xb50   : > { %p3370_p0 = scmp.lt.u32.totalorder %s3368_s26, %s3364_s23  ;;  %p3372_p6 = scmp.lt.u32.totalorder %s3364_s23, %s3807_s19 }
 0xb51   : > { %p3366_p11 = pnand %p3365_p8, %p3879_p9 }
 0xb52   : > { %p3371_p5 = por %p3370_p0, %p3369_p1 }
 0xb53   : > { %p3367_p13 = pneg %p3366_p11 }
 0xb54   : > { %p3373_p10 = por %p3372_p6, %p3371_p5 }
 0xb56   : > { %p3374_p12 = pnand %p3373_p10, %p3367_p13 }
 0xb58   : > { %3377 = shalt.err (!%p3374_p12)
}
 0xb59   : > { %s3428_s25 = smov 128   ;;  %s3429_s29 = smov 8  }
 0xb5a   : > { %3251 = dma.vmem_to_hbm [thread:$0]  (%p3879_p9), %s3801_s17, 256, %s3807_s19, %s3810_s20, %s3428_s25, %s3428_s25, %s3429_s29  }
 0xb5b PF: > { %p3263_p2 = scmp.ge.s32.totalorder %s3416_s24, 2  ;;  %s2187_s30 = sand.u32 1, %s3404_s21  }
 0xb5c   : > { %p3880_p3 = scmp.ne.s32.totalorder %s3871_s14, 0  ;;  %s2188_s23 = scalar_lea.sflag [#allocation5], %s2187_s30 }
 0xb5e   : > { %p3258_p4 = pnand %p3263_p2, %p3880_p3 }
 0xb60   : > { %3399 = dma.done.wait (!%p3258_p4), %s2188_s23, 256  }
 0xb61   : > { %3401 = vsyncadd (!%p3258_p4), %s2188_s23, 4294967040  ;;  %s3881_s15 = sld [smem:[#allocation9_spill]]  ;;  %s3882_s23 = sld [smem:[#allocation10_spill]] }
 0xb62   : > { %p23_p7 = scmp.ge.s32.totalorder %s3520_s27, 4   ;;  %s3883_s21 = smov %s3408_s22 }
 0xb63   : > { %s3885_s24 = smov %s3520_s27 }
 0xb64   :  { %25 = sbr.rel (!%p23_p7) target bundleno = 4 (0x4), region = 108 }
 0xb67   : > { %s3884_s22 = smov %s3881_s15 }
 0xb6b   :  { %2193 = vsyncpa [#allocation4], 1 }
 0xb6c   :  { %2195 = vsyncpa [#allocation4 + $0x1], 1 }
 0xb6d   :  { %2196 = vsyncpa [#allocation5], 1 }
 0xb6e   :  { %2198 = vsyncpa [#allocation5 + $0x1], 1 }

</bundles_post_ra>
